<compile_context>
chip_gen: v6e
topology: v6e:2x2x1
jax: 0.10.0
libtpu: 0.0.40
codegen_flags: <defaults>
</compile_context>

<pallas_src>
import math
import functools

import jax
import jax.numpy as jnp
from jax import lax
from jax.experimental import pallas as pl
from jax.experimental.pallas import tpu as pltpu

VMEM_SPEC = pl.BlockSpec(memory_space=pltpu.MemorySpace.VMEM)

CFG = dict(
    seq_len=32, enc_in=4, d_model=32, n_heads=4, d_ff=64, e_layers=2,
    num_class=4, patch_len=16, stride=8, text_dim=384, activation="gelu",
)


# ------------------------------- helpers / constants --------------------------------

def _round8(v):
    return ((v + 7) // 8) * 8


def _gvec_offsets(H, N, B, CK):
    r_hmask = 4
    r_rep = _round8(r_hmask + H)
    r_sb = _round8(r_rep + N)
    r_sk = _round8(r_sb + B)
    rows = r_sk + CK
    return r_hmask, r_rep, r_sb, r_sk, rows


def sinusoidal_pe(max_len, d_model):
    position = jnp.arange(max_len, dtype=jnp.float32)[:, None]
    div_term = jnp.exp(
        jnp.arange(0, d_model, 2, dtype=jnp.float32) * -(math.log(10000.0) / d_model)
    )
    pe = jnp.zeros((max_len, d_model), jnp.float32)
    pe = pe.at[:, 0::2].set(jnp.sin(position * div_term))
    pe = pe.at[:, 1::2].set(jnp.cos(position * div_term))
    return pe


def _build_constants(cfg, B):
    S, C, D, H = cfg["seq_len"], cfg["enc_in"], cfg["d_model"], cfg["n_heads"]
    K = cfg["num_class"]
    patch_len, stride = cfg["patch_len"], cfg["stride"]
    P = (S - patch_len) // stride + 2          # number of patches after pad + unfold
    L = P + 1                                  # + text token
    N = B * C                                  # series count (row n = b*C + c)
    T = L * N                                  # total tokens (L-major rows: l*N + n)
    E = D // H

    # row-repeated positional encoding: pe_rep[p*N + n] = pe[p]
    pe_rep = jnp.repeat(sinusoidal_pe(P, D), N, axis=0)                 # (P*N, D)

    # 0/1 head-feature masks: head h owns features [h*E, (h+1)*E)
    hmask = jnp.zeros((H, D), jnp.float32)
    for h in range(H):
        hmask = hmask.at[h, h * E:(h + 1) * E].set(1.0)

    # additive sample-block mask for the expanded score matrix (H*T, T):
    # row r = h*T + l*N + n may only attend columns m = l'*N + n (same series n)
    r = jnp.arange(H * T)[:, None] % N
    m = jnp.arange(T)[None, :] % N
    amask = jnp.where(r == m, 0.0, -1e30).astype(jnp.float32)           # (H*T, T)

    n_idx = jnp.arange(N)
    # text-token replication: txt_rows = Rep @ txt,  Rep[n, b] = 1 iff n//C == b
    rep = (n_idx[:, None] // C == jnp.arange(B)[None, :]).astype(jnp.float32)   # (N, B)
    # batch row-collapse for logits: Sb[b, n] = 1 iff n//C == b
    sb = (jnp.arange(B)[:, None] == (n_idx // C)[None, :]).astype(jnp.float32)  # (B, N)
    # channel-selection mask on g (N, C*K): keep only block c == n % C
    ck_c = jnp.arange(C * K) // K
    selmask = (ck_c[None, :] == (n_idx % C)[:, None]).astype(jnp.float32)       # (N, C*K)
    # collapse the C blocks and pad logits to 128 lanes: Sk[c*K + k, k] = 1
    sk = jnp.zeros((C * K, 128), jnp.float32)
    sk = sk.at[jnp.arange(C * K), jnp.arange(C * K) % K].set(1.0)               # (C*K, 128)

    return dict(pe_rep=pe_rep, hmask=hmask, amask=amask, rep=rep, sb=sb,
                selmask=selmask, sk=sk, P=P, L=L, N=N, T=T)


# --------------------------- fused forward kernel --------------------------

def _fused_forward_kernel(
    x_ref, xt_ref, wvp_ref, wtext_ref,
    wqkv_ref, wo_ref, w1_ref, w2_ref, pvec_ref,
    gvec_ref, amask_ref, headA_ref,
    logits_ref, emb_ref,
    *, B, C, S, D, H, L, P, K, dff, patch_len, stride, e_layers, activation,
    r_hmask, r_rep, r_sb, r_sk):
  f32 = jnp.float32
  N = B * C
  T = L * N
  E = D // H
  scale = 1.0 / math.sqrt(E)

  gvec = gvec_ref[...]                                        # (gvec_rows, 128)
  hmask = gvec[r_hmask:r_hmask + H, 0:D]                      # (H, D) 0/1

  # ---- 1) per-series instance norm over time (time on lanes) ----
  x = x_ref[...].astype(f32)                                  # (N, S)
  mean = jnp.mean(x, axis=-1, keepdims=True)
  xc = x - mean
  var = jnp.mean(xc * xc, axis=-1, keepdims=True)
  xn = xc * lax.rsqrt(var + 1e-5)                             # (N, S)

  # ---- 2) patch embedding: ReplicationPad1d((0, stride)) + unfold + linear + PE ----
  last = xn[:, S - 1:S]                                       # (N, 1)
  pad = jnp.broadcast_to(last, (N, stride))                   # (N, stride)
  xp = jnp.concatenate([xn, pad], axis=-1)                    # (N, S + stride)
  # batched patch slab: row p*N + n holds patch p of series n
  patch_slab = jnp.concatenate(
      [xp[:, p * stride: p * stride + patch_len] for p in range(P)],
      axis=0)                                                 # (P*N, patch_len)
  wval = wvp_ref[0:patch_len, :]                              # (patch_len, D)
  pe_rep = wvp_ref[patch_len:patch_len + P * N, :]            # (P*N, D)
  tok_all = jnp.dot(patch_slab, wval,
                    preferred_element_type=f32) + pe_rep      # (P*N, D)

  # ---- 3) text token (linear 384 -> D), replicated to every channel row ----
  b_text = gvec[0:1, 0:D]
  txt = jnp.dot(xt_ref[...].astype(f32), wtext_ref[...],
                preferred_element_type=f32) + b_text          # (B, D)
  rep = gvec[r_rep:r_rep + N, 0:B]                            # (N, B) 0/1
  txt_rows = jnp.dot(rep, txt, preferred_element_type=f32)    # (N, D)

  # token tensor in L-major row order: row l*N + n   -> (T, D)
  xtok = jnp.concatenate([tok_all, txt_rows], axis=0)

  amask = amask_ref[...]                                      # (H*T, T) additive

  def layer_norm(v, g, b):
    mu = jnp.mean(v, axis=-1, keepdims=True)
    vc = v - mu
    vv = jnp.mean(vc * vc, axis=-1, keepdims=True)
    return vc * lax.rsqrt(vv + 1e-5) * g + b

  # ---- 4) transformer encoder layers ----
  for lyr in range(e_layers):
    pv = pvec_ref[lyr]                                        # (8, 128) packed vectors
    bqkv = pv[0:1, 0:3 * D]
    b1 = pv[1:2, 0:dff]
    bo = pv[2:3, 0:D]
    b2 = pv[3:4, 0:D]
    ln1_g = pv[4:5, 0:D]
    ln1_b = pv[5:6, 0:D]
    ln2_g = pv[6:7, 0:D]
    ln2_b = pv[7:8, 0:D]

    qkv = jnp.dot(xtok, wqkv_ref[lyr],
                  preferred_element_type=f32) + bqkv          # (T, 3D)
    q = qkv[:, 0:D]
    k = qkv[:, D:2 * D]
    v = qkv[:, 2 * D:3 * D]

    # head-expanded queries: rows h*T + r hold q[r] masked to head h's features
    qh = jnp.concatenate([q * hmask[h:h + 1, :] for h in range(H)], axis=0)  # (H*T, D)

    # per-head scores in one full-width matmul; cross-series columns masked
    s = lax.dot_general(qh, k, (((1,), (1,)), ((), ())),
                        preferred_element_type=f32) * scale + amask          # (H*T, T)
    s = s - jnp.max(s, axis=-1, keepdims=True)
    pexp = jnp.exp(s)
    psum = jnp.sum(pexp, axis=-1, keepdims=True)
    pattn = pexp * pl.reciprocal(psum, approx=True)

    oh = jnp.dot(pattn, v, preferred_element_type=f32)                       # (H*T, D)
    # collapse heads: head h's rows contribute only its own feature block
    o = sum(oh[h * T:(h + 1) * T, :] * hmask[h:h + 1, :] for h in range(H))  # (T, D)

    attn_out = jnp.dot(o, wo_ref[lyr], preferred_element_type=f32) + bo
    xres = layer_norm(xtok + attn_out, ln1_g, ln1_b)

    y = jnp.dot(xres, w1_ref[lyr], preferred_element_type=f32) + b1
    if activation == "gelu":
      # TODO(synk): reference F.gelu is exact (erf); tanh approximation used in-kernel.
      y = jax.nn.gelu(y, approximate=True)
    else:
      y = jnp.maximum(y, 0.0)
    y = jnp.dot(y, w2_ref[lyr], preferred_element_type=f32) + b2
    xtok = layer_norm(xres + y, ln2_g, ln2_b)

  # ---- final encoder LayerNorm ----
  xtok = layer_norm(xtok, gvec[1:2, 0:D], gvec[2:3, 0:D])                    # (T, D)

  # ---- 5) head ----
  # f2[n, l*D + d] = xtok[l*N + n, d]; emitted as the raw emb output (the reference
  # permute(0,1,3,2)+flatten is layout plumbing done in the jitted wrapper).
  f2 = jnp.concatenate([xtok[l * N:(l + 1) * N, :] for l in range(L)], axis=1)  # (N, L*D)

  headA = headA_ref[...]                                      # (L*D + N, C*K)
  wp_all = headA[0:L * D, :]                                  # re-permuted W_proj
  selmask = headA[L * D:L * D + N, :]                         # (N, C*K) 0/1
  g = jnp.dot(f2, wp_all, preferred_element_type=f32) * selmask        # (N, C*K)
  sk = gvec[r_sk:r_sk + C * K, :]                                      # (C*K, 128)
  gk = jnp.dot(g, sk, preferred_element_type=f32)                      # (N, 128)
  sb = gvec[r_sb:r_sb + B, 0:N]                                        # (B, N)
  logits = jnp.dot(sb, gk, preferred_element_type=f32) + gvec[3:4, :]  # (B, 128)

  emb_ref[...] = f2.astype(emb_ref.dtype)
  logits_ref[...] = logits.astype(logits_ref.dtype)


# ------------------------------ params, packing & wrapper ---------------------------

def init_params(key, cfg):
    keyit = iter(jax.random.split(key, 64))

    def dense(fin, fout):
        return 0.02 * jax.random.normal(next(keyit), (fin, fout), jnp.float32)

    D, dff, Lyr = cfg["d_model"], cfg["d_ff"], cfg["e_layers"]
    P = (cfg["seq_len"] - cfg["patch_len"]) // cfg["stride"] + 2
    head_nf = D * (P + 1)

    params = {
        "W_val": dense(cfg["patch_len"], D),                   # value_embedding (no bias)
        "W_text": dense(cfg["text_dim"], D),                   # layer_text
        "b_text": jnp.zeros((1, D), jnp.float32),
        "Wqkv": jnp.stack([dense(D, 3 * D) for _ in range(Lyr)]),   # fused q/k/v
        "bqkv": jnp.zeros((Lyr, 1, 3 * D), jnp.float32),
        "Wo": jnp.stack([dense(D, D) for _ in range(Lyr)]),
        "bo": jnp.zeros((Lyr, 1, D), jnp.float32),
        "W1": jnp.stack([dense(D, dff) for _ in range(Lyr)]),
        "b1": jnp.zeros((Lyr, 1, dff), jnp.float32),
        "W2": jnp.stack([dense(dff, D) for _ in range(Lyr)]),
        "b2": jnp.zeros((Lyr, 1, D), jnp.float32),
        "ln1_g": jnp.ones((Lyr, 1, D), jnp.float32),
        "ln1_b": jnp.zeros((Lyr, 1, D), jnp.float32),
        "ln2_g": jnp.ones((Lyr, 1, D), jnp.float32),
        "ln2_b": jnp.zeros((Lyr, 1, D), jnp.float32),
        "ln_f_g": jnp.ones((1, D), jnp.float32),
        "ln_f_b": jnp.zeros((1, D), jnp.float32),
        "W_proj": dense(head_nf * cfg["enc_in"], cfg["num_class"]),
        "b_proj": jnp.zeros((1, cfg["num_class"]), jnp.float32),
    }
    return params


def pack_params(params, cfg, B):
    """One-time packing of params + constants into few, DMA-friendly slabs."""
    S, C, D, H = cfg["seq_len"], cfg["enc_in"], cfg["d_model"], cfg["n_heads"]
    K, dff, Lyr = cfg["num_class"], cfg["d_ff"], cfg["e_layers"]
    patch_len = cfg["patch_len"]
    consts = _build_constants(cfg, B)
    P, L, N = consts["P"], consts["L"], consts["N"]

    # value-embedding weight + row-repeated PE in one slab
    wvp = jnp.concatenate([params["W_val"], consts["pe_rep"]], axis=0)   # (pl + P*N, D)

    # per-layer vectors packed into (Lyr, 8, 128)
    def _row(v, width):
        r = jnp.zeros((Lyr, 1, 128), jnp.float32)
        return r.at[:, 0, :width].set(v.reshape(Lyr, width))
    pvec = jnp.concatenate([
        _row(params["bqkv"], 3 * D), _row(params["b1"], dff),
        _row(params["bo"], D), _row(params["b2"], D),
        _row(params["ln1_g"], D), _row(params["ln1_b"], D),
        _row(params["ln2_g"], D), _row(params["ln2_b"], D),
    ], axis=1)                                                           # (Lyr, 8, 128)

    # global vectors / small 0-1 matrices packed into one (rows, 128) slab
    r_hmask, r_rep, r_sb, r_sk, rows = _gvec_offsets(H, N, B, C * K)
    gvec = jnp.zeros((rows, 128), jnp.float32)
    gvec = gvec.at[0, :D].set(params["b_text"].reshape(D))
    gvec = gvec.at[1, :D].set(params["ln_f_g"].reshape(D))
    gvec = gvec.at[2, :D].set(params["ln_f_b"].reshape(D))
    gvec = gvec.at[3, :K].set(params["b_proj"].reshape(K))
    gvec = gvec.at[r_hmask:r_hmask + H, :D].set(consts["hmask"])
    gvec = gvec.at[r_rep:r_rep + N, :B].set(consts["rep"])
    gvec = gvec.at[r_sb:r_sb + B, :N].set(consts["sb"])
    gvec = gvec.at[r_sk:r_sk + C * K, :].set(consts["sk"])

    # re-permuted projection weight (folds the permute(0,1,3,2)+flatten ordering)
    # Wp_all[l*D + d, c*K + k] = W_proj[c*D*L + d*L + l, k]
    wp_all = params["W_proj"].reshape(C, D, L, K).transpose(2, 1, 0, 3).reshape(L * D, C * K)
    headA = jnp.concatenate([wp_all, consts["selmask"]], axis=0)         # (L*D + N, C*K)

    return dict(
        wvp=wvp, W_text=params["W_text"], Wqkv=params["Wqkv"], Wo=params["Wo"],
        W1=params["W1"], W2=params["W2"], pvec=pvec, gvec=gvec,
        amask=consts["amask"], headA=headA)


def make_forward(cfg, batch):
    B = batch
    S, C, D, H = cfg["seq_len"], cfg["enc_in"], cfg["d_model"], cfg["n_heads"]
    K, dff = cfg["num_class"], cfg["d_ff"]
    patch_len, stride = cfg["patch_len"], cfg["stride"]
    e_layers = cfg["e_layers"]
    P = (S - patch_len) // stride + 2
    L = P + 1
    N = B * C
    r_hmask, r_rep, r_sb, r_sk, _ = _gvec_offsets(H, N, B, C * K)

    kernel = functools.partial(
        _fused_forward_kernel, B=B, C=C, S=S, D=D, H=H, L=L, P=P, K=K, dff=dff,
        patch_len=patch_len, stride=stride, e_layers=e_layers,
        activation=cfg["activation"],
        r_hmask=r_hmask, r_rep=r_rep, r_sb=r_sb, r_sk=r_sk)

    fused_call = pl.pallas_call(
        kernel,
        out_shape=(jax.ShapeDtypeStruct((B, 128), jnp.float32),      # lane-dense logits
                   jax.ShapeDtypeStruct((N, L * D), jnp.float32)),   # raw emb slab (f2)
        in_specs=[VMEM_SPEC] * 12,
        out_specs=(VMEM_SPEC, VMEM_SPEC),
    )

    @jax.jit
    def forward(packed, x_time, x_text_emb):
        # (B, S, C) -> (B*C, S): series on sublanes, time on lanes (tiny XLA transpose)
        x_tc = jnp.transpose(x_time, (0, 2, 1)).reshape(N, S)
        logits_pad, f2 = fused_call(
            x_tc, x_text_emb,
            packed["wvp"], packed["W_text"],
            packed["Wqkv"], packed["Wo"], packed["W1"], packed["W2"],
            packed["pvec"], packed["gvec"], packed["amask"], packed["headA"])
        logits = logits_pad[:, :K]
        # reference layout: reshape(B,C,L,D) -> permute(0,1,3,2) -> flatten
        emb = f2.reshape(B, C, L, D).transpose(0, 1, 3, 2).reshape(B, C * D * L)
        return logits, emb

    return forward


if __name__ == "__main__":
    cfg = CFG
    B = 2
    key = jax.random.PRNGKey(0)
    kx, kt, kp = jax.random.split(key, 3)

    x_time = jax.random.normal(kx, (B, cfg["seq_len"], cfg["enc_in"]), jnp.float32)
    # TODO(synk): SentenceTransformer text encoder has no Pallas equivalent; the forward
    # consumes a precomputed 384-d sentence embedding (output of lm_model.encode) instead.
    x_text_emb = jax.random.normal(kt, (B, cfg["text_dim"]), jnp.float32)

    params = init_params(kp, cfg)
    packed = pack_params(params, cfg, B)
    forward = make_forward(cfg, B)
    out, emb = forward(packed, x_time, x_text_emb)
    jax.block_until_ready((out, emb))

    P = (cfg["seq_len"] - cfg["patch_len"]) // cfg["stride"] + 2
    assert out.shape == (B, cfg["num_class"])
    assert emb.shape == (B, cfg["enc_in"] * cfg["d_model"] * (P + 1))
    assert bool(jnp.all(jnp.isfinite(out))) and bool(jnp.all(jnp.isfinite(emb)))
    print("KERNEL_OK")
</pallas_src>

<mosaic_0001>
module attributes {stable_mosaic.version = 11 : i64} {
  func.func @_fused_forward_kernel(%arg0: memref<8x32xf32, #tpu.memory_space<vmem>>, %arg1: memref<2x384xf32, #tpu.memory_space<vmem>>, %arg2: memref<48x32xf32, #tpu.memory_space<vmem>>, %arg3: memref<384x32xf32, #tpu.memory_space<vmem>>, %arg4: memref<2x32x96xf32, #tpu.memory_space<vmem>>, %arg5: memref<2x32x32xf32, #tpu.memory_space<vmem>>, %arg6: memref<2x32x64xf32, #tpu.memory_space<vmem>>, %arg7: memref<2x64x32xf32, #tpu.memory_space<vmem>>, %arg8: memref<2x8x128xf32, #tpu.memory_space<vmem>>, %arg9: memref<40x128xf32, #tpu.memory_space<vmem>>, %arg10: memref<160x40xf32, #tpu.memory_space<vmem>>, %arg11: memref<168x16xf32, #tpu.memory_space<vmem>>, %arg12: memref<2x128xf32, #tpu.memory_space<vmem>>, %arg13: memref<8x160xf32, #tpu.memory_space<vmem>>) attributes {dimension_semantics = [], scalar_prefetch = 0 : i64, scratch_operands = 0 : i64, tpu.core_type = #tpu.core_type<tc>} {
    %c0 = arith.constant 0 : index
    %c0_0 = arith.constant 0 : index
    %0 = vector.load %arg9[%c0, %c0_0] : memref<40x128xf32, #tpu.memory_space<vmem>>, vector<40x128xf32>
    %1 = vector.extract_strided_slice %0 {offsets = [4, 0], sizes = [4, 32], strides = [1, 1]} : vector<40x128xf32> to vector<4x32xf32>
    %c0_1 = arith.constant 0 : index
    %c0_2 = arith.constant 0 : index
    %2 = vector.load %arg0[%c0_1, %c0_2] : memref<8x32xf32, #tpu.memory_space<vmem>>, vector<8x32xf32>
    %cst = arith.constant dense<0.000000e+00> : vector<8xf32>
    %3 = vector.multi_reduction <add>, %2, %cst [1] : vector<8x32xf32> to vector<8xf32>
    %4 = vector.shape_cast %3 : vector<8xf32> to vector<8x1xf32>
    %cst_3 = arith.constant 3.200000e+01 : f32
    %5 = vector.broadcast %cst_3 : f32 to vector<8x1xf32>
    %6 = arith.divf %4, %5 : vector<8x1xf32>
    %7 = vector.broadcast %6 : vector<8x1xf32> to vector<8x32xf32>
    %8 = arith.subf %2, %7 : vector<8x32xf32>
    %9 = arith.mulf %8, %8 : vector<8x32xf32>
    %cst_4 = arith.constant dense<0.000000e+00> : vector<8xf32>
    %10 = vector.multi_reduction <add>, %9, %cst_4 [1] : vector<8x32xf32> to vector<8xf32>
    %11 = vector.shape_cast %10 : vector<8xf32> to vector<8x1xf32>
    %cst_5 = arith.constant 3.200000e+01 : f32
    %12 = vector.broadcast %cst_5 : f32 to vector<8x1xf32>
    %13 = arith.divf %11, %12 : vector<8x1xf32>
    %cst_6 = arith.constant 9.99999974E-6 : f32
    %14 = vector.broadcast %cst_6 : f32 to vector<8x1xf32>
    %15 = arith.addf %13, %14 : vector<8x1xf32>
    %16 = math.rsqrt %15 : vector<8x1xf32>
    %17 = vector.broadcast %16 : vector<8x1xf32> to vector<8x32xf32>
    %18 = arith.mulf %8, %17 : vector<8x32xf32>
    %19 = vector.extract_strided_slice %18 {offsets = [0, 31], sizes = [8, 1], strides = [1, 1]} : vector<8x32xf32> to vector<8x1xf32>
    %20 = vector.shape_cast %19 : vector<8x1xf32> to vector<8x1xf32>
    %21 = vector.broadcast %20 : vector<8x1xf32> to vector<8x8xf32>
    %22 = tpu.concatenate %18, %21 in 1 : vector<8x32xf32>, vector<8x8xf32> -> vector<8x40xf32>
    %23 = vector.extract_strided_slice %22 {offsets = [0, 0], sizes = [8, 16], strides = [1, 1]} : vector<8x40xf32> to vector<8x16xf32>
    %24 = vector.extract_strided_slice %22 {offsets = [0, 8], sizes = [8, 16], strides = [1, 1]} : vector<8x40xf32> to vector<8x16xf32>
    %25 = vector.extract_strided_slice %22 {offsets = [0, 16], sizes = [8, 16], strides = [1, 1]} : vector<8x40xf32> to vector<8x16xf32>
    %26 = vector.extract_strided_slice %22 {offsets = [0, 24], sizes = [8, 16], strides = [1, 1]} : vector<8x40xf32> to vector<8x16xf32>
    %27 = tpu.concatenate %23, %24, %25, %26 in 0 : vector<8x16xf32>, vector<8x16xf32>, vector<8x16xf32>, vector<8x16xf32> -> vector<32x16xf32>
    %c0_7 = arith.constant 0 : index
    %c0_8 = arith.constant 0 : index
    %28 = vector.load %arg2[%c0_7, %c0_8] : memref<48x32xf32, #tpu.memory_space<vmem>>, vector<16x32xf32>
    %c16 = arith.constant 16 : index
    %c0_9 = arith.constant 0 : index
    %29 = vector.load %arg2[%c16, %c0_9] : memref<48x32xf32, #tpu.memory_space<vmem>>, vector<32x32xf32>
    %cst_10 = arith.constant dense<0.000000e+00> : vector<32x32xf32>
    %30 = tpu.matmul %27, %28, %cst_10 {dimension_numbers = #tpu.dot_dimension_numbers<[1], [0], [0], [1], [0, 0, 1, 1], [], []>} : vector<32x16xf32>, vector<16x32xf32>, vector<32x32xf32> -> vector<32x32xf32>
    %31 = arith.addf %30, %29 : vector<32x32xf32>
    %32 = vector.extract_strided_slice %0 {offsets = [0, 0], sizes = [1, 32], strides = [1, 1]} : vector<40x128xf32> to vector<1x32xf32>
    %c0_11 = arith.constant 0 : index
    %c0_12 = arith.constant 0 : index
    %33 = vector.load %arg1[%c0_11, %c0_12] : memref<2x384xf32, #tpu.memory_space<vmem>>, vector<2x384xf32>
    %c0_13 = arith.constant 0 : index
    %c0_14 = arith.constant 0 : index
    %34 = vector.load %arg3[%c0_13, %c0_14] : memref<384x32xf32, #tpu.memory_space<vmem>>, vector<384x32xf32>
    %cst_15 = arith.constant dense<0.000000e+00> : vector<2x32xf32>
    %35 = tpu.matmul %33, %34, %cst_15 {dimension_numbers = #tpu.dot_dimension_numbers<[1], [0], [0], [1], [0, 0, 1, 1], [], []>} : vector<2x384xf32>, vector<384x32xf32>, vector<2x32xf32> -> vector<2x32xf32>
    %36 = vector.broadcast %32 : vector<1x32xf32> to vector<2x32xf32>
    %37 = arith.addf %35, %36 : vector<2x32xf32>
    %38 = vector.extract_strided_slice %0 {offsets = [8, 0], sizes = [8, 2], strides = [1, 1]} : vector<40x128xf32> to vector<8x2xf32>
    %cst_16 = arith.constant dense<0.000000e+00> : vector<8x32xf32>
    %39 = tpu.matmul %38, %37, %cst_16 {dimension_numbers = #tpu.dot_dimension_numbers<[1], [0], [0], [1], [0, 0, 1, 1], [], []>} : vector<8x2xf32>, vector<2x32xf32>, vector<8x32xf32> -> vector<8x32xf32>
    %40 = tpu.concatenate %31, %39 in 0 : vector<32x32xf32>, vector<8x32xf32> -> vector<40x32xf32>
    %c0_17 = arith.constant 0 : index
    %c0_18 = arith.constant 0 : index
    %41 = vector.load %arg10[%c0_17, %c0_18] : memref<160x40xf32, #tpu.memory_space<vmem>>, vector<160x40xf32>
    %c0_19 = arith.constant 0 : index
    %c0_20 = arith.constant 0 : index
    %c0_21 = arith.constant 0 : index
    %42 = vector.load %arg8[%c0_19, %c0_20, %c0_21] : memref<2x8x128xf32, #tpu.memory_space<vmem>>, vector<1x8x128xf32>
    %43 = vector.shape_cast %42 : vector<1x8x128xf32> to vector<8x128xf32>
    %44 = vector.extract_strided_slice %43 {offsets = [0, 0], sizes = [1, 96], strides = [1, 1]} : vector<8x128xf32> to vector<1x96xf32>
    %45 = vector.extract_strided_slice %43 {offsets = [1, 0], sizes = [1, 64], strides = [1, 1]} : vector<8x128xf32> to vector<1x64xf32>
    %46 = vector.extract_strided_slice %43 {offsets = [2, 0], sizes = [1, 32], strides = [1, 1]} : vector<8x128xf32> to vector<1x32xf32>
    %47 = vector.extract_strided_slice %43 {offsets = [3, 0], sizes = [1, 32], strides = [1, 1]} : vector<8x128xf32> to vector<1x32xf32>
    %48 = vector.extract_strided_slice %43 {offsets = [4, 0], sizes = [1, 32], strides = [1, 1]} : vector<8x128xf32> to vector<1x32xf32>
    %49 = vector.extract_strided_slice %43 {offsets = [5, 0], sizes = [1, 32], strides = [1, 1]} : vector<8x128xf32> to vector<1x32xf32>
    %50 = vector.extract_strided_slice %43 {offsets = [6, 0], sizes = [1, 32], strides = [1, 1]} : vector<8x128xf32> to vector<1x32xf32>
    %51 = vector.extract_strided_slice %43 {offsets = [7, 0], sizes = [1, 32], strides = [1, 1]} : vector<8x128xf32> to vector<1x32xf32>
    %c0_22 = arith.constant 0 : index
    %c0_23 = arith.constant 0 : index
    %c0_24 = arith.constant 0 : index
    %52 = vector.load %arg4[%c0_22, %c0_23, %c0_24] : memref<2x32x96xf32, #tpu.memory_space<vmem>>, vector<1x32x96xf32>
    %53 = vector.shape_cast %52 : vector<1x32x96xf32> to vector<32x96xf32>
    %cst_25 = arith.constant dense<0.000000e+00> : vector<40x96xf32>
    %54 = tpu.matmul %40, %53, %cst_25 {dimension_numbers = #tpu.dot_dimension_numbers<[1], [0], [0], [1], [0, 0, 1, 1], [], []>} : vector<40x32xf32>, vector<32x96xf32>, vector<40x96xf32> -> vector<40x96xf32>
    %55 = vector.broadcast %44 : vector<1x96xf32> to vector<40x96xf32>
    %56 = arith.addf %54, %55 : vector<40x96xf32>
    %57 = vector.extract_strided_slice %56 {offsets = [0, 0], sizes = [40, 32], strides = [1, 1]} : vector<40x96xf32> to vector<40x32xf32>
    %58 = vector.extract_strided_slice %56 {offsets = [0, 32], sizes = [40, 32], strides = [1, 1]} : vector<40x96xf32> to vector<40x32xf32>
    %59 = vector.extract_strided_slice %56 {offsets = [0, 64], sizes = [40, 32], strides = [1, 1]} : vector<40x96xf32> to vector<40x32xf32>
    %60 = vector.extract_strided_slice %1 {offsets = [0, 0], sizes = [1, 32], strides = [1, 1]} : vector<4x32xf32> to vector<1x32xf32>
    %61 = vector.broadcast %60 : vector<1x32xf32> to vector<40x32xf32>
    %62 = arith.mulf %57, %61 : vector<40x32xf32>
    %63 = vector.extract_strided_slice %1 {offsets = [1, 0], sizes = [1, 32], strides = [1, 1]} : vector<4x32xf32> to vector<1x32xf32>
    %64 = vector.broadcast %63 : vector<1x32xf32> to vector<40x32xf32>
    %65 = arith.mulf %57, %64 : vector<40x32xf32>
    %66 = vector.extract_strided_slice %1 {offsets = [2, 0], sizes = [1, 32], strides = [1, 1]} : vector<4x32xf32> to vector<1x32xf32>
    %67 = vector.broadcast %66 : vector<1x32xf32> to vector<40x32xf32>
    %68 = arith.mulf %57, %67 : vector<40x32xf32>
    %69 = vector.extract_strided_slice %1 {offsets = [3, 0], sizes = [1, 32], strides = [1, 1]} : vector<4x32xf32> to vector<1x32xf32>
    %70 = vector.broadcast %69 : vector<1x32xf32> to vector<40x32xf32>
    %71 = arith.mulf %57, %70 : vector<40x32xf32>
    %72 = tpu.concatenate %62, %65, %68, %71 in 0 : vector<40x32xf32>, vector<40x32xf32>, vector<40x32xf32>, vector<40x32xf32> -> vector<160x32xf32>
    %cst_26 = arith.constant dense<0.000000e+00> : vector<160x40xf32>
    %73 = tpu.matmul %72, %58, %cst_26 {dimension_numbers = #tpu.dot_dimension_numbers<[1], [1], [0], [0], [0, 0, 1, 0], [], []>} : vector<160x32xf32>, vector<40x32xf32>, vector<160x40xf32> -> vector<160x40xf32>
    %cst_27 = arith.constant 0.353553385 : f32
    %74 = vector.broadcast %cst_27 : f32 to vector<160x40xf32>
    %75 = arith.mulf %73, %74 : vector<160x40xf32>
    %76 = arith.addf %75, %41 : vector<160x40xf32>
    %cst_28 = arith.constant dense<0xFF800000> : vector<160xf32>
    %77 = vector.multi_reduction <maximumf>, %76, %cst_28 [1] : vector<160x40xf32> to vector<160xf32>
    %78 = vector.shape_cast %77 : vector<160xf32> to vector<160x1xf32>
    %79 = vector.broadcast %78 : vector<160x1xf32> to vector<160x40xf32>
    %80 = arith.subf %76, %79 : vector<160x40xf32>
    %81 = math.exp %80 : vector<160x40xf32>
    %cst_29 = arith.constant dense<0.000000e+00> : vector<160xf32>
    %82 = vector.multi_reduction <add>, %81, %cst_29 [1] : vector<160x40xf32> to vector<160xf32>
    %83 = vector.shape_cast %82 : vector<160xf32> to vector<160x1xf32>
    %84 = tpu.reciprocal %83 {approx = true} : vector<160x1xf32> -> vector<160x1xf32>
    %85 = vector.broadcast %84 : vector<160x1xf32> to vector<160x40xf32>
    %86 = arith.mulf %81, %85 : vector<160x40xf32>
    %cst_30 = arith.constant dense<0.000000e+00> : vector<160x32xf32>
    %87 = tpu.matmul %86, %59, %cst_30 {dimension_numbers = #tpu.dot_dimension_numbers<[1], [0], [0], [1], [0, 0, 1, 1], [], []>} : vector<160x40xf32>, vector<40x32xf32>, vector<160x32xf32> -> vector<160x32xf32>
    %88 = vector.extract_strided_slice %87 {offsets = [0, 0], sizes = [40, 32], strides = [1, 1]} : vector<160x32xf32> to vector<40x32xf32>
    %89 = vector.extract_strided_slice %1 {offsets = [0, 0], sizes = [1, 32], strides = [1, 1]} : vector<4x32xf32> to vector<1x32xf32>
    %90 = vector.broadcast %89 : vector<1x32xf32> to vector<40x32xf32>
    %91 = arith.mulf %88, %90 : vector<40x32xf32>
    %cst_31 = arith.constant 0.000000e+00 : f32
    %92 = vector.broadcast %cst_31 : f32 to vector<40x32xf32>
    %93 = arith.addf %92, %91 : vector<40x32xf32>
    %94 = vector.extract_strided_slice %87 {offsets = [40, 0], sizes = [40, 32], strides = [1, 1]} : vector<160x32xf32> to vector<40x32xf32>
    %95 = vector.extract_strided_slice %1 {offsets = [1, 0], sizes = [1, 32], strides = [1, 1]} : vector<4x32xf32> to vector<1x32xf32>
    %96 = vector.broadcast %95 : vector<1x32xf32> to vector<40x32xf32>
    %97 = arith.mulf %94, %96 : vector<40x32xf32>
    %98 = arith.addf %93, %97 : vector<40x32xf32>
    %99 = vector.extract_strided_slice %87 {offsets = [80, 0], sizes = [40, 32], strides = [1, 1]} : vector<160x32xf32> to vector<40x32xf32>
    %100 = vector.extract_strided_slice %1 {offsets = [2, 0], sizes = [1, 32], strides = [1, 1]} : vector<4x32xf32> to vector<1x32xf32>
    %101 = vector.broadcast %100 : vector<1x32xf32> to vector<40x32xf32>
    %102 = arith.mulf %99, %101 : vector<40x32xf32>
    %103 = arith.addf %98, %102 : vector<40x32xf32>
    %104 = vector.extract_strided_slice %87 {offsets = [120, 0], sizes = [40, 32], strides = [1, 1]} : vector<160x32xf32> to vector<40x32xf32>
    %105 = vector.extract_strided_slice %1 {offsets = [3, 0], sizes = [1, 32], strides = [1, 1]} : vector<4x32xf32> to vector<1x32xf32>
    %106 = vector.broadcast %105 : vector<1x32xf32> to vector<40x32xf32>
    %107 = arith.mulf %104, %106 : vector<40x32xf32>
    %108 = arith.addf %103, %107 : vector<40x32xf32>
    %c0_32 = arith.constant 0 : index
    %c0_33 = arith.constant 0 : index
    %c0_34 = arith.constant 0 : index
    %109 = vector.load %arg5[%c0_32, %c0_33, %c0_34] : memref<2x32x32xf32, #tpu.memory_space<vmem>>, vector<1x32x32xf32>
    %110 = vector.shape_cast %109 : vector<1x32x32xf32> to vector<32x32xf32>
    %cst_35 = arith.constant dense<0.000000e+00> : vector<40x32xf32>
    %111 = tpu.matmul %108, %110, %cst_35 {dimension_numbers = #tpu.dot_dimension_numbers<[1], [0], [0], [1], [0, 0, 1, 1], [], []>} : vector<40x32xf32>, vector<32x32xf32>, vector<40x32xf32> -> vector<40x32xf32>
    %112 = vector.broadcast %46 : vector<1x32xf32> to vector<40x32xf32>
    %113 = arith.addf %111, %112 : vector<40x32xf32>
    %114 = arith.addf %40, %113 : vector<40x32xf32>
    %cst_36 = arith.constant dense<0.000000e+00> : vector<40xf32>
    %115 = vector.multi_reduction <add>, %114, %cst_36 [1] : vector<40x32xf32> to vector<40xf32>
    %116 = vector.shape_cast %115 : vector<40xf32> to vector<40x1xf32>
    %cst_37 = arith.constant 3.200000e+01 : f32
    %117 = vector.broadcast %cst_37 : f32 to vector<40x1xf32>
    %118 = arith.divf %116, %117 : vector<40x1xf32>
    %119 = vector.broadcast %118 : vector<40x1xf32> to vector<40x32xf32>
    %120 = arith.subf %114, %119 : vector<40x32xf32>
    %121 = arith.mulf %120, %120 : vector<40x32xf32>
    %cst_38 = arith.constant dense<0.000000e+00> : vector<40xf32>
    %122 = vector.multi_reduction <add>, %121, %cst_38 [1] : vector<40x32xf32> to vector<40xf32>
    %123 = vector.shape_cast %122 : vector<40xf32> to vector<40x1xf32>
    %cst_39 = arith.constant 3.200000e+01 : f32
    %124 = vector.broadcast %cst_39 : f32 to vector<40x1xf32>
    %125 = arith.divf %123, %124 : vector<40x1xf32>
    %cst_40 = arith.constant 9.99999974E-6 : f32
    %126 = vector.broadcast %cst_40 : f32 to vector<40x1xf32>
    %127 = arith.addf %125, %126 : vector<40x1xf32>
    %128 = math.rsqrt %127 : vector<40x1xf32>
    %129 = vector.broadcast %128 : vector<40x1xf32> to vector<40x32xf32>
    %130 = arith.mulf %120, %129 : vector<40x32xf32>
    %131 = vector.broadcast %48 : vector<1x32xf32> to vector<40x32xf32>
    %132 = arith.mulf %130, %131 : vector<40x32xf32>
    %133 = vector.broadcast %49 : vector<1x32xf32> to vector<40x32xf32>
    %134 = arith.addf %132, %133 : vector<40x32xf32>
    %c0_41 = arith.constant 0 : index
    %c0_42 = arith.constant 0 : index
    %c0_43 = arith.constant 0 : index
    %135 = vector.load %arg6[%c0_41, %c0_42, %c0_43] : memref<2x32x64xf32, #tpu.memory_space<vmem>>, vector<1x32x64xf32>
    %136 = vector.shape_cast %135 : vector<1x32x64xf32> to vector<32x64xf32>
    %cst_44 = arith.constant dense<0.000000e+00> : vector<40x64xf32>
    %137 = tpu.matmul %134, %136, %cst_44 {dimension_numbers = #tpu.dot_dimension_numbers<[1], [0], [0], [1], [0, 0, 1, 1], [], []>} : vector<40x32xf32>, vector<32x64xf32>, vector<40x64xf32> -> vector<40x64xf32>
    %138 = vector.broadcast %45 : vector<1x64xf32> to vector<40x64xf32>
    %139 = arith.addf %137, %138 : vector<40x64xf32>
    %140 = arith.mulf %139, %139 : vector<40x64xf32>
    %141 = arith.mulf %139, %140 : vector<40x64xf32>
    %cst_45 = arith.constant 4.471500e-02 : f32
    %142 = vector.broadcast %cst_45 : f32 to vector<40x64xf32>
    %143 = arith.mulf %142, %141 : vector<40x64xf32>
    %144 = arith.addf %139, %143 : vector<40x64xf32>
    %cst_46 = arith.constant 0.797884583 : f32
    %145 = vector.broadcast %cst_46 : f32 to vector<40x64xf32>
    %146 = arith.mulf %145, %144 : vector<40x64xf32>
    %147 = math.tanh %146 : vector<40x64xf32>
    %cst_47 = arith.constant 1.000000e+00 : f32
    %148 = vector.broadcast %cst_47 : f32 to vector<40x64xf32>
    %149 = arith.addf %148, %147 : vector<40x64xf32>
    %cst_48 = arith.constant 5.000000e-01 : f32
    %150 = vector.broadcast %cst_48 : f32 to vector<40x64xf32>
    %151 = arith.mulf %150, %149 : vector<40x64xf32>
    %152 = arith.mulf %139, %151 : vector<40x64xf32>
    %c0_49 = arith.constant 0 : index
    %c0_50 = arith.constant 0 : index
    %c0_51 = arith.constant 0 : index
    %153 = vector.load %arg7[%c0_49, %c0_50, %c0_51] : memref<2x64x32xf32, #tpu.memory_space<vmem>>, vector<1x64x32xf32>
    %154 = vector.shape_cast %153 : vector<1x64x32xf32> to vector<64x32xf32>
    %cst_52 = arith.constant dense<0.000000e+00> : vector<40x32xf32>
    %155 = tpu.matmul %152, %154, %cst_52 {dimension_numbers = #tpu.dot_dimension_numbers<[1], [0], [0], [1], [0, 0, 1, 1], [], []>} : vector<40x64xf32>, vector<64x32xf32>, vector<40x32xf32> -> vector<40x32xf32>
    %156 = vector.broadcast %47 : vector<1x32xf32> to vector<40x32xf32>
    %157 = arith.addf %155, %156 : vector<40x32xf32>
    %158 = arith.addf %134, %157 : vector<40x32xf32>
    %cst_53 = arith.constant dense<0.000000e+00> : vector<40xf32>
    %159 = vector.multi_reduction <add>, %158, %cst_53 [1] : vector<40x32xf32> to vector<40xf32>
    %160 = vector.shape_cast %159 : vector<40xf32> to vector<40x1xf32>
    %cst_54 = arith.constant 3.200000e+01 : f32
    %161 = vector.broadcast %cst_54 : f32 to vector<40x1xf32>
    %162 = arith.divf %160, %161 : vector<40x1xf32>
    %163 = vector.broadcast %162 : vector<40x1xf32> to vector<40x32xf32>
    %164 = arith.subf %158, %163 : vector<40x32xf32>
    %165 = arith.mulf %164, %164 : vector<40x32xf32>
    %cst_55 = arith.constant dense<0.000000e+00> : vector<40xf32>
    %166 = vector.multi_reduction <add>, %165, %cst_55 [1] : vector<40x32xf32> to vector<40xf32>
    %167 = vector.shape_cast %166 : vector<40xf32> to vector<40x1xf32>
    %cst_56 = arith.constant 3.200000e+01 : f32
    %168 = vector.broadcast %cst_56 : f32 to vector<40x1xf32>
    %169 = arith.divf %167, %168 : vector<40x1xf32>
    %cst_57 = arith.constant 9.99999974E-6 : f32
    %170 = vector.broadcast %cst_57 : f32 to vector<40x1xf32>
    %171 = arith.addf %169, %170 : vector<40x1xf32>
    %172 = math.rsqrt %171 : vector<40x1xf32>
    %173 = vector.broadcast %172 : vector<40x1xf32> to vector<40x32xf32>
    %174 = arith.mulf %164, %173 : vector<40x32xf32>
    %175 = vector.broadcast %50 : vector<1x32xf32> to vector<40x32xf32>
    %176 = arith.mulf %174, %175 : vector<40x32xf32>
    %177 = vector.broadcast %51 : vector<1x32xf32> to vector<40x32xf32>
    %178 = arith.addf %176, %177 : vector<40x32xf32>
    %c1 = arith.constant 1 : index
    %c0_58 = arith.constant 0 : index
    %c0_59 = arith.constant 0 : index
    %179 = vector.load %arg8[%c1, %c0_58, %c0_59] : memref<2x8x128xf32, #tpu.memory_space<vmem>>, vector<1x8x128xf32>
    %180 = vector.shape_cast %179 : vector<1x8x128xf32> to vector<8x128xf32>
    %181 = vector.extract_strided_slice %180 {offsets = [0, 0], sizes = [1, 96], strides = [1, 1]} : vector<8x128xf32> to vector<1x96xf32>
    %182 = vector.extract_strided_slice %180 {offsets = [1, 0], sizes = [1, 64], strides = [1, 1]} : vector<8x128xf32> to vector<1x64xf32>
    %183 = vector.extract_strided_slice %180 {offsets = [2, 0], sizes = [1, 32], strides = [1, 1]} : vector<8x128xf32> to vector<1x32xf32>
    %184 = vector.extract_strided_slice %180 {offsets = [3, 0], sizes = [1, 32], strides = [1, 1]} : vector<8x128xf32> to vector<1x32xf32>
    %185 = vector.extract_strided_slice %180 {offsets = [4, 0], sizes = [1, 32], strides = [1, 1]} : vector<8x128xf32> to vector<1x32xf32>
    %186 = vector.extract_strided_slice %180 {offsets = [5, 0], sizes = [1, 32], strides = [1, 1]} : vector<8x128xf32> to vector<1x32xf32>
    %187 = vector.extract_strided_slice %180 {offsets = [6, 0], sizes = [1, 32], strides = [1, 1]} : vector<8x128xf32> to vector<1x32xf32>
    %188 = vector.extract_strided_slice %180 {offsets = [7, 0], sizes = [1, 32], strides = [1, 1]} : vector<8x128xf32> to vector<1x32xf32>
    %c1_60 = arith.constant 1 : index
    %c0_61 = arith.constant 0 : index
    %c0_62 = arith.constant 0 : index
    %189 = vector.load %arg4[%c1_60, %c0_61, %c0_62] : memref<2x32x96xf32, #tpu.memory_space<vmem>>, vector<1x32x96xf32>
    %190 = vector.shape_cast %189 : vector<1x32x96xf32> to vector<32x96xf32>
    %cst_63 = arith.constant dense<0.000000e+00> : vector<40x96xf32>
    %191 = tpu.matmul %178, %190, %cst_63 {dimension_numbers = #tpu.dot_dimension_numbers<[1], [0], [0], [1], [0, 0, 1, 1], [], []>} : vector<40x32xf32>, vector<32x96xf32>, vector<40x96xf32> -> vector<40x96xf32>
    %192 = vector.broadcast %181 : vector<1x96xf32> to vector<40x96xf32>
    %193 = arith.addf %191, %192 : vector<40x96xf32>
    %194 = vector.extract_strided_slice %193 {offsets = [0, 0], sizes = [40, 32], strides = [1, 1]} : vector<40x96xf32> to vector<40x32xf32>
    %195 = vector.extract_strided_slice %193 {offsets = [0, 32], sizes = [40, 32], strides = [1, 1]} : vector<40x96xf32> to vector<40x32xf32>
    %196 = vector.extract_strided_slice %193 {offsets = [0, 64], sizes = [40, 32], strides = [1, 1]} : vector<40x96xf32> to vector<40x32xf32>
    %197 = vector.extract_strided_slice %1 {offsets = [0, 0], sizes = [1, 32], strides = [1, 1]} : vector<4x32xf32> to vector<1x32xf32>
    %198 = vector.broadcast %197 : vector<1x32xf32> to vector<40x32xf32>
    %199 = arith.mulf %194, %198 : vector<40x32xf32>
    %200 = vector.extract_strided_slice %1 {offsets = [1, 0], sizes = [1, 32], strides = [1, 1]} : vector<4x32xf32> to vector<1x32xf32>
    %201 = vector.broadcast %200 : vector<1x32xf32> to vector<40x32xf32>
    %202 = arith.mulf %194, %201 : vector<40x32xf32>
    %203 = vector.extract_strided_slice %1 {offsets = [2, 0], sizes = [1, 32], strides = [1, 1]} : vector<4x32xf32> to vector<1x32xf32>
    %204 = vector.broadcast %203 : vector<1x32xf32> to vector<40x32xf32>
    %205 = arith.mulf %194, %204 : vector<40x32xf32>
    %206 = vector.extract_strided_slice %1 {offsets = [3, 0], sizes = [1, 32], strides = [1, 1]} : vector<4x32xf32> to vector<1x32xf32>
    %207 = vector.broadcast %206 : vector<1x32xf32> to vector<40x32xf32>
    %208 = arith.mulf %194, %207 : vector<40x32xf32>
    %209 = tpu.concatenate %199, %202, %205, %208 in 0 : vector<40x32xf32>, vector<40x32xf32>, vector<40x32xf32>, vector<40x32xf32> -> vector<160x32xf32>
    %cst_64 = arith.constant dense<0.000000e+00> : vector<160x40xf32>
    %210 = tpu.matmul %209, %195, %cst_64 {dimension_numbers = #tpu.dot_dimension_numbers<[1], [1], [0], [0], [0, 0, 1, 0], [], []>} : vector<160x32xf32>, vector<40x32xf32>, vector<160x40xf32> -> vector<160x40xf32>
    %cst_65 = arith.constant 0.353553385 : f32
    %211 = vector.broadcast %cst_65 : f32 to vector<160x40xf32>
    %212 = arith.mulf %210, %211 : vector<160x40xf32>
    %213 = arith.addf %212, %41 : vector<160x40xf32>
    %cst_66 = arith.constant dense<0xFF800000> : vector<160xf32>
    %214 = vector.multi_reduction <maximumf>, %213, %cst_66 [1] : vector<160x40xf32> to vector<160xf32>
    %215 = vector.shape_cast %214 : vector<160xf32> to vector<160x1xf32>
    %216 = vector.broadcast %215 : vector<160x1xf32> to vector<160x40xf32>
    %217 = arith.subf %213, %216 : vector<160x40xf32>
    %218 = math.exp %217 : vector<160x40xf32>
    %cst_67 = arith.constant dense<0.000000e+00> : vector<160xf32>
    %219 = vector.multi_reduction <add>, %218, %cst_67 [1] : vector<160x40xf32> to vector<160xf32>
    %220 = vector.shape_cast %219 : vector<160xf32> to vector<160x1xf32>
    %221 = tpu.reciprocal %220 {approx = true} : vector<160x1xf32> -> vector<160x1xf32>
    %222 = vector.broadcast %221 : vector<160x1xf32> to vector<160x40xf32>
    %223 = arith.mulf %218, %222 : vector<160x40xf32>
    %cst_68 = arith.constant dense<0.000000e+00> : vector<160x32xf32>
    %224 = tpu.matmul %223, %196, %cst_68 {dimension_numbers = #tpu.dot_dimension_numbers<[1], [0], [0], [1], [0, 0, 1, 1], [], []>} : vector<160x40xf32>, vector<40x32xf32>, vector<160x32xf32> -> vector<160x32xf32>
    %225 = vector.extract_strided_slice %224 {offsets = [0, 0], sizes = [40, 32], strides = [1, 1]} : vector<160x32xf32> to vector<40x32xf32>
    %226 = vector.extract_strided_slice %1 {offsets = [0, 0], sizes = [1, 32], strides = [1, 1]} : vector<4x32xf32> to vector<1x32xf32>
    %227 = vector.broadcast %226 : vector<1x32xf32> to vector<40x32xf32>
    %228 = arith.mulf %225, %227 : vector<40x32xf32>
    %cst_69 = arith.constant 0.000000e+00 : f32
    %229 = vector.broadcast %cst_69 : f32 to vector<40x32xf32>
    %230 = arith.addf %229, %228 : vector<40x32xf32>
    %231 = vector.extract_strided_slice %224 {offsets = [40, 0], sizes = [40, 32], strides = [1, 1]} : vector<160x32xf32> to vector<40x32xf32>
    %232 = vector.extract_strided_slice %1 {offsets = [1, 0], sizes = [1, 32], strides = [1, 1]} : vector<4x32xf32> to vector<1x32xf32>
    %233 = vector.broadcast %232 : vector<1x32xf32> to vector<40x32xf32>
    %234 = arith.mulf %231, %233 : vector<40x32xf32>
    %235 = arith.addf %230, %234 : vector<40x32xf32>
    %236 = vector.extract_strided_slice %224 {offsets = [80, 0], sizes = [40, 32], strides = [1, 1]} : vector<160x32xf32> to vector<40x32xf32>
    %237 = vector.extract_strided_slice %1 {offsets = [2, 0], sizes = [1, 32], strides = [1, 1]} : vector<4x32xf32> to vector<1x32xf32>
    %238 = vector.broadcast %237 : vector<1x32xf32> to vector<40x32xf32>
    %239 = arith.mulf %236, %238 : vector<40x32xf32>
    %240 = arith.addf %235, %239 : vector<40x32xf32>
    %241 = vector.extract_strided_slice %224 {offsets = [120, 0], sizes = [40, 32], strides = [1, 1]} : vector<160x32xf32> to vector<40x32xf32>
    %242 = vector.extract_strided_slice %1 {offsets = [3, 0], sizes = [1, 32], strides = [1, 1]} : vector<4x32xf32> to vector<1x32xf32>
    %243 = vector.broadcast %242 : vector<1x32xf32> to vector<40x32xf32>
    %244 = arith.mulf %241, %243 : vector<40x32xf32>
    %245 = arith.addf %240, %244 : vector<40x32xf32>
    %c1_70 = arith.constant 1 : index
    %c0_71 = arith.constant 0 : index
    %c0_72 = arith.constant 0 : index
    %246 = vector.load %arg5[%c1_70, %c0_71, %c0_72] : memref<2x32x32xf32, #tpu.memory_space<vmem>>, vector<1x32x32xf32>
    %247 = vector.shape_cast %246 : vector<1x32x32xf32> to vector<32x32xf32>
    %cst_73 = arith.constant dense<0.000000e+00> : vector<40x32xf32>
    %248 = tpu.matmul %245, %247, %cst_73 {dimension_numbers = #tpu.dot_dimension_numbers<[1], [0], [0], [1], [0, 0, 1, 1], [], []>} : vector<40x32xf32>, vector<32x32xf32>, vector<40x32xf32> -> vector<40x32xf32>
    %249 = vector.broadcast %183 : vector<1x32xf32> to vector<40x32xf32>
    %250 = arith.addf %248, %249 : vector<40x32xf32>
    %251 = arith.addf %178, %250 : vector<40x32xf32>
    %cst_74 = arith.constant dense<0.000000e+00> : vector<40xf32>
    %252 = vector.multi_reduction <add>, %251, %cst_74 [1] : vector<40x32xf32> to vector<40xf32>
    %253 = vector.shape_cast %252 : vector<40xf32> to vector<40x1xf32>
    %cst_75 = arith.constant 3.200000e+01 : f32
    %254 = vector.broadcast %cst_75 : f32 to vector<40x1xf32>
    %255 = arith.divf %253, %254 : vector<40x1xf32>
    %256 = vector.broadcast %255 : vector<40x1xf32> to vector<40x32xf32>
    %257 = arith.subf %251, %256 : vector<40x32xf32>
    %258 = arith.mulf %257, %257 : vector<40x32xf32>
    %cst_76 = arith.constant dense<0.000000e+00> : vector<40xf32>
    %259 = vector.multi_reduction <add>, %258, %cst_76 [1] : vector<40x32xf32> to vector<40xf32>
    %260 = vector.shape_cast %259 : vector<40xf32> to vector<40x1xf32>
    %cst_77 = arith.constant 3.200000e+01 : f32
    %261 = vector.broadcast %cst_77 : f32 to vector<40x1xf32>
    %262 = arith.divf %260, %261 : vector<40x1xf32>
    %cst_78 = arith.constant 9.99999974E-6 : f32
    %263 = vector.broadcast %cst_78 : f32 to vector<40x1xf32>
    %264 = arith.addf %262, %263 : vector<40x1xf32>
    %265 = math.rsqrt %264 : vector<40x1xf32>
    %266 = vector.broadcast %265 : vector<40x1xf32> to vector<40x32xf32>
    %267 = arith.mulf %257, %266 : vector<40x32xf32>
    %268 = vector.broadcast %185 : vector<1x32xf32> to vector<40x32xf32>
    %269 = arith.mulf %267, %268 : vector<40x32xf32>
    %270 = vector.broadcast %186 : vector<1x32xf32> to vector<40x32xf32>
    %271 = arith.addf %269, %270 : vector<40x32xf32>
    %c1_79 = arith.constant 1 : index
    %c0_80 = arith.constant 0 : index
    %c0_81 = arith.constant 0 : index
    %272 = vector.load %arg6[%c1_79, %c0_80, %c0_81] : memref<2x32x64xf32, #tpu.memory_space<vmem>>, vector<1x32x64xf32>
    %273 = vector.shape_cast %272 : vector<1x32x64xf32> to vector<32x64xf32>
    %cst_82 = arith.constant dense<0.000000e+00> : vector<40x64xf32>
    %274 = tpu.matmul %271, %273, %cst_82 {dimension_numbers = #tpu.dot_dimension_numbers<[1], [0], [0], [1], [0, 0, 1, 1], [], []>} : vector<40x32xf32>, vector<32x64xf32>, vector<40x64xf32> -> vector<40x64xf32>
    %275 = vector.broadcast %182 : vector<1x64xf32> to vector<40x64xf32>
    %276 = arith.addf %274, %275 : vector<40x64xf32>
    %277 = arith.mulf %276, %276 : vector<40x64xf32>
    %278 = arith.mulf %276, %277 : vector<40x64xf32>
    %cst_83 = arith.constant 4.471500e-02 : f32
    %279 = vector.broadcast %cst_83 : f32 to vector<40x64xf32>
    %280 = arith.mulf %279, %278 : vector<40x64xf32>
    %281 = arith.addf %276, %280 : vector<40x64xf32>
    %cst_84 = arith.constant 0.797884583 : f32
    %282 = vector.broadcast %cst_84 : f32 to vector<40x64xf32>
    %283 = arith.mulf %282, %281 : vector<40x64xf32>
    %284 = math.tanh %283 : vector<40x64xf32>
    %cst_85 = arith.constant 1.000000e+00 : f32
    %285 = vector.broadcast %cst_85 : f32 to vector<40x64xf32>
    %286 = arith.addf %285, %284 : vector<40x64xf32>
    %cst_86 = arith.constant 5.000000e-01 : f32
    %287 = vector.broadcast %cst_86 : f32 to vector<40x64xf32>
    %288 = arith.mulf %287, %286 : vector<40x64xf32>
    %289 = arith.mulf %276, %288 : vector<40x64xf32>
    %c1_87 = arith.constant 1 : index
    %c0_88 = arith.constant 0 : index
    %c0_89 = arith.constant 0 : index
    %290 = vector.load %arg7[%c1_87, %c0_88, %c0_89] : memref<2x64x32xf32, #tpu.memory_space<vmem>>, vector<1x64x32xf32>
    %291 = vector.shape_cast %290 : vector<1x64x32xf32> to vector<64x32xf32>
    %cst_90 = arith.constant dense<0.000000e+00> : vector<40x32xf32>
    %292 = tpu.matmul %289, %291, %cst_90 {dimension_numbers = #tpu.dot_dimension_numbers<[1], [0], [0], [1], [0, 0, 1, 1], [], []>} : vector<40x64xf32>, vector<64x32xf32>, vector<40x32xf32> -> vector<40x32xf32>
    %293 = vector.broadcast %184 : vector<1x32xf32> to vector<40x32xf32>
    %294 = arith.addf %292, %293 : vector<40x32xf32>
    %295 = arith.addf %271, %294 : vector<40x32xf32>
    %cst_91 = arith.constant dense<0.000000e+00> : vector<40xf32>
    %296 = vector.multi_reduction <add>, %295, %cst_91 [1] : vector<40x32xf32> to vector<40xf32>
    %297 = vector.shape_cast %296 : vector<40xf32> to vector<40x1xf32>
    %cst_92 = arith.constant 3.200000e+01 : f32
    %298 = vector.broadcast %cst_92 : f32 to vector<40x1xf32>
    %299 = arith.divf %297, %298 : vector<40x1xf32>
    %300 = vector.broadcast %299 : vector<40x1xf32> to vector<40x32xf32>
    %301 = arith.subf %295, %300 : vector<40x32xf32>
    %302 = arith.mulf %301, %301 : vector<40x32xf32>
    %cst_93 = arith.constant dense<0.000000e+00> : vector<40xf32>
    %303 = vector.multi_reduction <add>, %302, %cst_93 [1] : vector<40x32xf32> to vector<40xf32>
    %304 = vector.shape_cast %303 : vector<40xf32> to vector<40x1xf32>
    %cst_94 = arith.constant 3.200000e+01 : f32
    %305 = vector.broadcast %cst_94 : f32 to vector<40x1xf32>
    %306 = arith.divf %304, %305 : vector<40x1xf32>
    %cst_95 = arith.constant 9.99999974E-6 : f32
    %307 = vector.broadcast %cst_95 : f32 to vector<40x1xf32>
    %308 = arith.addf %306, %307 : vector<40x1xf32>
    %309 = math.rsqrt %308 : vector<40x1xf32>
    %310 = vector.broadcast %309 : vector<40x1xf32> to vector<40x32xf32>
    %311 = arith.mulf %301, %310 : vector<40x32xf32>
    %312 = vector.broadcast %187 : vector<1x32xf32> to vector<40x32xf32>
    %313 = arith.mulf %311, %312 : vector<40x32xf32>
    %314 = vector.broadcast %188 : vector<1x32xf32> to vector<40x32xf32>
    %315 = arith.addf %313, %314 : vector<40x32xf32>
    %316 = vector.extract_strided_slice %0 {offsets = [1, 0], sizes = [1, 32], strides = [1, 1]} : vector<40x128xf32> to vector<1x32xf32>
    %317 = vector.extract_strided_slice %0 {offsets = [2, 0], sizes = [1, 32], strides = [1, 1]} : vector<40x128xf32> to vector<1x32xf32>
    %cst_96 = arith.constant dense<0.000000e+00> : vector<40xf32>
    %318 = vector.multi_reduction <add>, %315, %cst_96 [1] : vector<40x32xf32> to vector<40xf32>
    %319 = vector.shape_cast %318 : vector<40xf32> to vector<40x1xf32>
    %cst_97 = arith.constant 3.200000e+01 : f32
    %320 = vector.broadcast %cst_97 : f32 to vector<40x1xf32>
    %321 = arith.divf %319, %320 : vector<40x1xf32>
    %322 = vector.broadcast %321 : vector<40x1xf32> to vector<40x32xf32>
    %323 = arith.subf %315, %322 : vector<40x32xf32>
    %324 = arith.mulf %323, %323 : vector<40x32xf32>
    %cst_98 = arith.constant dense<0.000000e+00> : vector<40xf32>
    %325 = vector.multi_reduction <add>, %324, %cst_98 [1] : vector<40x32xf32> to vector<40xf32>
    %326 = vector.shape_cast %325 : vector<40xf32> to vector<40x1xf32>
    %cst_99 = arith.constant 3.200000e+01 : f32
    %327 = vector.broadcast %cst_99 : f32 to vector<40x1xf32>
    %328 = arith.divf %326, %327 : vector<40x1xf32>
    %cst_100 = arith.constant 9.99999974E-6 : f32
    %329 = vector.broadcast %cst_100 : f32 to vector<40x1xf32>
    %330 = arith.addf %328, %329 : vector<40x1xf32>
    %331 = math.rsqrt %330 : vector<40x1xf32>
    %332 = vector.broadcast %331 : vector<40x1xf32> to vector<40x32xf32>
    %333 = arith.mulf %323, %332 : vector<40x32xf32>
    %334 = vector.broadcast %316 : vector<1x32xf32> to vector<40x32xf32>
    %335 = arith.mulf %333, %334 : vector<40x32xf32>
    %336 = vector.broadcast %317 : vector<1x32xf32> to vector<40x32xf32>
    %337 = arith.addf %335, %336 : vector<40x32xf32>
    %338 = vector.extract_strided_slice %337 {offsets = [0, 0], sizes = [8, 32], strides = [1, 1]} : vector<40x32xf32> to vector<8x32xf32>
    %339 = vector.extract_strided_slice %337 {offsets = [8, 0], sizes = [8, 32], strides = [1, 1]} : vector<40x32xf32> to vector<8x32xf32>
    %340 = vector.extract_strided_slice %337 {offsets = [16, 0], sizes = [8, 32], strides = [1, 1]} : vector<40x32xf32> to vector<8x32xf32>
    %341 = vector.extract_strided_slice %337 {offsets = [24, 0], sizes = [8, 32], strides = [1, 1]} : vector<40x32xf32> to vector<8x32xf32>
    %342 = vector.extract_strided_slice %337 {offsets = [32, 0], sizes = [8, 32], strides = [1, 1]} : vector<40x32xf32> to vector<8x32xf32>
    %343 = tpu.concatenate %338, %339, %340, %341, %342 in 1 : vector<8x32xf32>, vector<8x32xf32>, vector<8x32xf32>, vector<8x32xf32>, vector<8x32xf32> -> vector<8x160xf32>
    %c0_101 = arith.constant 0 : index
    %c0_102 = arith.constant 0 : index
    %344 = vector.load %arg11[%c0_101, %c0_102] : memref<168x16xf32, #tpu.memory_space<vmem>>, vector<168x16xf32>
    %345 = vector.extract_strided_slice %344 {offsets = [0, 0], sizes = [160, 16], strides = [1, 1]} : vector<168x16xf32> to vector<160x16xf32>
    %346 = vector.extract_strided_slice %344 {offsets = [160, 0], sizes = [8, 16], strides = [1, 1]} : vector<168x16xf32> to vector<8x16xf32>
    %cst_103 = arith.constant dense<0.000000e+00> : vector<8x16xf32>
    %347 = tpu.matmul %343, %345, %cst_103 {dimension_numbers = #tpu.dot_dimension_numbers<[1], [0], [0], [1], [0, 0, 1, 1], [], []>} : vector<8x160xf32>, vector<160x16xf32>, vector<8x16xf32> -> vector<8x16xf32>
    %348 = arith.mulf %347, %346 : vector<8x16xf32>
    %349 = vector.extract_strided_slice %0 {offsets = [24, 0], sizes = [16, 128], strides = [1, 1]} : vector<40x128xf32> to vector<16x128xf32>
    %cst_104 = arith.constant dense<0.000000e+00> : vector<8x128xf32>
    %350 = tpu.matmul %348, %349, %cst_104 {dimension_numbers = #tpu.dot_dimension_numbers<[1], [0], [0], [1], [0, 0, 1, 1], [], []>} : vector<8x16xf32>, vector<16x128xf32>, vector<8x128xf32> -> vector<8x128xf32>
    %351 = vector.extract_strided_slice %0 {offsets = [16, 0], sizes = [2, 8], strides = [1, 1]} : vector<40x128xf32> to vector<2x8xf32>
    %cst_105 = arith.constant dense<0.000000e+00> : vector<2x128xf32>
    %352 = tpu.matmul %351, %350, %cst_105 {dimension_numbers = #tpu.dot_dimension_numbers<[1], [0], [0], [1], [0, 0, 1, 1], [], []>} : vector<2x8xf32>, vector<8x128xf32>, vector<2x128xf32> -> vector<2x128xf32>
    %353 = vector.extract_strided_slice %0 {offsets = [3, 0], sizes = [1, 128], strides = [1, 1]} : vector<40x128xf32> to vector<1x128xf32>
    %354 = vector.broadcast %353 : vector<1x128xf32> to vector<2x128xf32>
    %355 = arith.addf %352, %354 : vector<2x128xf32>
    %c0_106 = arith.constant 0 : index
    %c0_107 = arith.constant 0 : index
    %356 = vector.load %arg13[%c0_106, %c0_107] : memref<8x160xf32, #tpu.memory_space<vmem>>, vector<8x160xf32>
    tpu.vector_store %arg13[%c0_106, %c0_107], %343 {strides = array<i32>} : memref<8x160xf32, #tpu.memory_space<vmem>>, vector<8x160xf32>,
    %c0_108 = arith.constant 0 : index
    %c0_109 = arith.constant 0 : index
    %357 = vector.load %arg12[%c0_108, %c0_109] : memref<2x128xf32, #tpu.memory_space<vmem>>, vector<2x128xf32>
    tpu.vector_store %arg12[%c0_108, %c0_109], %355 {strides = array<i32>} : memref<2x128xf32, #tpu.memory_space<vmem>>, vector<2x128xf32>,
    return
  }
}

</mosaic_0001>

<bundles_post_ra>
// kernel: forward.1
= control target key start
LH: loop header
LB: loop body
LE: loop exit
PB: predicated region body
PF: predicated region fallthrough
CT: control target
= control target key end

     0   :  { %vm50_vm0 = vcmask 261120   ;;  %s6709_s0 = inlined_call_operand.vmem [shape: f32[8,32], index: 0, kind: input, shape index: {}]   ;;  %s6710_s1 = inlined_call_operand.vmem [shape: f32[2,384], index: 1, kind: input, shape index: {}]   ;;  %s6711_s2 = inlined_call_operand.vmem [shape: f32[48,32], index: 2, kind: input, shape index: {}]   ;;  %s6712_s3 = inlined_call_operand.vmem [shape: f32[384,32], index: 3, kind: input, shape index: {}]   ;;  %s6713_s4 = inlined_call_operand.vmem [shape: f32[2,32,96], index: 4, kind: input, shape index: {}]   ;;  %s6714_s5 = inlined_call_operand.vmem [shape: f32[2,32,32], index: 5, kind: input, shape index: {}]   ;;  %s6715_s6 = inlined_call_operand.vmem [shape: f32[2,32,64], index: 6, kind: input, shape index: {}]   ;;  %s6716_s7 = inlined_call_operand.vmem [shape: f32[2,64,32], index: 7, kind: input, shape index: {}]   ;;  %s6717_s8 = inlined_call_operand.vmem [shape: f32[2,8,128], index: 8, kind: input, shape index: {}]   ;;  %s6718_s9 = inlined_call_operand.vmem [shape: f32[40,128], index: 9, kind: input, shape index: {}]   ;;  %s6719_s10 = inlined_call_operand.vmem [shape: f32[160,40], index: 10, kind: input, shape index: {}]   ;;  %s6720_s11 = inlined_call_operand.vmem [shape: f32[168,16], index: 11, kind: input, shape index: {}]   ;;  %s6721_s12 = inlined_call_operand.hbm [shape: f32[2,128], index: 12, kind: output, shape index: {0}]   ;;  %s6722_s13 = inlined_call_operand.vmem [shape: f32[8,160], index: 13, kind: output, shape index: {1}]  }
   0x1   :  { %v49_v0 = vld [vmem:[%s6709_s0] sm:$0xff] }
   0x2   :  { %19 = vsyncpa [#allocation3], 0  ;;  %v51_v1 = vsel %vm50_vm0, %v49_v0, 0.0  ;;  %v4972_v7 = vmov 31   ;;  %v210_v13 = vld [vmem:[%s6712_s3 + $0xf8] sm:$0xff]  ;;  %v209_v15 = vld [vmem:[%s6712_s3 + $0xf0] sm:$0xff]  ;;  %v227_v41 = vlaneseq }
   0x3   :  { %52 = vadd.xlane.f32.xlu0 %v51_v1  ;;  %4692 = vset.pattern.permute.xlu1 %v4972_v7  ;;  %v194_v14 = vld [vmem:[%s6712_s3 + $0x78] sm:$0xff]  ;;  %v193_v16 = vld [vmem:[%s6712_s3 + $0x70] sm:$0xff]  ;;  %v79_v17 = vld [vmem:[%s6711_s2 + $0x8] sm:$0xff]  ;;  %v4973_v24 = vmov 0.0   ;;  %vm84_vm1 = vcmask 130048   ;;  %s4974_s21 = smov 112  }
   0x4   :  { %4693 = vset.pattern.permute.xlu0 %v4972_v7  ;;  %4020 = vmatprep.subr.mxu1 %v210_v13  ;;  %v208_v18 = vld [vmem:[%s6712_s3 + $0xe8] sm:$0xff]  ;;  %v78_v19 = vld [vmem:[%s6711_s2] sm:$0xff]  ;;  %v206_v23 = vld [vmem:[%s6712_s3 + $0xd8] sm:$0xff]  ;;  %s4975_s22 = smov 120   ;;  %v4976_v42 = vmov 1983009808  }
   0x5   :  { %4021 = vmatpush3.msra.mxu1 %v194_v14  ;;  %4259 = vmatprep.subr.mxu0 %v79_v17  ;;  %v192_v20 = vld [vmem:[%s6712_s3 + $0x68] sm:$0xff]  ;;  %v207_v21 = vld [vmem:[%s6712_s3 + $0xe0] sm:$0xff]  ;;  %v190_v25 = vld [vmem:[%s6712_s3 + $0x58] sm:$0xff]  ;;  %v234_v43 = vunpack.c.l.s4 %v4976_v42  ;;  %v5142_v46 = vshrl.u32 %v227_v41, 7  ;;  %s4977_s30 = smov 104   ;;  %vm4978_vm2 = vmmov 0  }
   0x6   :  { %4022 = vmatprep.subr.mxu1 %v209_v15  ;;  %4260 = vmatpush3.msra.mxu0 %v79_v17  ;;  %v191_v22 = vld [vmem:[%s6712_s3 + $0x60] sm:$0xff]  ;;  %v205_v26 = vld [vmem:[%s6712_s3 + $0xd0] sm:$0xff]  ;;  %v204_v28 = vld [vmem:[%s6712_s3 + $0xc8] sm:$0xff]  ;;  %vm395_vm3 = vcmask 1041408   ;;  %vm391_vm4 = vcmask 15360   ;;  %s4979_s23 = smov 64  }
   0x7   :  { %4023 = vmatpush3.msra.mxu1 %v193_v16  ;;  %4261 = vmatprep.subr.mxu0 %v78_v19  ;;  %v189_v27 = vld [vmem:[%s6712_s3 + $0x50] sm:$0xff]  ;;  %v188_v29 = vld [vmem:[%s6712_s3 + $0x48] sm:$0xff]  ;;  %v203_v30 = vld [vmem:[%s6712_s3 + $0xc0] sm:$0xff]  ;;  %v235_v47 = vunpack.c.0.s8 %v234_v43  ;;  %s4980_s24 = smov 96   ;;  %vm929_vm5 = vcmask 326656   ;;  %vm1801_vm6 = vcmask 523264  }
   0x8   :  { %4024 = vmatprep.subr.mxu1 %v208_v18  ;;  %4262 = vmatpush3.msra.mxu0 %v78_v19  ;;  %v187_v31 = vld [vmem:[%s6712_s3 + $0x40] sm:$0xff]  ;;  %v202_v32 = vld [vmem:[%s6712_s3 + $0xb8] sm:$0xff]  ;;  %v201_v34 = vld [vmem:[%s6712_s3 + $0xb0] sm:$0xff]  ;;  %s4981_s17 = smov 32   ;;  %vm3585_vm7 = vcmask 785408   ;;  %vm3759_vm8 = vcmask 64512  }
   0x9   :  { %4025 = vmatpush3.msra.mxu1 %v192_v20  ;;  %4269 = vmatprep.subr.mxu0 %v4973_v24  ;;  %v186_v33 = vld [vmem:[%s6712_s3 + $0x38] sm:$0xff]  ;;  %v185_v35 = vld [vmem:[%s6712_s3 + $0x30] sm:$0xff]  ;;  %v200_v37 = vld [vmem:[%s6712_s3 + $0xa8] sm:$0xff]  ;;  %v238_v50 = vsub.s32 %v235_v47, %v5142_v46 }
   0xa   :  { %4026 = vmatprep.subr.mxu1 %v207_v21  ;;  %v184_v39 = vld [vmem:[%s6712_s3 + $0x28] sm:$0xff]  ;;  %v199_v40 = vld [vmem:[%s6712_s3 + $0xa0] sm:$0xff]  ;;  %v198_v45 = vld [vmem:[%s6712_s3 + $0x98] sm:$0xff] }
   0xb   :  { %4027 = vmatpush3.msra.mxu1 %v191_v22  ;;  %v183_v44 = vld [vmem:[%s6712_s3 + $0x20] sm:$0xff]  ;;  %v182_v48 = vld [vmem:[%s6712_s3 + $0x18] sm:$0xff]  ;;  %v197_v49 = vld [vmem:[%s6712_s3 + $0x90] sm:$0xff] }
   0xc   :  { %4028 = vmatprep.subr.mxu1 %v206_v23  ;;  %v181_v51 = vld [vmem:[%s6712_s3 + $0x10] sm:$0xff]  ;;  %v178_v52 = vld [vmem:[%s6710_s1] sm:$0x3f]  ;;  %v196_v53 = vld [vmem:[%s6712_s3 + $0x88] sm:$0xff] }
   0xd   :  { %4029 = vmatpush3.msra.mxu1 %v190_v25  ;;  %v239_v54 = vrot.slane %v178_v52, %v238_v50  ;;  %v180_v55 = vld [vmem:[%s6712_s3 + $0x8] sm:$0xff]  ;;  %v195_v56 = vld [vmem:[%s6712_s3 + $0x80] sm:$0xff]  ;;  %v232_v59 = vcombine.high %v178_v52, %v178_v52  ;;  %v226_v61 = vld [vmem:[%s6712_s3 + $0x178] sm:$0xff] }
   0xe   :  { %4030 = vmatprep.subr.mxu1 %v205_v26  ;;  %v179_v58 = vld [vmem:[%s6712_s3] sm:$0xff]  ;;  %v224_v1 = vld [vmem:[%s6712_s3 + $0x168] sm:$0xff]  ;;  %v213_v13 = vld [vmem:[%s6712_s3 + $0x110] sm:$0xff] }
   0xf   :  { %4031 = vmatpush3.msra.mxu1 %v189_v27  ;;  %v247_v57 = vcombine.high %v239_v54, %v239_v54  ;;  %v246_v60 = vrot.slane %v232_v59, %v238_v50  ;;  %v219_v7 = vld [vmem:[%s6712_s3 + $0x140] sm:$0xff]  ;;  %v212_v14 = vld [vmem:[%s6712_s3 + $0x108] sm:$0xff]  ;;  %v493_v16 = vld [vmem:[%s6713_s4 + $0x18] sm:$0xff] }
  0x10   :  { %4032 = vmatprep.subr.mxu1 %v204_v28  ;;  %v211_v15 = vld [vmem:[%s6712_s3 + $0x100] sm:$0xff]  ;;  %v492_v17 = vld [vmem:[%s6713_s4 + $0x10] sm:$0xff]  ;;  %v491_v18 = vld [vmem:[%s6713_s4 + $0x8] sm:$0xff] }
  0x11   :  { %4033 = vmatpush3.msra.mxu1 %v188_v29  ;;  %315 = vmatprep.mubr.f32.mxu1 %v247_v57  ;;  %v490_v19 = vld [vmem:[%s6713_s4] sm:$0xff]  ;;  %v80_v21 = vld [vmem:[%s6711_s2 + $0x10] sm:$0xff]  ;;  %v81_v25 = vld [vmem:[%s6711_s2 + $0x18] sm:$0xff] }
  0x12   :  { %4034 = vmatprep.subr.mxu1 %v203_v30  ;;  %v82_v29 = vld [vmem:[%s6711_s2 + $0x20] sm:$0xff]  ;;  %v45_v42 = vld [vmem:[%s6718_s9 + $0x8] sm:$0xff] }
  0x13   :  { %4035 = vmatpush3.msra.mxu1 %v187_v31  ;;  %v83_v31 = vld [vmem:[%s6711_s2 + $0x28] sm:$0xff] }
  0x14   :  { %4036 = vmatprep.subr.mxu1 %v202_v32 }
  0x15   :  { %4037 = vmatpush3.msra.mxu1 %v186_v33 }
  0x16   :  { %4038 = vmatprep.subr.mxu1 %v201_v34  ;;  %v5295_v34 = vsub.s32 0, %v5142_v46 }
  0x17   :  { %4039 = vmatpush3.msra.mxu1 %v185_v35 }
  0x18   :  { %4040 = vmatprep.subr.mxu1 %v200_v37 }
  0x19   :  { %4041 = vmatpush3.msra.mxu1 %v184_v39 }
  0x1a   :  { %4042 = vmatprep.subr.mxu1 %v199_v40 }
  0x1b   :  { %4043 = vmatpush3.msra.mxu1 %v183_v44  ;;  %v489_v44 = vld [vmem:[%s6717_s8] sm:$0xff] }
  0x1c   :  { %4044 = vmatprep.subr.mxu1 %v198_v45  ;;  %v5311_v45 = vsub.s32 4, %v5142_v46  ;;  %v497_v47 = vrot.slane %v489_v44, %v5295_v34 }
  0x1d   :  { %4045 = vmatpush3.msra.mxu1 %v182_v48 }
  0x1e   :  { %4046 = vmatprep.subr.mxu1 %v197_v49 }
  0x1f   :  { %4047 = vmatpush3.msra.mxu1 %v181_v51 }
  0x20   :  { %4048 = vmatprep.subr.mxu1 %v196_v53 }
  0x21   :  { %4049 = vmatpush3.msra.mxu1 %v180_v55 }
  0x22   :  { %4050 = vmatprep.subr.mxu1 %v195_v56 }
  0x23   :  { %4051 = vmatpush3.msra.mxu1 %v179_v58 }
  0x24   :  { %316 = vmatmul.mubr.f32.vlgmr.msra.gmra.mxu1 %v239_v54  ;;  %4304 = vmatprep.subr.mxu1 %v4973_v24 }
  0x25   :  { %4306 = vmatprep.mubr.msk.f32.mxu1 %vm4978_vm2, %v4973_v24 }
  0x8c   :  { %v53_v2 = vpop.xlane.xlu0 %52 }
  0x8d   :  { %v55_v3 = vmul.f32 0.03125, %v53_v2 }
  0x8f   :  { %v56_v4 = vsub.f32 %v49_v0, %v55_v3  ;;  %v225_v0 = vld [vmem:[%s6712_s3 + $0x170] sm:$0xff]  ;;  %v223_v3 = vld [vmem:[%s6712_s3 + $0x160] sm:$0xff] }
  0x91   :  { %v57_v5 = vmul.f32 %v56_v4, %v56_v4 }
  0x93   :  { %v58_v6 = vsel %vm50_vm0, %v57_v5, 0.0  ;;  %v221_v5 = vld [vmem:[%s6712_s3 + $0x150] sm:$0xff] }
  0x94   :  { %59 = vadd.xlane.f32.xlu0 %v58_v6  ;;  %v220_v6 = vld [vmem:[%s6712_s3 + $0x148] sm:$0xff] }
  0xe4   :  { %v4052_v33 = vpop.f32.mrf.mxu1 }
  0xe6   :  { %v4053_v35 = vpop.f32.mrf.mxu1 }
  0xe7   :  { %v4054_v37 = vadd.f32 %v4053_v35, %v4052_v33 }
 0x11d   :  { %v60_v8 = vpop.xlane.xlu0 %59 }
 0x11e   :  { %v61_v9 = vmul.f32 0.03125, %v60_v8  ;;  %v218_v8 = vld [vmem:[%s6712_s3 + $0x138] sm:$0xff] }
 0x120   :  { %v62_v10 = vadd.f32 1e-05, %v61_v9  ;;  %v217_v9 = vld [vmem:[%s6712_s3 + $0x130] sm:$0xff] }
 0x122   :  { %4695 = vrsqrt.f32 %v62_v10  ;;  %v216_v10 = vld [vmem:[%s6712_s3 + $0x128] sm:$0xff] }
 0x12f   :  { %v4696_v11 = vpop.eup %4695 }
 0x130   :  { %v64_v12 = vmul.f32 %v4696_v11, %v56_v4  ;;  %v222_v4 = vld [vmem:[%s6712_s3 + $0x158] sm:$0xff]  ;;  %v215_v11 = vld [vmem:[%s6712_s3 + $0x120] sm:$0xff] }
 0x132   :  { %67 = vperm.xlu1 %4692, %v64_v12  }
 0x1ad   :  { %v68_v36 = vpop.permute.xlu1 %67 }
 0x1ae   :  { %v70_v38 = vsel %vm50_vm0, %v64_v12, %v68_v36  ;;  %v214_v12 = vld [vmem:[%s6712_s3 + $0x118] sm:$0xff]  ;;  %v5300_v36 = vld [vmem:[%s6718_s9] sm:$0xff] }
 0x1af   :  { %74 = vrot.lane.b32.xlu0 %v70_v38, %s4974_s21  ;;  %72 = vrot.lane.b32.xlu1 %v70_v38, %s4975_s22  ;;  %v5316_v48 = vrot.slane %v5300_v36, %v5311_v45 }
 0x1b0   :  { %4263 = vmatprep.mubr.msk.f32.mxu0 %vm84_vm1, %v70_v38 }
 0x1b3   :  { %76 = vrot.lane.b32.xlu1 %v70_v38, %s4977_s30  ;;  %v230_v38 = vrot.slane %v5300_v36, %v5295_v34 }
 0x1b5   :  { %v318_v39 = vadd.f32 %v4054_v37, %v230_v38 }
 0x221   :  { %v75_v62 = vpop.permute.xlu0 %74  ;;  %v73_v63 = vpop.permute.xlu1 %72 }
 0x222   :  { %4264 = vmatmul.mubr.msk.f32.vlgmr.msra.gmra.mxu0 %vm84_vm1, %v73_v63 }
 0x223   :  { %4270 = vmatpush3.msra.mxu0 %v226_v61  ;;  %4266 = vmatprep.mubr.msk.f32.mxu0 %vm84_vm1, %v75_v62 }
 0x224   :  { %4271 = vmatprep.subr.mxu0 %v4973_v24 }
 0x225   :  { %4272 = vmatpush3.msra.mxu0 %v225_v0  ;;  %v77_v2 = vpop.permute.xlu1 %76 }
 0x226   :  { %4273 = vmatprep.subr.mxu0 %v4973_v24  ;;  %4267 = vmatmul.mubr.msk.f32.gmra.mxu0 %vm84_vm1, %v77_v2 }
 0x227   :  { %4274 = vmatpush3.msra.mxu0 %v224_v1  ;;  %4301 = vmatprep.mubr.msk.f32.mxu0 %vm4978_vm2, %v4973_v24 }
 0x228   :  { %4275 = vmatprep.subr.mxu0 %v4973_v24 }
 0x229   :  { %4276 = vmatpush3.msra.mxu0 %v223_v3 }
 0x22a   :  { %4277 = vmatprep.subr.mxu0 %v4973_v24 }
 0x22b   :  { %4278 = vmatpush3.msra.mxu0 %v222_v4 }
 0x22c   :  { %4279 = vmatprep.subr.mxu0 %v4973_v24 }
 0x22d   :  { %4280 = vmatpush3.msra.mxu0 %v221_v5 }
 0x22e   :  { %4281 = vmatprep.subr.mxu0 %v4973_v24 }
 0x22f   :  { %4282 = vmatpush3.msra.mxu0 %v220_v6 }
 0x230   :  { %4283 = vmatprep.subr.mxu0 %v4973_v24 }
 0x231   :  { %4284 = vmatpush3.msra.mxu0 %v219_v7 }
 0x232   :  { %4285 = vmatprep.subr.mxu0 %v4973_v24 }
 0x233   :  { %4286 = vmatpush3.msra.mxu0 %v218_v8  ;;  %v5360_v8 = vsub.s32 5, %v5142_v46 }
 0x234   :  { %4287 = vmatprep.subr.mxu0 %v4973_v24 }
 0x235   :  { %4288 = vmatpush3.msra.mxu0 %v217_v9 }
 0x236   :  { %4289 = vmatprep.subr.mxu0 %v4973_v24 }
 0x237   :  { %4290 = vmatpush3.msra.mxu0 %v216_v10 }
 0x238   :  { %4291 = vmatprep.subr.mxu0 %v4973_v24 }
 0x239   :  { %4292 = vmatpush3.msra.mxu0 %v215_v11 }
 0x23a   :  { %4293 = vmatprep.subr.mxu0 %v4973_v24 }
 0x23b   :  { %4294 = vmatpush3.msra.mxu0 %v214_v12 }
 0x23c   :  { %4295 = vmatprep.subr.mxu0 %v4973_v24 }
 0x23d   :  { %4296 = vmatpush3.msra.mxu0 %v213_v13  ;;  %v5371_v13 = vrot.slane %v5300_v36, %v5360_v8 }
 0x23e   :  { %4297 = vmatprep.subr.mxu0 %v4973_v24 }
 0x23f   :  { %4298 = vmatpush3.msra.mxu0 %v212_v14 }
 0x240   :  { %4299 = vmatprep.subr.mxu0 %v4973_v24 }
 0x241   :  { %4300 = vmatpush3.msra.mxu0 %v211_v15 }
 0x242   :  { %4302 = vmatmul.mubr.f32.vlgmr.msra.gmra.mxu0 %v246_v60  ;;  %4309 = vmatprep.subr.mxu0 %v4973_v24 }
 0x243   :  { %4310 = vmatpush3.msra.mxu0 %v493_v16  ;;  %4317 = vmatprep.mubr.msk.f32.mxu0 %vm4978_vm2, %v4973_v24 }
 0x244   :  { %4311 = vmatprep.subr.mxu0 %v4973_v24 }
 0x245   :  { %4312 = vmatpush3.msra.mxu0 %v492_v17  ;;  %v5382_v17 = vsub.s32 6, %v5142_v46 }
 0x246   :  { %4313 = vmatprep.subr.mxu0 %v4973_v24 }
 0x247   :  { %4314 = vmatpush3.msra.mxu0 %v491_v18 }
 0x248   :  { %4315 = vmatprep.subr.mxu0 %v4973_v24 }
 0x249   :  { %4316 = vmatpush3.msra.mxu0 %v490_v19 }
 0x2e2   :  { %v4265_v20 = vpop.f32.mrf.mxu0 }
 0x2e3   :  { %v5270_v27 = vadd.f32 %v4265_v20, %v81_v25  ;;  %v5392_v20 = vrot.slane %v5300_v36, %v5382_v17 }
 0x2e4   :  { %v159_v22 = vpop.f32.mrf.mxu0 }
 0x2e5   :  { %v5261_v23 = vadd.f32 %v159_v22, %v80_v21 }
 0x2e6   :  { %v4268_v26 = vpop.f32.mrf.mxu0 }
 0x2e7   :  { %4318 = vmatmul.mubr.msk.f32.vlgmr.msra.gmra.mxu0 %vm50_vm0, %v5261_v23  ;;  %v5288_v32 = vadd.f32 %v4268_v26, %v83_v31  ;;  %v5405_v26 = vsub.s32 7, %v5142_v46 }
 0x2e8   :  { %4320 = vmatprep.mubr.msk.f32.mxu0 %vm4978_vm2, %v4973_v24  ;;  %v169_v28 = vpop.f32.mrf.mxu0 }
 0x2e9   :  { %v5279_v30 = vadd.f32 %v169_v28, %v82_v29  ;;  %v5415_v31 = vrot.slane %v5300_v36, %v5405_v26 }
 0x2eb   :  { %4321 = vmatmul.mubr.msk.f32.gmra.mxu0 %vm50_vm0, %v5270_v27 }
 0x2ec   :  { %4323 = vmatprep.mubr.msk.f32.mxu0 %vm4978_vm2, %v4973_v24 }
 0x2ef   :  { %4324 = vmatmul.mubr.msk.f32.gmra.mxu0 %vm50_vm0, %v5279_v30 }
 0x2f0   :  { %4326 = vmatprep.mubr.msk.f32.mxu0 %vm4978_vm2, %v4973_v24 }
 0x2f3   :  { %4327 = vmatmul.mubr.msk.f32.gmra.mxu0 %vm50_vm0, %v5288_v32 }
 0x2f4   :  { %4329 = vmatprep.mubr.msk.f32.mxu0 %vm4978_vm2, %v4973_v24 }
 0x302   :  { %v387_v40 = vpop.f32.mrf.mxu0 }
 0x303   :  { %v388_v41 = vadd.f32 %v387_v40, %v318_v39 }
 0x304   :  { %v4303_v43 = vpop.f32.mrf.mxu0 }
 0x305   :  { %4305 = vmatpush3.msk.msra.mxu1 %vm395_vm3, %v388_v41 }
 0x306   :  { %4307 = vmatmul.mubr.msk.f32.vlgmr.msra.gmra.mxu1 %vm391_vm4, %v45_v42  ;;  %v470_v42 = vld [vmem:[%s6719_s10 + $0x8] sm:$0xff] }
 0x3a7   :  { %v579_v49 = vpop.f32.mrf.mxu0 }
 0x3a8   :  { %v5318_v50 = vadd.f32 %v579_v49, %v497_v47 }
 0x3a9   :  { %v4319_v51 = vpop.f32.mrf.mxu0 }
 0x3aa   :  { %v607_v52 = vmul.f32 %v5316_v48, %v5318_v50  ;;  %v616_v16 = vmul.f32 %v5371_v13, %v5318_v50  ;;  %v625_v25 = vmul.f32 %v5392_v20, %v5318_v50  ;;  %v634_v37 = vmul.f32 %v5415_v31, %v5318_v50 }
 0x3ab   :  { %v584_v53 = vpop.f32.mrf.mxu0 }
 0x3ac   :  { %4342 = vmatprep.mubr.msk.f32.mxu1 %vm50_vm0, %v607_v52  ;;  %v5341_v2 = vadd.f32 %v584_v53, %v497_v47  ;;  %v472_v53 = vld [vmem:[%s6719_s10 + $0x18] sm:$0xff] }
 0x3ad   :  { %v4322_v54 = vpop.f32.mrf.mxu0 }
 0x3ae   :  { %v608_v9 = vmul.f32 %v5316_v48, %v5341_v2  ;;  %v617_v18 = vmul.f32 %v5371_v13, %v5341_v2  ;;  %v626_v28 = vmul.f32 %v5392_v20, %v5341_v2  ;;  %v635_v38 = vmul.f32 %v5415_v31, %v5341_v2 }
 0x3af   :  { %v589_v55 = vpop.f32.mrf.mxu0 }
 0x3b0   :  { %v5337_v1 = vadd.f32 %v589_v55, %v497_v47 }
 0x3b1   :  { %v4325_v56 = vpop.f32.mrf.mxu0 }
 0x3b2   :  { %v609_v11 = vmul.f32 %v5316_v48, %v5337_v1  ;;  %v618_v19 = vmul.f32 %v5371_v13, %v5337_v1  ;;  %v627_v29 = vmul.f32 %v5392_v20, %v5337_v1  ;;  %v636_v36 = vmul.f32 %v5415_v31, %v5337_v1 }
 0x3b3   :  { %v594_v57 = vpop.f32.mrf.mxu0 }
 0x3b4   :  { %v5323_v58 = vadd.f32 %v594_v57, %v497_v47 }
 0x3b5   :  { %v4328_v59 = vpop.f32.mrf.mxu0 }
 0x3b6   :  { %1156 = vrot.lane.b32.xlu0 %v5323_v58, %s4979_s23  ;;  %v610_v14 = vmul.f32 %v5316_v48, %v5323_v58  ;;  %v619_v21 = vmul.f32 %v5371_v13, %v5323_v58  ;;  %v628_v33 = vmul.f32 %v5392_v20, %v5323_v58  ;;  %v637_v39 = vmul.f32 %v5415_v31, %v5323_v58 }
 0x3c6   :  { %v5327_v60 = vpop.f32.mrf.mxu1 }
 0x3c7   :  { %4330 = vmatmul.mubr.msk.f32.gmra.mxu0 %vm50_vm0, %v5327_v60 }
 0x3c8   :  { %v4308_v61 = vpop.f32.mrf.mxu1 }
 0x428   :  { %v1157_v12 = vpop.permute.xlu0 %1156 }
 0x487   :  { %v599_v62 = vpop.f32.mrf.mxu0 }
 0x488   :  { %v5331_v63 = vadd.f32 %v599_v62, %v497_v47  ;;  %v469_v47 = vld [vmem:[%s6719_s10] sm:$0xff] }
 0x489   :  { %v4331_v0 = vpop.f32.mrf.mxu0 }
 0x48a   :  { %652 = vrot.lane.b32.xlu1 %v5331_v63, %s4980_s24  ;;  %v611_v15 = vmul.f32 %v5316_v48, %v5331_v63  ;;  %v620_v22 = vmul.f32 %v5371_v13, %v5331_v63  ;;  %v629_v35 = vmul.f32 %v5392_v20, %v5331_v63  ;;  %v638_v40 = vmul.f32 %v5415_v31, %v5331_v63 }
 0x48e   :  { %650 = vrot.lane.b32.xlu1 %v5323_v58, %s4980_s24 }
 0x492   :  { %648 = vrot.lane.b32.xlu1 %v5337_v1, %s4980_s24 }
 0x496   :  { %646 = vrot.lane.b32.xlu1 %v5341_v2, %s4980_s24 }
 0x49a   :  { %644 = vrot.lane.b32.xlu1 %v5318_v50, %s4980_s24 }
 0x49e   :  { %1158 = vrot.lane.b32.xlu1 %v5331_v63, %s4979_s23  ;;  %v471_v63 = vld [vmem:[%s6719_s10 + $0x10] sm:$0xff] }
 0x4fc   :  { %v653_v3 = vpop.permute.xlu1 %652 }
 0x4fd   :  { %4332 = vmatprep.subr.msk.mxu1 %vm50_vm0, %v653_v3 }
 0x4fe   :  { %4333 = vmatpush3.xpose.msk.msra.mxu1 %vm50_vm0, %v653_v3  ;;  %v473_v3 = vld [vmem:[%s6719_s10 + $0x20] sm:$0xff] }
 0x500   :  { %v651_v4 = vpop.permute.xlu1 %650 }
 0x501   :  { %4334 = vmatprep.subr.msk.mxu1 %vm50_vm0, %v651_v4 }
 0x502   :  { %4335 = vmatpush3.xpose.msk.msra.mxu1 %vm50_vm0, %v651_v4 }
 0x504   :  { %v649_v5 = vpop.permute.xlu1 %648 }
 0x505   :  { %4336 = vmatprep.subr.msk.mxu1 %vm50_vm0, %v649_v5 }
 0x506   :  { %4337 = vmatpush3.xpose.msk.msra.mxu1 %vm50_vm0, %v649_v5 }
 0x508   :  { %v647_v6 = vpop.permute.xlu1 %646 }
 0x509   :  { %4338 = vmatprep.subr.msk.mxu1 %vm50_vm0, %v647_v6 }
 0x50a   :  { %4339 = vmatpush3.xpose.msk.msra.mxu1 %vm50_vm0, %v647_v6 }
 0x50c   :  { %v645_v7 = vpop.permute.xlu1 %644 }
 0x50d   :  { %4340 = vmatprep.subr.msk.mxu1 %vm50_vm0, %v645_v7 }
 0x50e   :  { %4341 = vmatpush3.xpose.msk.msra.mxu1 %vm50_vm0, %v645_v7 }
 0x50f   :  { %4412 = vmatprep.subr.mxu1 %v4973_v24 }
 0x510   :  { %v1159_v10 = vpop.permute.xlu1 %1158 }
 0x511   :  { %4343 = vmatmul.mubr.msk.f32.vlgmr.msra.gmra.mxu1 %vm50_vm0, %v608_v9  ;;  %4372 = vmatprep.subr.mxu0 %v1159_v10 }
 0x512   :  { %4345 = vmatprep.mubr.msk.f32.mxu1 %vm50_vm0, %v609_v11  ;;  %4373 = vmatpush3.msra.mxu0 %v1159_v10  ;;  %v474_v10 = vld [vmem:[%s6719_s10 + $0x28] sm:$0xff] }
 0x513   :  { %4374 = vmatprep.subr.mxu0 %v1157_v12 }
 0x514   :  { %4375 = vmatpush3.msra.mxu0 %v1157_v12 }
 0x515   :  { %4346 = vmatmul.mubr.msk.f32.gmra.mxu1 %vm50_vm0, %v610_v14 }
 0x516   :  { %4348 = vmatprep.mubr.msk.f32.mxu1 %vm50_vm0, %v611_v15  ;;  %v475_v15 = vld [vmem:[%s6719_s10 + $0x30] sm:$0xff] }
 0x519   :  { %4349 = vmatmul.mubr.msk.f32.gmra.mxu1 %vm50_vm0, %v616_v16 }
 0x51a   :  { %4351 = vmatprep.mubr.msk.f32.mxu1 %vm50_vm0, %v617_v18 }
 0x51d   :  { %4352 = vmatmul.mubr.msk.f32.gmra.mxu1 %vm50_vm0, %v618_v19 }
 0x51e   :  { %4354 = vmatprep.mubr.msk.f32.mxu1 %vm50_vm0, %v619_v21 }
 0x521   :  { %4355 = vmatmul.mubr.msk.f32.gmra.mxu1 %vm50_vm0, %v620_v22  ;;  %v476_v22 = vld [vmem:[%s6719_s10 + $0x38] sm:$0xff] }
 0x522   :  { %4357 = vmatprep.mubr.msk.f32.mxu1 %vm50_vm0, %v625_v25 }
 0x525   :  { %4358 = vmatmul.mubr.msk.f32.gmra.mxu1 %vm50_vm0, %v626_v28 }
 0x526   :  { %4360 = vmatprep.mubr.msk.f32.mxu1 %vm50_vm0, %v627_v29 }
 0x529   :  { %4361 = vmatmul.mubr.msk.f32.gmra.mxu1 %vm50_vm0, %v628_v33 }
 0x52a   :  { %4363 = vmatprep.mubr.msk.f32.mxu1 %vm50_vm0, %v629_v35  ;;  %v477_v35 = vld [vmem:[%s6719_s10 + $0x40] sm:$0xff] }
 0x52d   :  { %4364 = vmatmul.mubr.msk.f32.gmra.mxu1 %vm50_vm0, %v634_v37 }
 0x52e   :  { %4366 = vmatprep.mubr.msk.f32.mxu1 %vm50_vm0, %v635_v38 }
 0x531   :  { %4367 = vmatmul.mubr.msk.f32.gmra.mxu1 %vm50_vm0, %v636_v36 }
 0x532   :  { %4369 = vmatprep.mubr.msk.f32.mxu1 %vm50_vm0, %v637_v39 }
 0x535   :  { %4370 = vmatmul.mubr.msk.f32.gmra.mxu1 %vm50_vm0, %v638_v40 }
 0x536   :  { %4420 = vmatprep.mubr.msk.f32.mxu1 %vm4978_vm2, %v4973_v24 }
 0x5d1   :  { %v4344_v41 = vpop.f32.mrf.mxu1 }
 0x5d2   :  { %v890_v43 = vmul.f32 0.35355338, %v4344_v41  ;;  %v478_v41 = vld [vmem:[%s6719_s10 + $0x48] sm:$0xff] }
 0x5d3   :  { %v790_v44 = vpop.f32.mrf.mxu1 }
 0x5d4   :  { %v889_v49 = vmul.f32 0.35355338, %v790_v44  ;;  %v5446_v51 = vadd.f32 %v890_v43, %v470_v42 }
 0x5d5   :  { %v4347_v52 = vpop.f32.mrf.mxu1 }
 0x5d6   :  { %v892_v54 = vmul.f32 0.35355338, %v4347_v52  ;;  %v933_v55 = vsel %vm929_vm5, %v5446_v51, -inf  ;;  %v5453_v56 = vadd.f32 %v889_v49, %v469_v47  ;;  %v479_v47 = vld [vmem:[%s6719_s10 + $0x50] sm:$0xff] }
 0x5d7   :  { %934 = vmax.xlane.f32.xlu1 %v933_v55  ;;  %v800_v57 = vpop.f32.mrf.mxu1 }
 0x5d8   :  { %v891_v58 = vmul.f32 0.35355338, %v800_v57  ;;  %v930_v59 = vsel %vm929_vm5, %v5453_v56, -inf  ;;  %v5457_v61 = vadd.f32 %v892_v54, %v472_v53  ;;  %v480_v57 = vld [vmem:[%s6719_s10 + $0x58] sm:$0xff] }
 0x5d9   :  { %931 = vmax.xlane.f32.xlu0 %v930_v59  ;;  %v4350_v62 = vpop.f32.mrf.mxu1 }
 0x5da   :  { %v894_v4 = vmul.f32 0.35355338, %v4350_v62  ;;  %v939_v6 = vsel %vm929_vm5, %v5457_v61, -inf  ;;  %v5467_v7 = vadd.f32 %v891_v58, %v471_v63  ;;  %v481_v63 = vld [vmem:[%s6719_s10 + $0x60] sm:$0xff] }
 0x5db   :  { %v810_v0 = vpop.f32.mrf.mxu1 }
 0x5dc   :  { %v893_v5 = vmul.f32 0.35355338, %v810_v0  ;;  %v936_v18 = vsel %vm929_vm5, %v5467_v7, -inf  ;;  %v5481_v21 = vadd.f32 %v894_v4, %v474_v10 }
 0x5dd   :  { %940 = vmax.xlane.f32.xlu0 %v939_v6  ;;  %v4353_v9 = vpop.f32.mrf.mxu1  ;;  %v482_v6 = vld [vmem:[%s6719_s10 + $0x68] sm:$0xff] }
 0x5de   :  { %v5472_v11 = vadd.f32 %v893_v5, %v473_v3  ;;  %v896_v12 = vmul.f32 0.35355338, %v4353_v9  ;;  %v945_v36 = vsel %vm929_vm5, %v5481_v21, -inf }
 0x5df   :  { %v820_v14 = vpop.f32.mrf.mxu1 }
 0x5e0   :  { %v895_v16 = vmul.f32 0.35355338, %v820_v14  ;;  %v942_v19 = vsel %vm929_vm5, %v5472_v11, -inf  ;;  %v5488_v33 = vadd.f32 %v896_v12, %v476_v22 }
 0x5e1   :  { %937 = vmax.xlane.f32.xlu0 %v936_v18  ;;  %943 = vmax.xlane.f32.xlu1 %v942_v19  ;;  %v4356_v25 = vpop.f32.mrf.mxu1 }
 0x5e2   :  { %v5486_v28 = vadd.f32 %v895_v16, %v475_v15  ;;  %v898_v37 = vmul.f32 0.35355338, %v4356_v25  ;;  %v951_v44 = vsel %vm929_vm5, %v5488_v33, -inf  ;;  %v483_v15 = vld [vmem:[%s6719_s10 + $0x70] sm:$0xff] }
 0x5e3   :  { %v830_v29 = vpop.f32.mrf.mxu1 }
 0x5e4   :  { %v897_v38 = vmul.f32 0.35355338, %v830_v29  ;;  %v948_v39 = vsel %vm929_vm5, %v5486_v28, -inf  ;;  %v5509_v54 = vadd.f32 %v898_v37, %v478_v41  ;;  %v484_v29 = vld [vmem:[%s6719_s10 + $0x78] sm:$0xff] }
 0x5e5   :  { %946 = vmax.xlane.f32.xlu0 %v945_v36  ;;  %949 = vmax.xlane.f32.xlu1 %v948_v39  ;;  %v4359_v40 = vpop.f32.mrf.mxu1  ;;  %v485_v36 = vld [vmem:[%s6719_s10 + $0x80] sm:$0xff] }
 0x5e6   :  { %v5500_v42 = vadd.f32 %v897_v38, %v477_v35  ;;  %v900_v49 = vmul.f32 0.35355338, %v4359_v40  ;;  %v957_v3 = vsel %vm929_vm5, %v5509_v54, -inf }
 0x5e7   :  { %v840_v43 = vpop.f32.mrf.mxu1 }
 0x5e8   :  { %v899_v52 = vmul.f32 0.35355338, %v840_v43  ;;  %v954_v53 = vsel %vm929_vm5, %v5500_v42, -inf  ;;  %v5523_v5 = vadd.f32 %v900_v49, %v480_v57 }
 0x5e9   :  { %952 = vmax.xlane.f32.xlu0 %v951_v44  ;;  %955 = vmax.xlane.f32.xlu1 %v954_v53  ;;  %v4362_v55 = vpop.f32.mrf.mxu1 }
 0x5ea   :  { %v5514_v58 = vadd.f32 %v899_v52, %v479_v47  ;;  %v902_v59 = vmul.f32 0.35355338, %v4362_v55  ;;  %v963_v19 = vsel %vm929_vm5, %v5523_v5, -inf  ;;  %v486_v47 = vld [vmem:[%s6719_s10 + $0x88] sm:$0xff] }
 0x5eb   :  { %v850_v62 = vpop.f32.mrf.mxu1 }
 0x5ec   :  { %v901_v0 = vmul.f32 0.35355338, %v850_v62  ;;  %v960_v4 = vsel %vm929_vm5, %v5514_v58, -inf  ;;  %v5530_v14 = vadd.f32 %v902_v59, %v482_v6  ;;  %v488_v59 = vld [vmem:[%s6719_s10 + $0x98] sm:$0xff]  ;;  %v487_v6 = vld [vmem:[%s6719_s10 + $0x90] sm:$0xff] }
 0x5ed   :  { %958 = vmax.xlane.f32.xlu0 %v957_v3  ;;  %961 = vmax.xlane.f32.xlu1 %v960_v4  ;;  %v4365_v9 = vpop.f32.mrf.mxu1 }
 0x5ee   :  { %v5528_v10 = vadd.f32 %v901_v0, %v481_v63  ;;  %v904_v16 = vmul.f32 0.35355338, %v4365_v9  ;;  %v969_v38 = vsel %vm929_vm5, %v5530_v14, -inf }
 0x5ef   :  { %v860_v12 = vpop.f32.mrf.mxu1 }
 0x5f0   :  { %v903_v18 = vmul.f32 0.35355338, %v860_v12  ;;  %v966_v22 = vsel %vm929_vm5, %v5528_v10, -inf  ;;  %v5551_v43 = vadd.f32 %v904_v16, %v484_v29 }
 0x5f1   :  { %964 = vmax.xlane.f32.xlu0 %v963_v19  ;;  %967 = vmax.xlane.f32.xlu1 %v966_v22  ;;  %v4368_v25 = vpop.f32.mrf.mxu1 }
 0x5f2   :  { %v5542_v35 = vadd.f32 %v903_v18, %v483_v15  ;;  %v906_v39 = vmul.f32 0.35355338, %v4368_v25  ;;  %v975_v53 = vsel %vm929_vm5, %v5551_v43, -inf }
 0x5f3   :  { %v870_v37 = vpop.f32.mrf.mxu1 }
 0x5f4   :  { %v905_v40 = vmul.f32 0.35355338, %v870_v37  ;;  %v972_v41 = vsel %vm929_vm5, %v5542_v35, -inf  ;;  %v5562_v57 = vadd.f32 %v906_v39, %v486_v47 }
 0x5f5   :  { %970 = vmax.xlane.f32.xlu0 %v969_v38  ;;  %973 = vmax.xlane.f32.xlu1 %v972_v41  ;;  %v4371_v44 = vpop.f32.mrf.mxu1 }
 0x5f6   :  { %v5556_v49 = vadd.f32 %v905_v40, %v485_v36  ;;  %v908_v52 = vmul.f32 0.35355338, %v4371_v44  ;;  %v981_v62 = vsel %vm929_vm5, %v5562_v57, -inf }
 0x5f7   :  { %v880_v3 = vpop.f32.mrf.mxu1 }
 0x5f8   :  { %v978_v55 = vsel %vm929_vm5, %v5556_v49, -inf  ;;  %v5569_v63 = vadd.f32 %v908_v52, %v488_v59  ;;  %v907_v4 = vmul.f32 0.35355338, %v880_v3 }
 0x5f9   :  { %976 = vmax.xlane.f32.xlu0 %v975_v53  ;;  %979 = vmax.xlane.f32.xlu1 %v978_v55 }
 0x5fa   :  { %v987_v0 = vsel %vm929_vm5, %v5569_v63, -inf  ;;  %v5578_v9 = vadd.f32 %v907_v4, %v487_v6 }
 0x5fc   :  { %v984_v12 = vsel %vm929_vm5, %v5578_v9, -inf }
 0x5fd   :  { %982 = vmax.xlane.f32.xlu0 %v981_v62 }
 0x601   :  { %988 = vmax.xlane.f32.xlu0 %v987_v0 }
 0x60a   :  { %1154 = vrot.lane.b32.xlu1 %v5337_v1, %s4979_s23 }
 0x62e   :  { %985 = vmax.xlane.f32.xlu1 %v984_v12 }
 0x660   :  { %v935_v15 = vpop.xlane.xlu1 %934 }
 0x661   :  { %v991_v16 = vsub.f32 %v5446_v51, %v935_v15 }
 0x662   :  { %v932_v18 = vpop.xlane.xlu0 %931 }
 0x663   :  { %v1012_v19 = vmul.f32 1.442695, %v991_v16  ;;  %v990_v22 = vsub.f32 %v5453_v56, %v932_v18 }
 0x665   :  { %4697 = vpow2.f32 %v1012_v19  ;;  %v1010_v1 = vmul.f32 1.442695, %v990_v22 }
 0x666   :  { %v941_v25 = vpop.xlane.xlu0 %940 }
 0x667   :  { %4699 = vpow2.f32 %v1010_v1  ;;  %v993_v29 = vsub.f32 %v5457_v61, %v941_v25 }
 0x669   :  { %v1016_v37 = vmul.f32 1.442695, %v993_v29 }
 0x66a   :  { %v938_v38 = vpop.xlane.xlu0 %937  ;;  %v944_v36 = vpop.xlane.xlu1 %943 }
 0x66b   :  { %4701 = vpow2.f32 %v1016_v37  ;;  %v992_v39 = vsub.f32 %v5467_v7, %v938_v38  ;;  %v994_v40 = vsub.f32 %v5472_v11, %v944_v36 }
 0x66d   :  { %v1014_v41 = vmul.f32 1.442695, %v992_v39  ;;  %v1018_v51 = vmul.f32 1.442695, %v994_v40 }
 0x66e   :  { %v947_v44 = vpop.xlane.xlu0 %946  ;;  %v950_v47 = vpop.xlane.xlu1 %949 }
 0x66f   :  { %4703 = vpow2.f32 %v1014_v41  ;;  %v995_v56 = vsub.f32 %v5481_v21, %v947_v44  ;;  %v996_v52 = vsub.f32 %v5486_v28, %v950_v47 }
 0x670   :  { %4705 = vpow2.f32 %v1018_v51 }
 0x671   :  { %v1020_v53 = vmul.f32 1.442695, %v995_v56  ;;  %v1022_v61 = vmul.f32 1.442695, %v996_v52 }
 0x672   :  { %v5589_v55 = vpop.eup %4697  ;;  %v953_v59 = vpop.xlane.xlu0 %952 }
 0x673   :  { %v956_v62 = vpop.xlane.xlu1 %955  ;;  %4707 = vpow2.f32 %v1020_v53  ;;  %v997_v7 = vsub.f32 %v5488_v33, %v953_v59  ;;  %v1053_v0 = vsel %vm929_vm5, %v5589_v55, 0.0 }
 0x674   :  { %v998_v11 = vsub.f32 %v5500_v42, %v956_v62  ;;  %v5595_v3 = vpop.eup %4699  ;;  %1054 = vadd.xlane.f32.xlu0 %v1053_v0  ;;  %4709 = vpow2.f32 %v1022_v61 }
 0x675   :  { %v1024_v21 = vmul.f32 1.442695, %v997_v7  ;;  %v1050_v4 = vsel %vm929_vm5, %v5595_v3, 0.0 }
 0x676   :  { %v1026_v28 = vmul.f32 1.442695, %v998_v11  ;;  %v959_v6 = vpop.xlane.xlu0 %958  ;;  %1051 = vadd.xlane.f32.xlu1 %v1050_v4 }
 0x677   :  { %v962_v12 = vpop.xlane.xlu1 %961  ;;  %4711 = vpow2.f32 %v1024_v21  ;;  %v999_v33 = vsub.f32 %v5509_v54, %v959_v6 }
 0x678   :  { %v5600_v15 = vpop.eup %4701  ;;  %4713 = vpow2.f32 %v1026_v28  ;;  %v1000_v16 = vsub.f32 %v5514_v58, %v962_v12 }
 0x679   :  { %v1028_v42 = vmul.f32 1.442695, %v999_v33  ;;  %v1059_v18 = vsel %vm929_vm5, %v5600_v15, 0.0 }
 0x67a   :  { %v965_v19 = vpop.xlane.xlu0 %964  ;;  %1060 = vadd.xlane.f32.xlu0 %v1059_v18  ;;  %v1030_v29 = vmul.f32 1.442695, %v1000_v16 }
 0x67b   :  { %v968_v22 = vpop.xlane.xlu1 %967  ;;  %4715 = vpow2.f32 %v1028_v42  ;;  %v1001_v1 = vsub.f32 %v5523_v5, %v965_v19 }
 0x67c   :  { %v5606_v25 = vpop.eup %4703  ;;  %v1002_v28 = vsub.f32 %v5528_v10, %v968_v22 }
 0x67d   :  { %v1032_v37 = vmul.f32 1.442695, %v1001_v1  ;;  %v1056_v54 = vsel %vm929_vm5, %v5606_v25, 0.0  ;;  %v5610_v38 = vpop.eup %4705 }
 0x67e   :  { %1057 = vadd.xlane.f32.xlu1 %v1056_v54  ;;  %v1062_v5 = vsel %vm929_vm5, %v5610_v38, 0.0  ;;  %v971_v21 = vpop.xlane.xlu0 %970  ;;  %v1034_v6 = vmul.f32 1.442695, %v1002_v28 }
 0x67f   :  { %v974_v36 = vpop.xlane.xlu1 %973  ;;  %4717 = vpow2.f32 %v1032_v37  ;;  %v1003_v42 = vsub.f32 %v5530_v14, %v971_v21 }
 0x680   :  { %v5612_v58 = vpop.eup %4707  ;;  %4719 = vpow2.f32 %v1030_v29  ;;  %v1004_v12 = vsub.f32 %v5542_v35, %v974_v36 }
 0x681   :  { %v1065_v39 = vsel %vm929_vm5, %v5612_v58, 0.0  ;;  %v5618_v40 = vpop.eup %4709  ;;  %4721 = vpow2.f32 %v1034_v6  ;;  %v1036_v19 = vmul.f32 1.442695, %v1003_v42 }
 0x682   :  { %1066 = vadd.xlane.f32.xlu0 %v1065_v39  ;;  %1063 = vadd.xlane.f32.xlu1 %v1062_v5  ;;  %v1068_v47 = vsel %vm929_vm5, %v5618_v40, 0.0  ;;  %v977_v4 = vpop.xlane.xlu0 %976  ;;  %v1038_v16 = vmul.f32 1.442695, %v1004_v12 }
 0x683   :  { %v980_v41 = vpop.xlane.xlu1 %979 }
 0x684   :  { %v5620_v51 = vpop.eup %4711  ;;  %v1006_v18 = vsub.f32 %v5556_v49, %v980_v41  ;;  %4723 = vpow2.f32 %v1038_v16 }
 0x685   :  { %v1071_v44 = vsel %vm929_vm5, %v5620_v51, 0.0  ;;  %v5626_v56 = vpop.eup %4713  ;;  %4725 = vpow2.f32 %v1036_v19 }
 0x686   :  { %1072 = vadd.xlane.f32.xlu0 %v1071_v44  ;;  %1069 = vadd.xlane.f32.xlu1 %v1068_v47  ;;  %v1074_v59 = vsel %vm929_vm5, %v5626_v56, 0.0  ;;  %v983_v33 = vpop.xlane.xlu0 %982  ;;  %v1042_v1 = vmul.f32 1.442695, %v1006_v18 }
 0x687   :  { %v1155_v52 = vpop.permute.xlu1 %1154  ;;  %v1007_v10 = vsub.f32 %v5562_v57, %v983_v33 }
 0x688   :  { %4376 = vmatprep.subr.mxu0 %v1155_v52  ;;  %v5628_v53 = vpop.eup %4715  ;;  %4727 = vpow2.f32 %v1042_v1 }
 0x689   :  { %4377 = vmatpush3.msra.mxu0 %v1155_v52  ;;  %v1077_v61 = vsel %vm929_vm5, %v5628_v53, 0.0  ;;  %v1044_v35 = vmul.f32 1.442695, %v1007_v10 }
 0x68a   :  { %1078 = vadd.xlane.f32.xlu0 %v1077_v61  ;;  %1075 = vadd.xlane.f32.xlu1 %v1074_v59  ;;  %v989_v22 = vpop.xlane.xlu0 %988 }
 0x68b   :  { %v1009_v29 = vsub.f32 %v5569_v63, %v989_v22 }
 0x68c   :  { %v5634_v62 = vpop.eup %4717 }
 0x68d   :  { %v1083_v7 = vsel %vm929_vm5, %v5634_v62, 0.0  ;;  %v5638_v11 = vpop.eup %4719  ;;  %v1048_v54 = vmul.f32 1.442695, %v1009_v29 }
 0x68e   :  { %1084 = vadd.xlane.f32.xlu0 %v1083_v7  ;;  %v1080_v0 = vsel %vm929_vm5, %v5638_v11, 0.0  ;;  %v5654_v36 = vpop.eup %4721 }
 0x691   :  { %v5658_v57 = vpop.eup %4723 }
 0x692   :  { %1081 = vadd.xlane.f32.xlu0 %v1080_v0  ;;  %v5660_v63 = vpop.eup %4725  ;;  %v1092_v39 = vsel %vm929_vm5, %v5658_v57, 0.0 }
 0x693   :  { %v1089_v41 = vsel %vm929_vm5, %v5660_v63, 0.0 }
 0x69b   :  { %1152 = vrot.lane.b32.xlu1 %v5341_v2, %s4979_s23  ;;  %v1005_v2 = vsub.f32 %v5551_v43, %v977_v4  ;;  %v1086_v43 = vsel %vm929_vm5, %v5654_v36, 0.0 }
 0x6a8   :  { %1150 = vrot.lane.b32.xlu0 %v5318_v50, %s4979_s23  ;;  %v1040_v50 = vmul.f32 1.442695, %v1005_v2 }
 0x6aa   :  { %4729 = vpow2.f32 %v1040_v50 }
 0x6ab   :  { %4731 = vpow2.f32 %v1044_v35 }
 0x6ac   :  { %4733 = vpow2.f32 %v1048_v54 }
 0x6b7   :  { %v986_v37 = vpop.xlane.xlu1 %985 }
 0x6b8   :  { %v1008_v14 = vsub.f32 %v5578_v9, %v986_v37  ;;  %v5664_v9 = vpop.eup %4727 }
 0x6b9   :  { %v5666_v5 = vpop.eup %4729  ;;  %v1098_v44 = vsel %vm929_vm5, %v5664_v9, 0.0 }
 0x6ba   :  { %v1046_v49 = vmul.f32 1.442695, %v1008_v14  ;;  %v5672_v47 = vpop.eup %4731  ;;  %v1095_v61 = vsel %vm929_vm5, %v5666_v5, 0.0 }
 0x6bb   :  { %v5674_v52 = vpop.eup %4733  ;;  %v1101_v59 = vsel %vm929_vm5, %v5672_v47, 0.0 }
 0x6bc   :  { %4735 = vpow2.f32 %v1046_v49  ;;  %v1107_v0 = vsel %vm929_vm5, %v5674_v52, 0.0 }
 0x6bf   :  { %1087 = vadd.xlane.f32.xlu1 %v1086_v43 }
 0x6c3   :  { %1093 = vadd.xlane.f32.xlu1 %v1092_v39 }
 0x6c7   :  { %1090 = vadd.xlane.f32.xlu0 %v1089_v41  ;;  %1099 = vadd.xlane.f32.xlu1 %v1098_v44 }
 0x6c9   :  { %v5680_v7 = vpop.eup %4735 }
 0x6ca   :  { %v1104_v21 = vsel %vm929_vm5, %v5680_v7, 0.0 }
 0x6cb   :  { %1096 = vadd.xlane.f32.xlu0 %v1095_v61  ;;  %1102 = vadd.xlane.f32.xlu1 %v1101_v59 }
 0x6cf   :  { %1108 = vadd.xlane.f32.xlu1 %v1107_v0  ;;  %1105 = vadd.xlane.f32.xlu0 %v1104_v21 }
 0x6fd   :  { %v1055_v4 = vpop.xlane.xlu0 %1054 }
 0x6ff   :  { %v1052_v28 = vpop.xlane.xlu1 %1051 }
 0x700   :  { %4737 = vrcp.f32 %v1052_v28 }
 0x701   :  { %4739 = vrcp.f32 %v1055_v4 }
 0x703   :  { %v1061_v6 = vpop.xlane.xlu0 %1060 }
 0x707   :  { %v1058_v12 = vpop.xlane.xlu1 %1057 }
 0x708   :  { %4741 = vrcp.f32 %v1058_v12 }
 0x709   :  { %4743 = vrcp.f32 %v1061_v6 }
 0x70b   :  { %v1067_v33 = vpop.xlane.xlu0 %1066  ;;  %v1064_v42 = vpop.xlane.xlu1 %1063 }
 0x70c   :  { %4745 = vrcp.f32 %v1064_v42 }
 0x70d   :  { %v4738_v16 = vpop.eup %4737  ;;  %4747 = vrcp.f32 %v1067_v33 }
 0x70e   :  { %v1130_v18 = vmul.f32 %v4738_v16, %v5595_v3  ;;  %v4740_v35 = vpop.eup %4739 }
 0x70f   :  { %v1073_v19 = vpop.xlane.xlu0 %1072  ;;  %v1070_v2 = vpop.xlane.xlu1 %1069  ;;  %v1131_v14 = vmul.f32 %v4740_v35, %v5589_v55 }
 0x710   :  { %4382 = vmatprep.mubr.msk.f32.mxu0 %vm929_vm5, %v1130_v18  ;;  %4749 = vrcp.f32 %v1070_v2 }
 0x711   :  { %4751 = vrcp.f32 %v1073_v19 }
 0x713   :  { %v1079_v1 = vpop.xlane.xlu0 %1078  ;;  %v1076_v10 = vpop.xlane.xlu1 %1075 }
 0x714   :  { %4753 = vrcp.f32 %v1076_v10 }
 0x715   :  { %v4742_v3 = vpop.eup %4741  ;;  %4755 = vrcp.f32 %v1079_v1 }
 0x716   :  { %v4744_v54 = vpop.eup %4743  ;;  %v1132_v49 = vmul.f32 %v4742_v3, %v5606_v25 }
 0x717   :  { %v1085_v22 = vpop.xlane.xlu0 %1084  ;;  %v1153_v50 = vpop.permute.xlu1 %1152  ;;  %v1133_v39 = vmul.f32 %v4744_v54, %v5600_v15 }
 0x718   :  { %4378 = vmatprep.subr.mxu0 %v1153_v50 }
 0x719   :  { %4379 = vmatpush3.msra.mxu0 %v1153_v50  ;;  %v4746_v43 = vpop.eup %4745 }
 0x71a   :  { %v4748_v41 = vpop.eup %4747  ;;  %v1134_v55 = vmul.f32 %v4746_v43, %v5610_v38 }
 0x71b   :  { %v1082_v29 = vpop.xlane.xlu0 %1081  ;;  %v1135_v25 = vmul.f32 %v4748_v41, %v5612_v58 }
 0x71c   :  { %4757 = vrcp.f32 %v1082_v29 }
 0x71d   :  { %4759 = vrcp.f32 %v1085_v22  ;;  %v4750_v44 = vpop.eup %4749 }
 0x71e   :  { %v4752_v61 = vpop.eup %4751  ;;  %v1136_v59 = vmul.f32 %v4750_v44, %v5618_v40 }
 0x71f   :  { %v1151_v37 = vpop.permute.xlu0 %1150  ;;  %v1137_v15 = vmul.f32 %v4752_v61, %v5620_v51 }
 0x720   :  { %4380 = vmatprep.subr.mxu0 %v1151_v37 }
 0x721   :  { %4381 = vmatpush3.msra.mxu0 %v1151_v37  ;;  %v4754_v0 = vpop.eup %4753 }
 0x722   :  { %4383 = vmatmul.mubr.msk.f32.vlgmr.msra.gmra.mxu0 %vm929_vm5, %v1131_v14  ;;  %4435 = vmatprep.subr.mxu0 %v4973_v24  ;;  %v4756_v21 = vpop.eup %4755  ;;  %v1138_v38 = vmul.f32 %v4754_v0, %v5626_v56 }
 0x723   :  { %4385 = vmatprep.mubr.msk.f32.mxu0 %vm929_vm5, %v1132_v49  ;;  %v1139_v58 = vmul.f32 %v4756_v21, %v5628_v53 }
 0x726   :  { %4386 = vmatmul.mubr.msk.f32.gmra.mxu0 %vm929_vm5, %v1133_v39 }
 0x727   :  { %4388 = vmatprep.mubr.msk.f32.mxu0 %vm929_vm5, %v1134_v55 }
 0x729   :  { %v4758_v28 = vpop.eup %4757 }
 0x72a   :  { %4389 = vmatmul.mubr.msk.f32.gmra.mxu0 %vm929_vm5, %v1135_v25  ;;  %v4760_v4 = vpop.eup %4759  ;;  %v1140_v40 = vmul.f32 %v4758_v28, %v5638_v11 }
 0x72b   :  { %4391 = vmatprep.mubr.msk.f32.mxu0 %vm929_vm5, %v1136_v59  ;;  %v1141_v6 = vmul.f32 %v4760_v4, %v5634_v62 }
 0x72e   :  { %4392 = vmatmul.mubr.msk.f32.gmra.mxu0 %vm929_vm5, %v1137_v15 }
 0x72f   :  { %4394 = vmatprep.mubr.msk.f32.mxu0 %vm929_vm5, %v1138_v38 }
 0x732   :  { %4395 = vmatmul.mubr.msk.f32.gmra.mxu0 %vm929_vm5, %v1139_v58 }
 0x733   :  { %4397 = vmatprep.mubr.msk.f32.mxu0 %vm929_vm5, %v1140_v40 }
 0x736   :  { %4398 = vmatmul.mubr.msk.f32.gmra.mxu0 %vm929_vm5, %v1141_v6 }
 0x748   :  { %v1088_v51 = vpop.xlane.xlu1 %1087 }
 0x749   :  { %4761 = vrcp.f32 %v1088_v51 }
 0x74c   :  { %v1094_v56 = vpop.xlane.xlu1 %1093 }
 0x74d   :  { %4763 = vrcp.f32 %v1094_v56 }
 0x750   :  { %v1091_v12 = vpop.xlane.xlu0 %1090  ;;  %v1100_v33 = vpop.xlane.xlu1 %1099 }
 0x751   :  { %4765 = vrcp.f32 %v1091_v12 }
 0x752   :  { %4767 = vrcp.f32 %v1100_v33 }
 0x754   :  { %v1097_v53 = vpop.xlane.xlu0 %1096  ;;  %v1103_v42 = vpop.xlane.xlu1 %1102 }
 0x755   :  { %4769 = vrcp.f32 %v1097_v53 }
 0x756   :  { %v4762_v11 = vpop.eup %4761  ;;  %4771 = vrcp.f32 %v1103_v42 }
 0x757   :  { %v1142_v16 = vmul.f32 %v4762_v11, %v5654_v36 }
 0x758   :  { %v1106_v18 = vpop.xlane.xlu0 %1105  ;;  %v1109_v19 = vpop.xlane.xlu1 %1108 }
 0x759   :  { %4773 = vrcp.f32 %v1106_v18  ;;  %4400 = vmatprep.mubr.msk.f32.mxu0 %vm929_vm5, %v1142_v16 }
 0x75a   :  { %4775 = vrcp.f32 %v1109_v19  ;;  %v4764_v62 = vpop.eup %4763 }
 0x75b   :  { %v1144_v10 = vmul.f32 %v4764_v62, %v5658_v57 }
 0x75e   :  { %v4766_v2 = vpop.eup %4765 }
 0x75f   :  { %v1143_v1 = vmul.f32 %v4766_v2, %v5660_v63  ;;  %v4768_v22 = vpop.eup %4767 }
 0x760   :  { %v1146_v35 = vmul.f32 %v4768_v22, %v5664_v9  ;;  %v1433_v9 = vld [vmem:[%s6714_s5 + $0x18] sm:$0xff] }
 0x761   :  { %4401 = vmatmul.mubr.msk.f32.gmra.mxu0 %vm929_vm5, %v1143_v1  ;;  %4413 = vmatpush3.msra.mxu1 %v1433_v9 }
 0x762   :  { %v4770_v50 = vpop.eup %4769  ;;  %4403 = vmatprep.mubr.msk.f32.mxu0 %vm929_vm5, %v1144_v10  ;;  %4414 = vmatprep.subr.mxu1 %v4973_v24 }
 0x763   :  { %v1145_v36 = vmul.f32 %v4770_v50, %v5666_v5  ;;  %v4772_v29 = vpop.eup %4771  ;;  %v1432_v5 = vld [vmem:[%s6714_s5 + $0x10] sm:$0xff] }
 0x764   :  { %v1147_v63 = vmul.f32 %v4772_v29, %v5672_v47  ;;  %v1431_v47 = vld [vmem:[%s6714_s5 + $0x8] sm:$0xff]  ;;  %4415 = vmatpush3.msra.mxu1 %v1432_v5 }
 0x765   :  { %4404 = vmatmul.mubr.msk.f32.gmra.mxu0 %vm929_vm5, %v1145_v36  ;;  %4416 = vmatprep.subr.mxu1 %v4973_v24 }
 0x766   :  { %v4774_v3 = vpop.eup %4773  ;;  %4406 = vmatprep.mubr.msk.f32.mxu0 %vm929_vm5, %v1146_v35  ;;  %4417 = vmatpush3.msra.mxu1 %v1431_v47 }
 0x767   :  { %v1148_v57 = vmul.f32 %v4774_v3, %v5680_v7  ;;  %v4776_v37 = vpop.eup %4775  ;;  %4418 = vmatprep.subr.mxu1 %v4973_v24 }
 0x768   :  { %v1149_v14 = vmul.f32 %v4776_v37, %v5674_v52  ;;  %v1430_v52 = vld [vmem:[%s6714_s5] sm:$0xff] }
 0x769   :  { %4407 = vmatmul.mubr.msk.f32.gmra.mxu0 %vm929_vm5, %v1147_v63  ;;  %4419 = vmatpush3.msra.mxu1 %v1430_v52 }
 0x76a   :  { %4409 = vmatprep.mubr.msk.f32.mxu0 %vm929_vm5, %v1148_v57  ;;  %4458 = vmatprep.subr.mxu1 %v4973_v24 }
 0x76d   :  { %4410 = vmatmul.mubr.msk.f32.gmra.mxu0 %vm929_vm5, %v1149_v14 }
 0x76e   :  { %4443 = vmatprep.mubr.msk.f32.mxu0 %vm4978_vm2, %v4973_v24 }
 0x7e2   :  { %v4384_v7 = vpop.f32.mrf.mxu0 }
 0x7e3   :  { %v1391_v33 = vmul.f32 %v4384_v7, %v5316_v48 }
 0x7e4   :  { %v1291_v54 = vpop.f32.mrf.mxu0 }
 0x7e5   :  { %v1390_v38 = vmul.f32 %v1291_v54, %v5316_v48 }
 0x7e6   :  { %v4387_v49 = vpop.f32.mrf.mxu0 }
 0x7e7   :  { %v1393_v63 = vmul.f32 %v4387_v49, %v5316_v48 }
 0x7e8   :  { %v1301_v43 = vpop.f32.mrf.mxu0 }
 0x7e9   :  { %v1392_v62 = vmul.f32 %v1301_v43, %v5316_v48 }
 0x7ea   :  { %v4390_v39 = vpop.f32.mrf.mxu0 }
 0x7eb   :  { %v1400_v15 = vmul.f32 %v4390_v39, %v5371_v13 }
 0x7ec   :  { %v1311_v41 = vpop.f32.mrf.mxu0 }
 0x7ed   :  { %v1405_v4 = vadd.f32 %v1400_v15, %v1390_v38  ;;  %v1394_v52 = vmul.f32 %v1311_v41, %v5316_v48  ;;  %v5781_v41 = vsub.s32 2, %v5142_v46 }
 0x7ee   :  { %v4393_v55 = vpop.f32.mrf.mxu0 }
 0x7ef   :  { %v1402_v16 = vmul.f32 %v4393_v55, %v5371_v13 }
 0x7f0   :  { %v1321_v44 = vpop.f32.mrf.mxu0 }
 0x7f1   :  { %v1401_v6 = vmul.f32 %v1321_v44, %v5371_v13  ;;  %v1407_v50 = vadd.f32 %v1402_v16, %v1392_v62 }
 0x7f2   :  { %v4396_v25 = vpop.f32.mrf.mxu0 }
 0x7f3   :  { %v1406_v18 = vadd.f32 %v1401_v6, %v1391_v33  ;;  %v1404_v14 = vmul.f32 %v4396_v25, %v5371_v13  ;;  %v5786_v25 = vld [vmem:[%s6717_s8] sm:$0xff] }
 0x7f4   :  { %v1331_v61 = vpop.f32.mrf.mxu0 }
 0x7f5   :  { %v1403_v36 = vmul.f32 %v1331_v61, %v5371_v13  ;;  %v1409_v49 = vadd.f32 %v1404_v14, %v1394_v52  ;;  %v1437_v61 = vrot.slane %v5786_v25, %v5781_v41 }
 0x7f6   :  { %v4399_v59 = vpop.f32.mrf.mxu0 }
 0x7f7   :  { %v1411_v53 = vmul.f32 %v4399_v59, %v5392_v20  ;;  %v1408_v9 = vadd.f32 %v1403_v36, %v1393_v63 }
 0x7f8   :  { %v1341_v0 = vpop.f32.mrf.mxu0 }
 0x7f9   :  { %v1410_v28 = vmul.f32 %v1341_v0, %v5392_v20  ;;  %v1416_v2 = vadd.f32 %v1411_v53, %v1406_v18 }
 0x7fb   :  { %v1415_v51 = vadd.f32 %v1410_v28, %v1405_v4 }
 0x821   :  { %v4402_v21 = vpop.f32.mrf.mxu0 }
 0x822   :  { %v1413_v57 = vmul.f32 %v4402_v21, %v5392_v20 }
 0x823   :  { %v1351_v58 = vpop.f32.mrf.mxu0 }
 0x824   :  { %v1412_v1 = vmul.f32 %v1351_v58, %v5392_v20  ;;  %v1418_v7 = vadd.f32 %v1413_v57, %v1408_v9 }
 0x825   :  { %v4405_v40 = vpop.f32.mrf.mxu0 }
 0x826   :  { %v1420_v56 = vmul.f32 %v4405_v40, %v5415_v31  ;;  %v1417_v37 = vadd.f32 %v1412_v1, %v1407_v50 }
 0x827   :  { %v1361_v12 = vpop.f32.mrf.mxu0 }
 0x828   :  { %v1425_v42 = vadd.f32 %v1420_v56, %v1415_v51  ;;  %v1414_v54 = vmul.f32 %v1361_v12, %v5392_v20 }
 0x829   :  { %v4408_v11 = vpop.f32.mrf.mxu0 }
 0x82a   :  { %4421 = vmatmul.mubr.msk.f32.vlgmr.msra.gmra.mxu1 %vm50_vm0, %v1425_v42  ;;  %v1422_v29 = vmul.f32 %v4408_v11, %v5415_v31  ;;  %v1419_v55 = vadd.f32 %v1414_v54, %v1409_v49 }
 0x82b   :  { %v1371_v19 = vpop.f32.mrf.mxu0  ;;  %4423 = vmatprep.mubr.msk.f32.mxu1 %vm4978_vm2, %v4973_v24 }
 0x82c   :  { %v1421_v10 = vmul.f32 %v1371_v19, %v5415_v31  ;;  %v1427_v5 = vadd.f32 %v1422_v29, %v1417_v37 }
 0x82d   :  { %v4411_v22 = vpop.f32.mrf.mxu0 }
 0x82e   :  { %v1426_v35 = vadd.f32 %v1421_v10, %v1416_v2  ;;  %v1424_v43 = vmul.f32 %v4411_v22, %v5415_v31  ;;  %v1633_v10 = vld [vmem:[%s6715_s6 + $0x10] sm:$0xff] }
 0x82f   :  { %v1381_v3 = vpop.f32.mrf.mxu0 }
 0x830   :  { %4424 = vmatmul.mubr.msk.f32.gmra.mxu1 %vm50_vm0, %v1426_v35  ;;  %v1423_v47 = vmul.f32 %v1381_v3, %v5415_v31  ;;  %v1429_v44 = vadd.f32 %v1424_v43, %v1419_v55 }
 0x831   :  { %4426 = vmatprep.mubr.msk.f32.mxu1 %vm4978_vm2, %v4973_v24 }
 0x832   :  { %v1428_v39 = vadd.f32 %v1423_v47, %v1418_v7 }
 0x834   :  { %4427 = vmatmul.mubr.msk.f32.gmra.mxu1 %vm50_vm0, %v1427_v5 }
 0x835   :  { %4429 = vmatprep.mubr.msk.f32.mxu1 %vm4978_vm2, %v4973_v24 }
 0x838   :  { %4430 = vmatmul.mubr.msk.f32.gmra.mxu1 %vm50_vm0, %v1428_v39 }
 0x839   :  { %4432 = vmatprep.mubr.msk.f32.mxu1 %vm4978_vm2, %v4973_v24 }
 0x83c   :  { %4433 = vmatmul.mubr.msk.f32.gmra.mxu1 %vm50_vm0, %v1429_v44 }
 0x83d   :  { %4474 = vmatprep.mubr.msk.f32.mxu1 %vm4978_vm2, %v4973_v24 }
 0x8ea   :  { %v1519_v59 = vpop.f32.mrf.mxu1 }
 0x8eb   :  { %v1520_v0 = vadd.f32 %v1519_v59, %v1437_v61 }
 0x8ec   :  { %v4422_v15 = vpop.f32.mrf.mxu1 }
 0x8ed   :  { %v1543_v21 = vadd.f32 %v1520_v0, %v5261_v23  ;;  %v1632_v0 = vld [vmem:[%s6715_s6 + $0x8] sm:$0xff]  ;;  %v1631_v15 = vld [vmem:[%s6715_s6] sm:$0xff] }
 0x8ef   :  { %v1548_v38 = vsel %vm50_vm0, %v1543_v21, 0.0 }
 0x8f0   :  { %1549 = vadd.xlane.f32.xlu0 %v1548_v38  ;;  %v1524_v28 = vpop.f32.mrf.mxu1 }
 0x8f1   :  { %v1525_v58 = vadd.f32 %v1524_v28, %v1437_v61 }
 0x8f2   :  { %v4425_v4 = vpop.f32.mrf.mxu1 }
 0x8f3   :  { %v1544_v40 = vadd.f32 %v1525_v58, %v5270_v27 }
 0x8f4   :  { %v1529_v6 = vpop.f32.mrf.mxu1 }
 0x8f5   :  { %v1530_v51 = vadd.f32 %v1529_v6, %v1437_v61  ;;  %v1551_v56 = vsel %vm50_vm0, %v1544_v40, 0.0 }
 0x8f6   :  { %1552 = vadd.xlane.f32.xlu1 %v1551_v56  ;;  %v4428_v12 = vpop.f32.mrf.mxu1 }
 0x8f7   :  { %v1545_v33 = vadd.f32 %v1530_v51, %v5279_v30  ;;  %v1634_v30 = vld [vmem:[%s6715_s6 + $0x18] sm:$0xff] }
 0x8f8   :  { %v1534_v53 = vpop.f32.mrf.mxu1  ;;  %4436 = vmatpush3.msra.mxu0 %v1634_v30 }
 0x8f9   :  { %v1535_v42 = vadd.f32 %v1534_v53, %v1437_v61  ;;  %v1554_v23 = vsel %vm50_vm0, %v1545_v33, 0.0  ;;  %4437 = vmatprep.subr.mxu0 %v4973_v24  ;;  %v1616_v53 = vrot.slane %v5786_v25, %v5311_v45 }
 0x8fa   :  { %1555 = vadd.xlane.f32.xlu0 %v1554_v23  ;;  %v4431_v11 = vpop.f32.mrf.mxu1  ;;  %4438 = vmatpush3.msra.mxu0 %v1633_v10 }
 0x8fb   :  { %v1546_v16 = vadd.f32 %v1535_v42, %v5288_v32  ;;  %4439 = vmatprep.subr.mxu0 %v4973_v24 }
 0x8fc   :  { %v1539_v18 = vpop.f32.mrf.mxu1  ;;  %4440 = vmatpush3.msra.mxu0 %v1632_v0 }
 0x8fd   :  { %v1540_v19 = vadd.f32 %v1539_v18, %v1437_v61  ;;  %v1557_v27 = vsel %vm50_vm0, %v1546_v16, 0.0  ;;  %4441 = vmatprep.subr.mxu0 %v4973_v24 }
 0x8fe   :  { %1558 = vadd.xlane.f32.xlu1 %v1557_v27  ;;  %v4434_v62 = vpop.f32.mrf.mxu1  ;;  %4442 = vmatpush3.msra.mxu0 %v1631_v15 }
 0x8ff   :  { %v1547_v2 = vadd.f32 %v1540_v19, %v5327_v60  ;;  %4489 = vmatprep.subr.mxu0 %v4973_v24  ;;  %v1625_v19 = vrot.slane %v5786_v25, %v5360_v8 }
 0x901   :  { %v1560_v1 = vsel %vm50_vm0, %v1547_v2, 0.0 }
 0x902   :  { %1561 = vadd.xlane.f32.xlu0 %v1560_v1 }
 0x979   :  { %v1550_v32 = vpop.xlane.xlu0 %1549 }
 0x97a   :  { %v1563_v22 = vmul.f32 0.03125, %v1550_v32 }
 0x97c   :  { %v1568_v60 = vsub.f32 %v1543_v21, %v1563_v22 }
 0x97e   :  { %v1573_v50 = vmul.f32 %v1568_v60, %v1568_v60 }
 0x97f   :  { %v1553_v36 = vpop.xlane.xlu1 %1552 }
 0x980   :  { %v1564_v29 = vmul.f32 0.03125, %v1553_v36  ;;  %v1578_v35 = vsel %vm50_vm0, %v1573_v50, 0.0 }
 0x981   :  { %1579 = vadd.xlane.f32.xlu1 %v1578_v35 }
 0x982   :  { %v1569_v3 = vsub.f32 %v1544_v40, %v1564_v29 }
 0x983   :  { %v1556_v63 = vpop.xlane.xlu0 %1555 }
 0x984   :  { %v1565_v57 = vmul.f32 0.03125, %v1556_v63  ;;  %v1574_v37 = vmul.f32 %v1569_v3, %v1569_v3 }
 0x986   :  { %v1570_v14 = vsub.f32 %v1545_v33, %v1565_v57  ;;  %v1581_v9 = vsel %vm50_vm0, %v1574_v37, 0.0 }
 0x987   :  { %1582 = vadd.xlane.f32.xlu0 %v1581_v9  ;;  %v1559_v5 = vpop.xlane.xlu1 %1558 }
 0x988   :  { %v1566_v47 = vmul.f32 0.03125, %v1559_v5  ;;  %v1575_v52 = vmul.f32 %v1570_v14, %v1570_v14  ;;  %v1796_v5 = vld [vmem:[%s6716_s7 + $0x38] sm:$0xff] }
 0x989   :  { %4459 = vmatpush3.msra.mxu1 %v1796_v5 }
 0x98a   :  { %v1571_v7 = vsub.f32 %v1546_v16, %v1566_v47  ;;  %v1584_v54 = vsel %vm50_vm0, %v1575_v52, 0.0  ;;  %4460 = vmatprep.subr.mxu1 %v4973_v24  ;;  %v1795_v47 = vld [vmem:[%s6716_s7 + $0x30] sm:$0xff]  ;;  %v1794_v52 = vld [vmem:[%s6716_s7 + $0x28] sm:$0xff] }
 0x98b   :  { %1585 = vadd.xlane.f32.xlu1 %v1584_v54  ;;  %v1562_v49 = vpop.xlane.xlu0 %1561  ;;  %4461 = vmatpush3.msra.mxu1 %v1795_v47  ;;  %v1792_v54 = vld [vmem:[%s6716_s7 + $0x18] sm:$0xff] }
 0x98c   :  { %v1567_v43 = vmul.f32 0.03125, %v1562_v49  ;;  %v1576_v39 = vmul.f32 %v1571_v7, %v1571_v7  ;;  %4462 = vmatprep.subr.mxu1 %v4973_v24  ;;  %v1791_v49 = vld [vmem:[%s6716_s7 + $0x10] sm:$0xff] }
 0x98d   :  { %4463 = vmatpush3.msra.mxu1 %v1794_v52 }
 0x98e   :  { %v1572_v55 = vsub.f32 %v1547_v2, %v1567_v43  ;;  %v1587_v44 = vsel %vm50_vm0, %v1576_v39, 0.0  ;;  %4464 = vmatprep.subr.mxu1 %v4973_v24  ;;  %v1790_v43 = vld [vmem:[%s6716_s7 + $0x8] sm:$0xff]  ;;  %v1789_v39 = vld [vmem:[%s6716_s7] sm:$0xff] }
 0x98f   :  { %1588 = vadd.xlane.f32.xlu0 %v1587_v44 }
 0x990   :  { %v1577_v61 = vmul.f32 %v1572_v55, %v1572_v55 }
 0x992   :  { %v1590_v59 = vsel %vm50_vm0, %v1577_v61, 0.0 }
 0x993   :  { %1591 = vadd.xlane.f32.xlu1 %v1590_v59 }
 0xa0a   :  { %v1580_v21 = vpop.xlane.xlu1 %1579 }
 0xa0b   :  { %v1593_v38 = vmul.f32 0.03125, %v1580_v21 }
 0xa0d   :  { %v1598_v28 = vadd.f32 1e-05, %v1593_v38 }
 0xa0f   :  { %4777 = vrsqrt.f32 %v1598_v28 }
 0xa10   :  { %v1583_v58 = vpop.xlane.xlu0 %1582 }
 0xa11   :  { %v1594_v4 = vmul.f32 0.03125, %v1583_v58 }
 0xa13   :  { %v1599_v40 = vadd.f32 1e-05, %v1594_v4 }
 0xa14   :  { %v1586_v6 = vpop.xlane.xlu1 %1585 }
 0xa15   :  { %4779 = vrsqrt.f32 %v1599_v40  ;;  %v1595_v51 = vmul.f32 0.03125, %v1586_v6 }
 0xa17   :  { %v1600_v56 = vadd.f32 1e-05, %v1595_v51 }
 0xa18   :  { %v1589_v12 = vpop.xlane.xlu0 %1588 }
 0xa19   :  { %4781 = vrsqrt.f32 %v1600_v56  ;;  %v1596_v33 = vmul.f32 0.03125, %v1589_v12 }
 0xa1b   :  { %v1601_v42 = vadd.f32 1e-05, %v1596_v33 }
 0xa1c   :  { %v4778_v23 = vpop.eup %4777  ;;  %v1592_v11 = vpop.xlane.xlu1 %1591 }
 0xa1d   :  { %v1608_v16 = vmul.f32 %v4778_v23, %v1568_v60  ;;  %4783 = vrsqrt.f32 %v1601_v42  ;;  %v1597_v18 = vmul.f32 0.03125, %v1592_v11 }
 0xa1f   :  { %v1617_v27 = vmul.f32 %v1616_v53, %v1608_v16  ;;  %v1602_v62 = vadd.f32 1e-05, %v1597_v18 }
 0xa21   :  { %4785 = vrsqrt.f32 %v1602_v62  ;;  %v5825_v2 = vadd.f32 %v1625_v19, %v1617_v27 }
 0xa22   :  { %v4780_v1 = vpop.eup %4779 }
 0xa23   :  { %4444 = vmatmul.mubr.msk.f32.vlgmr.msra.gmra.mxu0 %vm50_vm0, %v5825_v2  ;;  %v1609_v30 = vmul.f32 %v4780_v1, %v1569_v3 }
 0xa24   :  { %4446 = vmatprep.mubr.msk.f32.mxu0 %vm4978_vm2, %v4973_v24 }
 0xa25   :  { %v1618_v10 = vmul.f32 %v1616_v53, %v1609_v30 }
 0xa26   :  { %v4782_v32 = vpop.eup %4781 }
 0xa27   :  { %v5831_v22 = vadd.f32 %v1625_v19, %v1618_v10  ;;  %v1610_v60 = vmul.f32 %v4782_v32, %v1570_v14 }
 0xa29   :  { %4447 = vmatmul.mubr.msk.f32.gmra.mxu0 %vm50_vm0, %v5831_v22  ;;  %v1619_v50 = vmul.f32 %v1616_v53, %v1610_v60 }
 0xa2a   :  { %v4784_v36 = vpop.eup %4783  ;;  %4449 = vmatprep.mubr.msk.f32.mxu0 %vm4978_vm2, %v4973_v24 }
 0xa2b   :  { %v5837_v29 = vadd.f32 %v1625_v19, %v1619_v50  ;;  %v1611_v35 = vmul.f32 %v4784_v36, %v1571_v7  ;;  %v1793_v7 = vld [vmem:[%s6716_s7 + $0x20] sm:$0xff] }
 0xa2c   :  { %4465 = vmatpush3.msra.mxu1 %v1793_v7 }
 0xa2d   :  { %4450 = vmatmul.mubr.msk.f32.gmra.mxu0 %vm50_vm0, %v5837_v29  ;;  %v1620_v3 = vmul.f32 %v1616_v53, %v1611_v35  ;;  %4466 = vmatprep.subr.mxu1 %v4973_v24 }
 0xa2e   :  { %v4786_v63 = vpop.eup %4785  ;;  %4452 = vmatprep.mubr.msk.f32.mxu0 %vm4978_vm2, %v4973_v24  ;;  %4467 = vmatpush3.msra.mxu1 %v1792_v54 }
 0xa2f   :  { %v5843_v57 = vadd.f32 %v1625_v19, %v1620_v3  ;;  %v1612_v37 = vmul.f32 %v4786_v63, %v1572_v55  ;;  %4468 = vmatprep.subr.mxu1 %v4973_v24  ;;  %v5887_v55 = vsub.s32 1, %v5142_v46 }
 0xa30   :  { %4469 = vmatpush3.msra.mxu1 %v1791_v49 }
 0xa31   :  { %4453 = vmatmul.mubr.msk.f32.gmra.mxu0 %vm50_vm0, %v5843_v57  ;;  %v1621_v14 = vmul.f32 %v1616_v53, %v1612_v37  ;;  %4470 = vmatprep.subr.mxu1 %v4973_v24  ;;  %v1638_v44 = vrot.slane %v5786_v25, %v5887_v55 }
 0xa32   :  { %4455 = vmatprep.mubr.msk.f32.mxu0 %vm4978_vm2, %v4973_v24  ;;  %4471 = vmatpush3.msra.mxu1 %v1790_v43 }
 0xa33   :  { %v5849_v9 = vadd.f32 %v1625_v19, %v1621_v14  ;;  %4472 = vmatprep.subr.mxu1 %v4973_v24 }
 0xa34   :  { %4473 = vmatpush3.msra.mxu1 %v1789_v39 }
 0xa35   :  { %4456 = vmatmul.mubr.msk.f32.gmra.mxu0 %vm50_vm0, %v5849_v9 }
 0xa36   :  { %4497 = vmatprep.mubr.msk.f32.mxu0 %vm4978_vm2, %v4973_v24 }
 0xae3   :  { %v1720_v61 = vpop.f32.mrf.mxu0 }
 0xae4   :  { %v1721_v59 = vadd.f32 %v1720_v61, %v1638_v44 }
 0xae5   :  { %v4445_v0 = vpop.f32.mrf.mxu0 }
 0xae6   :  { %v1744_v15 = vmul.f32 %v1721_v59, %v1721_v59 }
 0xae8   :  { %v1749_v21 = vmul.f32 %v1744_v15, %v1721_v59 }
 0xae9   :  { %v1725_v38 = vpop.f32.mrf.mxu0 }
 0xaea   :  { %v1754_v28 = vmul.f32 0.044715, %v1749_v21  ;;  %v1726_v58 = vadd.f32 %v1725_v38, %v1638_v44 }
 0xaeb   :  { %v4448_v4 = vpop.f32.mrf.mxu0 }
 0xaec   :  { %v1759_v40 = vadd.f32 %v1754_v28, %v1721_v59  ;;  %v1745_v6 = vmul.f32 %v1726_v58, %v1726_v58 }
 0xaed   :  { %v1730_v51 = vpop.f32.mrf.mxu0 }
 0xaee   :  { %v1764_v56 = vmul.f32 0.7978846, %v1759_v40  ;;  %v1750_v12 = vmul.f32 %v1745_v6, %v1726_v58  ;;  %v1731_v33 = vadd.f32 %v1730_v51, %v1638_v44 }
 0xaef   :  { %v4451_v53 = vpop.f32.mrf.mxu0 }
 0xaf0   :  { %4787 = vtanh.f32 %v1764_v56  ;;  %v1755_v42 = vmul.f32 0.044715, %v1750_v12  ;;  %v1746_v23 = vmul.f32 %v1731_v33, %v1731_v33 }
 0xaf1   :  { %v1735_v11 = vpop.f32.mrf.mxu0 }
 0xaf2   :  { %v1760_v16 = vadd.f32 %v1755_v42, %v1726_v58  ;;  %v1751_v18 = vmul.f32 %v1746_v23, %v1731_v33  ;;  %v1736_v19 = vadd.f32 %v1735_v11, %v1638_v44 }
 0xaf3   :  { %v4454_v27 = vpop.f32.mrf.mxu0 }
 0xaf4   :  { %v1765_v62 = vmul.f32 0.7978846, %v1760_v16  ;;  %v1756_v1 = vmul.f32 0.044715, %v1751_v18  ;;  %v1747_v30 = vmul.f32 %v1736_v19, %v1736_v19 }
 0xaf5   :  { %v1740_v10 = vpop.f32.mrf.mxu0 }
 0xaf6   :  { %4789 = vtanh.f32 %v1765_v62  ;;  %v1761_v32 = vadd.f32 %v1756_v1, %v1731_v33  ;;  %v1752_v60 = vmul.f32 %v1747_v30, %v1736_v19  ;;  %v1741_v50 = vadd.f32 %v1740_v10, %v1638_v44 }
 0xaf7   :  { %v4457_v36 = vpop.f32.mrf.mxu0 }
 0xaf8   :  { %v1766_v35 = vmul.f32 0.7978846, %v1761_v32  ;;  %v1757_v3 = vmul.f32 0.044715, %v1752_v60  ;;  %v1748_v63 = vmul.f32 %v1741_v50, %v1741_v50 }
 0xafa   :  { %4791 = vtanh.f32 %v1766_v35  ;;  %v1762_v37 = vadd.f32 %v1757_v3, %v1736_v19  ;;  %v1753_v14 = vmul.f32 %v1748_v63, %v1741_v50 }
 0xafc   :  { %v1767_v5 = vmul.f32 0.7978846, %v1762_v37  ;;  %v1758_v47 = vmul.f32 0.044715, %v1753_v14 }
 0xafd   :  { %v4788_v52 = vpop.eup %4787 }
 0xafe   :  { %v1774_v7 = vadd.f32 1.0, %v4788_v52  ;;  %4793 = vtanh.f32 %v1767_v5  ;;  %v1763_v54 = vadd.f32 %v1758_v47, %v1741_v50 }
 0xb00   :  { %v1779_v49 = vmul.f32 0.5, %v1774_v7  ;;  %v1768_v43 = vmul.f32 0.7978846, %v1763_v54 }
 0xb02   :  { %v1784_v39 = vmul.f32 %v1779_v49, %v1721_v59  ;;  %4795 = vtanh.f32 %v1768_v43 }
 0xb03   :  { %v4790_v61 = vpop.eup %4789 }
 0xb04   :  { %4475 = vmatmul.mubr.msk.f32.vlgmr.msra.gmra.mxu1 %vm1801_vm6, %v1784_v39  ;;  %v1775_v44 = vadd.f32 1.0, %v4790_v61 }
 0xb05   :  { %4477 = vmatprep.mubr.msk.f32.mxu1 %vm4978_vm2, %v4973_v24 }
 0xb06   :  { %v1780_v0 = vmul.f32 0.5, %v1775_v44 }
 0xb07   :  { %v4792_v15 = vpop.eup %4791 }
 0xb08   :  { %v1785_v21 = vmul.f32 %v1780_v0, %v1726_v58  ;;  %v1776_v38 = vadd.f32 1.0, %v4792_v15 }
 0xb0a   :  { %4478 = vmatmul.mubr.msk.f32.gmra.mxu1 %vm1801_vm6, %v1785_v21  ;;  %v1781_v28 = vmul.f32 0.5, %v1776_v38 }
 0xb0b   :  { %v4794_v4 = vpop.eup %4793  ;;  %4480 = vmatprep.mubr.msk.f32.mxu1 %vm4978_vm2, %v4973_v24 }
 0xb0c   :  { %v1786_v59 = vmul.f32 %v1781_v28, %v1731_v33  ;;  %v1777_v40 = vadd.f32 1.0, %v4794_v4  ;;  %v5905_v33 = vsub.s32 3, %v5142_v46 }
 0xb0e   :  { %4481 = vmatmul.mubr.msk.f32.gmra.mxu1 %vm1801_vm6, %v1786_v59  ;;  %v1782_v6 = vmul.f32 0.5, %v1777_v40  ;;  %v1800_v42 = vrot.slane %v5786_v25, %v5905_v33 }
 0xb0f   :  { %v4796_v51 = vpop.eup %4795  ;;  %4483 = vmatprep.mubr.msk.f32.mxu1 %vm4978_vm2, %v4973_v24 }
 0xb10   :  { %v1787_v56 = vmul.f32 %v1782_v6, %v1736_v19  ;;  %v1778_v12 = vadd.f32 1.0, %v4796_v51 }
 0xb12   :  { %4484 = vmatmul.mubr.msk.f32.gmra.mxu1 %vm1801_vm6, %v1787_v56  ;;  %v1783_v58 = vmul.f32 0.5, %v1778_v12 }
 0xb13   :  { %4486 = vmatprep.mubr.msk.f32.mxu1 %vm4978_vm2, %v4973_v24 }
 0xb14   :  { %v1788_v53 = vmul.f32 %v1783_v58, %v1741_v50 }
 0xb16   :  { %4487 = vmatmul.mubr.msk.f32.gmra.mxu1 %vm1801_vm6, %v1788_v53 }
 0xbc4   :  { %v1883_v23 = vpop.f32.mrf.mxu1 }
 0xbc5   :  { %v1884_v11 = vadd.f32 %v1883_v23, %v1800_v42  ;;  %v3929_v23 = vld [vmem:[%s6713_s4 + $0x38] sm:$0xff] }
 0xbc6   :  { %v4476_v16 = vpop.f32.mrf.mxu1  ;;  %4490 = vmatpush3.msra.mxu0 %v3929_v23 }
 0xbc7   :  { %v1907_v18 = vadd.f32 %v1884_v11, %v5825_v2  ;;  %4491 = vmatprep.subr.mxu0 %v4973_v24  ;;  %v3928_v11 = vld [vmem:[%s6713_s4 + $0x30] sm:$0xff]  ;;  %v3927_v16 = vld [vmem:[%s6713_s4 + $0x28] sm:$0xff] }
 0xbc8   :  { %4492 = vmatpush3.msra.mxu0 %v3928_v11 }
 0xbc9   :  { %v1912_v19 = vsel %vm50_vm0, %v1907_v18, 0.0  ;;  %4493 = vmatprep.subr.mxu0 %v4973_v24 }
 0xbca   :  { %1913 = vadd.xlane.f32.xlu0 %v1912_v19  ;;  %v1888_v27 = vpop.f32.mrf.mxu1  ;;  %4494 = vmatpush3.msra.mxu0 %v3927_v16 }
 0xbcb   :  { %v1889_v62 = vadd.f32 %v1888_v27, %v1800_v42  ;;  %4495 = vmatprep.subr.mxu0 %v4973_v24 }
 0xbcc   :  { %v4479_v1 = vpop.f32.mrf.mxu1 }
 0xbcd   :  { %v1908_v30 = vadd.f32 %v1889_v62, %v5831_v22 }
 0xbce   :  { %v1893_v10 = vpop.f32.mrf.mxu1 }
 0xbcf   :  { %v1894_v32 = vadd.f32 %v1893_v10, %v1800_v42  ;;  %v1915_v46 = vsel %vm50_vm0, %v1908_v30, 0.0 }
 0xbd0   :  { %1916 = vadd.xlane.f32.xlu1 %v1915_v46  ;;  %v4482_v60 = vpop.f32.mrf.mxu1 }
 0xbd1   :  { %v1909_v50 = vadd.f32 %v1894_v32, %v5837_v29 }
 0xbd2   :  { %v1898_v36 = vpop.f32.mrf.mxu1 }
 0xbd3   :  { %v1899_v35 = vadd.f32 %v1898_v36, %v1800_v42  ;;  %v1918_v2 = vsel %vm50_vm0, %v1909_v50, 0.0 }
 0xbd4   :  { %1919 = vadd.xlane.f32.xlu0 %v1918_v2  ;;  %v4485_v3 = vpop.f32.mrf.mxu1 }
 0xbd5   :  { %v1910_v63 = vadd.f32 %v1899_v35, %v5843_v57  ;;  %v1980_v35 = vrot.slane %v5786_v25, %v5382_v17 }
 0xbd6   :  { %v1903_v37 = vpop.f32.mrf.mxu1 }
 0xbd7   :  { %v1904_v14 = vadd.f32 %v1903_v37, %v1800_v42  ;;  %v1921_v22 = vsel %vm50_vm0, %v1910_v63, 0.0 }
 0xbd8   :  { %1922 = vadd.xlane.f32.xlu1 %v1921_v22  ;;  %v4488_v5 = vpop.f32.mrf.mxu1  ;;  %v1989_v22 = vrot.slane %v5786_v25, %v5405_v26 }
 0xbd9   :  { %v1911_v47 = vadd.f32 %v1904_v14, %v5849_v9 }
 0xbdb   :  { %v1924_v52 = vsel %vm50_vm0, %v1911_v47, 0.0 }
 0xbdc   :  { %1925 = vadd.xlane.f32.xlu0 %v1924_v52 }
 0xc53   :  { %v1914_v29 = vpop.xlane.xlu0 %1913 }
 0xc54   :  { %v1927_v7 = vmul.f32 0.03125, %v1914_v29 }
 0xc56   :  { %v1932_v54 = vsub.f32 %v1907_v18, %v1927_v7  ;;  %v3926_v18 = vld [vmem:[%s6713_s4 + $0x20] sm:$0xff] }
 0xc57   :  { %4496 = vmatpush3.msra.mxu0 %v3926_v18 }
 0xc58   :  { %v1937_v49 = vmul.f32 %v1932_v54, %v1932_v54 }
 0xc59   :  { %v1917_v43 = vpop.xlane.xlu1 %1916 }
 0xc5a   :  { %v1928_v39 = vmul.f32 0.03125, %v1917_v43  ;;  %v1942_v61 = vsel %vm50_vm0, %v1937_v49, 0.0 }
 0xc5b   :  { %1943 = vadd.xlane.f32.xlu1 %v1942_v61 }
 0xc5c   :  { %v1933_v57 = vsub.f32 %v1908_v30, %v1928_v39 }
 0xc5d   :  { %v1920_v44 = vpop.xlane.xlu0 %1919 }
 0xc5e   :  { %v1929_v0 = vmul.f32 0.03125, %v1920_v44  ;;  %v1938_v15 = vmul.f32 %v1933_v57, %v1933_v57 }
 0xc60   :  { %v1934_v21 = vsub.f32 %v1909_v50, %v1929_v0  ;;  %v1945_v38 = vsel %vm50_vm0, %v1938_v15, 0.0 }
 0xc61   :  { %1946 = vadd.xlane.f32.xlu0 %v1945_v38  ;;  %v1923_v9 = vpop.xlane.xlu1 %1922 }
 0xc62   :  { %v1930_v28 = vmul.f32 0.03125, %v1923_v9  ;;  %v1939_v4 = vmul.f32 %v1934_v21, %v1934_v21 }
 0xc64   :  { %v1935_v59 = vsub.f32 %v1910_v63, %v1930_v28  ;;  %v1948_v40 = vsel %vm50_vm0, %v1939_v4, 0.0  ;;  %v3925_v4 = vld [vmem:[%s6717_s8 + $0x8] sm:$0xff] }
 0xc65   :  { %1949 = vadd.xlane.f32.xlu1 %v1948_v40  ;;  %v1926_v6 = vpop.xlane.xlu0 %1925 }
 0xc66   :  { %v1931_v51 = vmul.f32 0.03125, %v1926_v6  ;;  %v1940_v56 = vmul.f32 %v1935_v59, %v1935_v59 }
 0xc68   :  { %v1936_v12 = vsub.f32 %v1911_v47, %v1931_v51  ;;  %v1951_v58 = vsel %vm50_vm0, %v1940_v56, 0.0 }
 0xc69   :  { %1952 = vadd.xlane.f32.xlu0 %v1951_v58 }
 0xc6a   :  { %v1941_v53 = vmul.f32 %v1936_v12, %v1936_v12 }
 0xc6c   :  { %v1954_v42 = vsel %vm50_vm0, %v1941_v53, 0.0 }
 0xc6d   :  { %1955 = vadd.xlane.f32.xlu1 %v1954_v42 }
 0xce4   :  { %v1944_v19 = vpop.xlane.xlu1 %1943 }
 0xce5   :  { %v1957_v27 = vmul.f32 0.03125, %v1944_v19 }
 0xce7   :  { %v1962_v62 = vadd.f32 1e-05, %v1957_v27 }
 0xce9   :  { %4797 = vrsqrt.f32 %v1962_v62 }
 0xcea   :  { %v1947_v1 = vpop.xlane.xlu0 %1946 }
 0xceb   :  { %v1958_v30 = vmul.f32 0.03125, %v1947_v1 }
 0xced   :  { %v1963_v10 = vadd.f32 1e-05, %v1958_v30 }
 0xcee   :  { %v1950_v32 = vpop.xlane.xlu1 %1949 }
 0xcef   :  { %4799 = vrsqrt.f32 %v1963_v10  ;;  %v1959_v46 = vmul.f32 0.03125, %v1950_v32 }
 0xcf1   :  { %v1964_v60 = vadd.f32 1e-05, %v1959_v46 }
 0xcf2   :  { %v1953_v50 = vpop.xlane.xlu0 %1952 }
 0xcf3   :  { %4801 = vrsqrt.f32 %v1964_v60  ;;  %v1960_v36 = vmul.f32 0.03125, %v1953_v50 }
 0xcf5   :  { %v1965_v2 = vadd.f32 1e-05, %v1960_v36 }
 0xcf6   :  { %v4798_v3 = vpop.eup %4797  ;;  %v1956_v63 = vpop.xlane.xlu1 %1955 }
 0xcf7   :  { %v1972_v37 = vmul.f32 %v4798_v3, %v1932_v54  ;;  %4803 = vrsqrt.f32 %v1965_v2  ;;  %v1961_v14 = vmul.f32 0.03125, %v1956_v63 }
 0xcf9   :  { %v1981_v5 = vmul.f32 %v1980_v35, %v1972_v37  ;;  %v1966_v47 = vadd.f32 1e-05, %v1961_v14 }
 0xcfb   :  { %4805 = vrsqrt.f32 %v1966_v47  ;;  %v5943_v52 = vadd.f32 %v1989_v22, %v1981_v5 }
 0xcfc   :  { %v4800_v29 = vpop.eup %4799 }
 0xcfd   :  { %4498 = vmatmul.mubr.msk.f32.vlgmr.msra.gmra.mxu0 %vm50_vm0, %v5943_v52  ;;  %v1973_v7 = vmul.f32 %v4800_v29, %v1933_v57 }
 0xcfe   :  { %4500 = vmatprep.mubr.msk.f32.mxu0 %vm4978_vm2, %v4973_v24 }
 0xcff   :  { %v1982_v49 = vmul.f32 %v1980_v35, %v1973_v7 }
 0xd00   :  { %v4802_v54 = vpop.eup %4801 }
 0xd01   :  { %v5949_v43 = vadd.f32 %v1989_v22, %v1982_v49  ;;  %v1974_v39 = vmul.f32 %v4802_v54, %v1934_v21 }
 0xd03   :  { %4501 = vmatmul.mubr.msk.f32.gmra.mxu0 %vm50_vm0, %v5949_v43  ;;  %v1983_v25 = vmul.f32 %v1980_v35, %v1974_v39 }
 0xd04   :  { %v4804_v61 = vpop.eup %4803  ;;  %4503 = vmatprep.mubr.msk.f32.mxu0 %vm4978_vm2, %v4973_v24 }
 0xd05   :  { %v5955_v44 = vadd.f32 %v1989_v22, %v1983_v25  ;;  %v1975_v0 = vmul.f32 %v4804_v61, %v1935_v59  ;;  %v2005_v59 = vrot.slane %v3925_v4, %v5295_v34 }
 0xd07   :  { %4504 = vmatmul.mubr.msk.f32.gmra.mxu0 %vm50_vm0, %v5955_v44  ;;  %v1984_v57 = vmul.f32 %v1980_v35, %v1975_v0 }
 0xd08   :  { %v4806_v15 = vpop.eup %4805  ;;  %4506 = vmatprep.mubr.msk.f32.mxu0 %vm4978_vm2, %v4973_v24 }
 0xd09   :  { %v5961_v21 = vadd.f32 %v1989_v22, %v1984_v57  ;;  %v1976_v38 = vmul.f32 %v4806_v15, %v1936_v12 }
 0xd0b   :  { %4507 = vmatmul.mubr.msk.f32.gmra.mxu0 %vm50_vm0, %v5961_v21  ;;  %v1985_v9 = vmul.f32 %v1980_v35, %v1976_v38 }
 0xd0c   :  { %4509 = vmatprep.mubr.msk.f32.mxu0 %vm4978_vm2, %v4973_v24 }
 0xd0d   :  { %v5967_v28 = vadd.f32 %v1989_v22, %v1985_v9 }
 0xd0f   :  { %4510 = vmatmul.mubr.msk.f32.gmra.mxu0 %vm50_vm0, %v5967_v28 }
 0xdbd   :  { %v2087_v40 = vpop.f32.mrf.mxu0 }
 0xdbe   :  { %v5975_v6 = vadd.f32 %v2087_v40, %v2005_v59 }
 0xdbf   :  { %v4499_v51 = vpop.f32.mrf.mxu0 }
 0xdc0   :  { %v2111_v56 = vmul.f32 %v5975_v6, %v5316_v48  ;;  %v2116_v63 = vmul.f32 %v5975_v6, %v5371_v13  ;;  %v2121_v47 = vmul.f32 %v5975_v6, %v5392_v20  ;;  %v2126_v39 = vmul.f32 %v5975_v6, %v5415_v31 }
 0xdc2   :  { %4522 = vmatprep.mubr.msk.f32.mxu1 %vm50_vm0, %v2111_v56 }
 0xdc3   :  { %v2092_v12 = vpop.f32.mrf.mxu0 }
 0xdc4   :  { %v5992_v62 = vadd.f32 %v2092_v12, %v2005_v59 }
 0xdc5   :  { %v4502_v58 = vpop.f32.mrf.mxu0 }
 0xdc6   :  { %v2112_v36 = vmul.f32 %v5992_v62, %v5316_v48  ;;  %v2117_v37 = vmul.f32 %v5992_v62, %v5371_v13  ;;  %v2122_v29 = vmul.f32 %v5992_v62, %v5392_v20  ;;  %v2127_v25 = vmul.f32 %v5992_v62, %v5415_v31  ;;  %v4929_v58 = vld [vmem:[%s6719_s10] sm:$0xff] }
 0xdc7   :  { %v2097_v53 = vpop.f32.mrf.mxu0 }
 0xdc8   :  { %v5984_v18 = vadd.f32 %v2097_v53, %v2005_v59 }
 0xdc9   :  { %v4505_v42 = vpop.f32.mrf.mxu0 }
 0xdca   :  { %v2113_v35 = vmul.f32 %v5984_v18, %v5316_v48  ;;  %v2118_v14 = vmul.f32 %v5984_v18, %v5371_v13  ;;  %v2123_v7 = vmul.f32 %v5984_v18, %v5392_v20  ;;  %v2128_v61 = vmul.f32 %v5984_v18, %v5415_v31 }
 0xdcb   :  { %v2102_v23 = vpop.f32.mrf.mxu0 }
 0xdcc   :  { %v5980_v11 = vadd.f32 %v2102_v23, %v2005_v59 }
 0xdcd   :  { %v4508_v16 = vpop.f32.mrf.mxu0 }
 0xdce   :  { %2142 = vrot.lane.b32.xlu1 %v5980_v11, %s4980_s24  ;;  %v2114_v2 = vmul.f32 %v5980_v11, %v5316_v48  ;;  %v2119_v22 = vmul.f32 %v5980_v11, %v5371_v13  ;;  %v2124_v49 = vmul.f32 %v5980_v11, %v5392_v20  ;;  %v2129_v0 = vmul.f32 %v5980_v11, %v5415_v31  ;;  %v4930_v16 = vld [vmem:[%s6719_s10 + $0x18] sm:$0xff] }
 0xdcf   :  { %v2107_v34 = vpop.f32.mrf.mxu0 }
 0xdd0   :  { %v5986_v19 = vadd.f32 %v2107_v34, %v2005_v59  ;;  %v4928_v59 = vld [vmem:[%s6719_s10 + $0x8] sm:$0xff] }
 0xdd1   :  { %v4511_v27 = vpop.f32.mrf.mxu0 }
 0xdd2   :  { %2140 = vrot.lane.b32.xlu1 %v5984_v18, %s4980_s24  ;;  %2144 = vrot.lane.b32.xlu0 %v5986_v19, %s4980_s24  ;;  %v2115_v3 = vmul.f32 %v5986_v19, %v5316_v48  ;;  %v2120_v5 = vmul.f32 %v5986_v19, %v5371_v13  ;;  %v2125_v54 = vmul.f32 %v5986_v19, %v5392_v20 }
 0xdd3   :  { %v2130_v57 = vmul.f32 %v5986_v19, %v5415_v31 }
 0xdd6   :  { %2136 = vrot.lane.b32.xlu1 %v5975_v6, %s4980_s24  ;;  %2138 = vrot.lane.b32.xlu0 %v5992_v62, %s4980_s24 }
 0xdda   :  { %2649 = vrot.lane.b32.xlu1 %v5986_v19, %s4979_s23  ;;  %2647 = vrot.lane.b32.xlu0 %v5980_v11, %s4979_s23 }
 0xe40   :  { %v2143_v1 = vpop.permute.xlu1 %2142 }
 0xe44   :  { %v2145_v30 = vpop.permute.xlu0 %2144  ;;  %v2141_v10 = vpop.permute.xlu1 %2140 }
 0xe45   :  { %4512 = vmatprep.subr.msk.mxu1 %vm50_vm0, %v2145_v30 }
 0xe46   :  { %4513 = vmatpush3.xpose.msk.msra.mxu1 %vm50_vm0, %v2145_v30 }
 0xe47   :  { %4514 = vmatprep.subr.msk.mxu1 %vm50_vm0, %v2143_v1 }
 0xe48   :  { %v2139_v32 = vpop.permute.xlu0 %2138  ;;  %v2137_v46 = vpop.permute.xlu1 %2136 }
 0xe4a   :  { %4515 = vmatpush3.xpose.msk.msra.mxu1 %vm50_vm0, %v2143_v1 }
 0xe4b   :  { %4516 = vmatprep.subr.msk.mxu1 %vm50_vm0, %v2141_v10 }
 0xe4c   :  { %v2650_v60 = vpop.permute.xlu1 %2649  ;;  %v2648_v50 = vpop.permute.xlu0 %2647 }
 0xe4d   :  { %4552 = vmatprep.subr.mxu0 %v2650_v60 }
 0xe4e   :  { %4517 = vmatpush3.xpose.msk.msra.mxu1 %vm50_vm0, %v2141_v10  ;;  %4553 = vmatpush3.msra.mxu0 %v2650_v60 }
 0xe4f   :  { %4518 = vmatprep.subr.msk.mxu1 %vm50_vm0, %v2139_v32  ;;  %4554 = vmatprep.subr.mxu0 %v2648_v50 }
 0xe50   :  { %4555 = vmatpush3.msra.mxu0 %v2648_v50  ;;  %v4932_v50 = vld [vmem:[%s6719_s10 + $0x20] sm:$0xff] }
 0xe52   :  { %4519 = vmatpush3.xpose.msk.msra.mxu1 %vm50_vm0, %v2139_v32  ;;  %v4931_v32 = vld [vmem:[%s6719_s10 + $0x10] sm:$0xff] }
 0xe53   :  { %4520 = vmatprep.subr.msk.mxu1 %vm50_vm0, %v2137_v46 }
 0xe56   :  { %4521 = vmatpush3.xpose.msk.msra.mxu1 %vm50_vm0, %v2137_v46 }
 0xe57   :  { %4592 = vmatprep.subr.mxu1 %v4973_v24 }
 0xe59   :  { %4523 = vmatmul.mubr.msk.f32.vlgmr.msra.gmra.mxu1 %vm50_vm0, %v2112_v36 }
 0xe5a   :  { %4525 = vmatprep.mubr.msk.f32.mxu1 %vm50_vm0, %v2113_v35 }
 0xe5d   :  { %4526 = vmatmul.mubr.msk.f32.gmra.mxu1 %vm50_vm0, %v2114_v2 }
 0xe5e   :  { %4528 = vmatprep.mubr.msk.f32.mxu1 %vm50_vm0, %v2115_v3 }
 0xe61   :  { %4529 = vmatmul.mubr.msk.f32.gmra.mxu1 %vm50_vm0, %v2116_v63 }
 0xe62   :  { %4531 = vmatprep.mubr.msk.f32.mxu1 %vm50_vm0, %v2117_v37 }
 0xe65   :  { %4532 = vmatmul.mubr.msk.f32.gmra.mxu1 %vm50_vm0, %v2118_v14  ;;  %v4933_v14 = vld [vmem:[%s6719_s10 + $0x28] sm:$0xff] }
 0xe66   :  { %4534 = vmatprep.mubr.msk.f32.mxu1 %vm50_vm0, %v2119_v22 }
 0xe69   :  { %4535 = vmatmul.mubr.msk.f32.gmra.mxu1 %vm50_vm0, %v2120_v5 }
 0xe6a   :  { %4537 = vmatprep.mubr.msk.f32.mxu1 %vm50_vm0, %v2121_v47  ;;  %v4934_v47 = vld [vmem:[%s6719_s10 + $0x30] sm:$0xff] }
 0xe6d   :  { %4538 = vmatmul.mubr.msk.f32.gmra.mxu1 %vm50_vm0, %v2122_v29 }
 0xe6e   :  { %4540 = vmatprep.mubr.msk.f32.mxu1 %vm50_vm0, %v2123_v7 }
 0xe71   :  { %4541 = vmatmul.mubr.msk.f32.gmra.mxu1 %vm50_vm0, %v2124_v49  ;;  %v4935_v49 = vld [vmem:[%s6719_s10 + $0x38] sm:$0xff] }
 0xe72   :  { %4543 = vmatprep.mubr.msk.f32.mxu1 %vm50_vm0, %v2125_v54 }
 0xe75   :  { %4544 = vmatmul.mubr.msk.f32.gmra.mxu1 %vm50_vm0, %v2126_v39 }
 0xe76   :  { %4546 = vmatprep.mubr.msk.f32.mxu1 %vm50_vm0, %v2127_v25 }
 0xe79   :  { %4547 = vmatmul.mubr.msk.f32.gmra.mxu1 %vm50_vm0, %v2128_v61 }
 0xe7a   :  { %4549 = vmatprep.mubr.msk.f32.mxu1 %vm50_vm0, %v2129_v0 }
 0xe7d   :  { %4550 = vmatmul.mubr.msk.f32.gmra.mxu1 %vm50_vm0, %v2130_v57 }
 0xe7e   :  { %4600 = vmatprep.mubr.msk.f32.mxu1 %vm4978_vm2, %v4973_v24 }
 0xf19   :  { %v4524_v15 = vpop.f32.mrf.mxu1 }
 0xf1a   :  { %v2382_v38 = vmul.f32 0.35355338, %v4524_v15  ;;  %v4936_v15 = vld [vmem:[%s6719_s10 + $0x40] sm:$0xff] }
 0xf1b   :  { %v2282_v9 = vpop.f32.mrf.mxu1 }
 0xf1c   :  { %v2381_v4 = vmul.f32 0.35355338, %v2282_v9  ;;  %v6075_v40 = vadd.f32 %v4928_v59, %v2382_v38 }
 0xf1d   :  { %v4527_v51 = vpop.f32.mrf.mxu1 }
 0xf1e   :  { %v2384_v56 = vmul.f32 0.35355338, %v4527_v51  ;;  %v2424_v12 = vsel %vm929_vm5, %v6075_v40, -inf  ;;  %v6082_v53 = vadd.f32 %v4929_v58, %v2381_v4 }
 0xf1f   :  { %2425 = vmax.xlane.f32.xlu1 %v2424_v12  ;;  %v2292_v42 = vpop.f32.mrf.mxu1  ;;  %v4937_v12 = vld [vmem:[%s6719_s10 + $0x48] sm:$0xff] }
 0xf20   :  { %v2383_v23 = vmul.f32 0.35355338, %v2292_v42  ;;  %v2421_v11 = vsel %vm929_vm5, %v6082_v53, -inf  ;;  %v6089_v34 = vadd.f32 %v4930_v16, %v2384_v56 }
 0xf21   :  { %2422 = vmax.xlane.f32.xlu0 %v2421_v11  ;;  %v4530_v19 = vpop.f32.mrf.mxu1 }
 0xf22   :  { %v2386_v1 = vmul.f32 0.35355338, %v4530_v19  ;;  %v2430_v10 = vsel %vm929_vm5, %v6089_v34, -inf  ;;  %v6096_v46 = vadd.f32 %v4931_v32, %v2383_v23  ;;  %v4938_v23 = vld [vmem:[%s6719_s10 + $0x50] sm:$0xff] }
 0xf23   :  { %v2302_v27 = vpop.f32.mrf.mxu1 }
 0xf24   :  { %v2385_v30 = vmul.f32 0.35355338, %v2302_v27  ;;  %v2427_v63 = vsel %vm929_vm5, %v6096_v46, -inf  ;;  %v6110_v22 = vadd.f32 %v4933_v14, %v2386_v1 }
 0xf25   :  { %2431 = vmax.xlane.f32.xlu0 %v2430_v10  ;;  %v4533_v60 = vpop.f32.mrf.mxu1  ;;  %v4939_v10 = vld [vmem:[%s6719_s10 + $0x58] sm:$0xff] }
 0xf26   :  { %v6101_v36 = vadd.f32 %v4932_v50, %v2385_v30  ;;  %v2388_v35 = vmul.f32 0.35355338, %v4533_v60  ;;  %v2436_v61 = vsel %vm929_vm5, %v6110_v22, -inf  ;;  %v4940_v50 = vld [vmem:[%s6719_s10 + $0x60] sm:$0xff] }
 0xf27   :  { %v2312_v2 = vpop.f32.mrf.mxu1 }
 0xf28   :  { %v2387_v3 = vmul.f32 0.35355338, %v2312_v2  ;;  %v2433_v37 = vsel %vm929_vm5, %v6101_v36, -inf  ;;  %v6120_v54 = vadd.f32 %v4935_v49, %v2388_v35  ;;  %v4942_v49 = vld [vmem:[%s6719_s10 + $0x70] sm:$0xff] }
 0xf29   :  { %2428 = vmax.xlane.f32.xlu0 %v2427_v63  ;;  %2434 = vmax.xlane.f32.xlu1 %v2433_v37  ;;  %v4536_v5 = vpop.f32.mrf.mxu1 }
 0xf2a   :  { %v6115_v29 = vadd.f32 %v4934_v47, %v2387_v3  ;;  %v2390_v39 = vmul.f32 0.35355338, %v4536_v5  ;;  %v2442_v4 = vsel %vm929_vm5, %v6120_v54, -inf  ;;  %v4941_v3 = vld [vmem:[%s6719_s10 + $0x68] sm:$0xff] }
 0xf2b   :  { %v2322_v7 = vpop.f32.mrf.mxu1 }
 0xf2c   :  { %v2389_v25 = vmul.f32 0.35355338, %v2322_v7  ;;  %v2439_v0 = vsel %vm929_vm5, %v6115_v29, -inf  ;;  %v6138_v58 = vadd.f32 %v4937_v12, %v2390_v39 }
 0xf2d   :  { %2437 = vmax.xlane.f32.xlu0 %v2436_v61  ;;  %2440 = vmax.xlane.f32.xlu1 %v2439_v0  ;;  %v4539_v57 = vpop.f32.mrf.mxu1 }
 0xf2e   :  { %v6129_v38 = vadd.f32 %v4936_v15, %v2389_v25  ;;  %v2392_v59 = vmul.f32 0.35355338, %v4539_v57  ;;  %v2448_v1 = vsel %vm929_vm5, %v6138_v58, -inf }
 0xf2f   :  { %v2332_v9 = vpop.f32.mrf.mxu1 }
 0xf30   :  { %v2391_v51 = vmul.f32 0.35355338, %v2332_v9  ;;  %v2445_v56 = vsel %vm929_vm5, %v6129_v38, -inf  ;;  %v6152_v32 = vadd.f32 %v4939_v10, %v2392_v59  ;;  %v4943_v9 = vld [vmem:[%s6719_s10 + $0x78] sm:$0xff] }
 0xf31   :  { %2443 = vmax.xlane.f32.xlu0 %v2442_v4  ;;  %2446 = vmax.xlane.f32.xlu1 %v2445_v56  ;;  %v4542_v42 = vpop.f32.mrf.mxu1 }
 0xf32   :  { %v6143_v11 = vadd.f32 %v4938_v23, %v2391_v51  ;;  %v2394_v16 = vmul.f32 0.35355338, %v4542_v42  ;;  %v2454_v5 = vsel %vm929_vm5, %v6152_v32, -inf  ;;  %v4944_v51 = vld [vmem:[%s6719_s10 + $0x80] sm:$0xff] }
 0xf33   :  { %v2342_v19 = vpop.f32.mrf.mxu1 }
 0xf34   :  { %v2393_v27 = vmul.f32 0.35355338, %v2342_v19  ;;  %v2451_v30 = vsel %vm929_vm5, %v6143_v11, -inf  ;;  %v6162_v63 = vadd.f32 %v4941_v3, %v2394_v16  ;;  %v4945_v16 = vld [vmem:[%s6719_s10 + $0x88] sm:$0xff] }
 0xf35   :  { %2449 = vmax.xlane.f32.xlu0 %v2448_v1  ;;  %2452 = vmax.xlane.f32.xlu1 %v2451_v30  ;;  %v4545_v60 = vpop.f32.mrf.mxu1 }
 0xf36   :  { %v6157_v35 = vadd.f32 %v4940_v50, %v2393_v27  ;;  %v2396_v37 = vmul.f32 0.35355338, %v4545_v60  ;;  %v2460_v61 = vsel %vm929_vm5, %v6162_v63, -inf  ;;  %v4946_v27 = vld [vmem:[%s6719_s10 + $0x98] sm:$0xff] }
 0xf37   :  { %v2352_v2 = vpop.f32.mrf.mxu1 }
 0xf38   :  { %v2395_v14 = vmul.f32 0.35355338, %v2352_v2  ;;  %v2457_v47 = vsel %vm929_vm5, %v6157_v35, -inf  ;;  %v6180_v4 = vadd.f32 %v4943_v9, %v2396_v37  ;;  %v4947_v2 = vld [vmem:[%s6719_s10 + $0x90] sm:$0xff] }
 0xf39   :  { %2455 = vmax.xlane.f32.xlu0 %v2454_v5  ;;  %2458 = vmax.xlane.f32.xlu1 %v2457_v47  ;;  %v4548_v7 = vpop.f32.mrf.mxu1 }
 0xf3a   :  { %v6171_v39 = vadd.f32 %v4942_v49, %v2395_v14  ;;  %v2398_v0 = vmul.f32 0.35355338, %v4548_v7  ;;  %v2466_v42 = vsel %vm929_vm5, %v6180_v4, -inf }
 0xf3b   :  { %v2362_v25 = vpop.f32.mrf.mxu1 }
 0xf3c   :  { %v2397_v57 = vmul.f32 0.35355338, %v2362_v25  ;;  %v2463_v15 = vsel %vm929_vm5, %v6171_v39, -inf  ;;  %v6194_v19 = vadd.f32 %v4945_v16, %v2398_v0 }
 0xf3d   :  { %2461 = vmax.xlane.f32.xlu0 %v2460_v61  ;;  %2464 = vmax.xlane.f32.xlu1 %v2463_v15  ;;  %v4551_v59 = vpop.f32.mrf.mxu1 }
 0xf3e   :  { %v6185_v56 = vadd.f32 %v4944_v51, %v2397_v57  ;;  %v2400_v12 = vmul.f32 0.35355338, %v4551_v59  ;;  %v2472_v30 = vsel %vm929_vm5, %v6194_v19, -inf }
 0xf3f   :  { %v2372_v60 = vpop.f32.mrf.mxu1 }
 0xf40   :  { %v2469_v23 = vsel %vm929_vm5, %v6185_v56, -inf  ;;  %v6199_v1 = vadd.f32 %v4946_v27, %v2400_v12  ;;  %v2399_v50 = vmul.f32 0.35355338, %v2372_v60 }
 0xf41   :  { %2467 = vmax.xlane.f32.xlu0 %v2466_v42  ;;  %2470 = vmax.xlane.f32.xlu1 %v2469_v23 }
 0xf42   :  { %v2478_v10 = vsel %vm929_vm5, %v6199_v1, -inf  ;;  %v6210_v3 = vadd.f32 %v4947_v2, %v2399_v50 }
 0xf44   :  { %v2475_v37 = vsel %vm929_vm5, %v6210_v3, -inf }
 0xf45   :  { %2473 = vmax.xlane.f32.xlu0 %v2472_v30 }
 0xf49   :  { %2479 = vmax.xlane.f32.xlu0 %v2478_v10 }
 0xf52   :  { %2645 = vrot.lane.b32.xlu1 %v5984_v18, %s4979_s23 }
 0xf76   :  { %2476 = vmax.xlane.f32.xlu1 %v2475_v37 }
 0xfa8   :  { %v2426_v14 = vpop.xlane.xlu1 %2425 }
 0xfa9   :  { %v2482_v5 = vsub.f32 %v6075_v40, %v2426_v14 }
 0xfaa   :  { %v2423_v47 = vpop.xlane.xlu0 %2422 }
 0xfab   :  { %v2503_v7 = vmul.f32 1.442695, %v2482_v5  ;;  %v2481_v49 = vsub.f32 %v6082_v53, %v2423_v47 }
 0xfad   :  { %4807 = vpow2.f32 %v2503_v7  ;;  %v2501_v18 = vmul.f32 1.442695, %v2481_v49 }
 0xfae   :  { %v2432_v25 = vpop.xlane.xlu0 %2431 }
 0xfaf   :  { %4809 = vpow2.f32 %v2501_v18  ;;  %v2484_v61 = vsub.f32 %v6089_v34, %v2432_v25 }
 0xfb1   :  { %v2507_v0 = vmul.f32 1.442695, %v2484_v61 }
 0xfb2   :  { %v2429_v57 = vpop.xlane.xlu0 %2428  ;;  %v2435_v15 = vpop.xlane.xlu1 %2434 }
 0xfb3   :  { %4811 = vpow2.f32 %v2507_v0  ;;  %v2483_v9 = vsub.f32 %v6096_v46, %v2429_v57  ;;  %v2485_v59 = vsub.f32 %v6101_v36, %v2435_v15 }
 0xfb5   :  { %v2505_v51 = vmul.f32 1.442695, %v2483_v9  ;;  %v2509_v40 = vmul.f32 1.442695, %v2485_v59 }
 0xfb6   :  { %v2438_v12 = vpop.xlane.xlu0 %2437  ;;  %v2441_v42 = vpop.xlane.xlu1 %2440 }
 0xfb7   :  { %4813 = vpow2.f32 %v2505_v51  ;;  %v2486_v53 = vsub.f32 %v6110_v22, %v2438_v12  ;;  %v2487_v23 = vsub.f32 %v6115_v29, %v2441_v42 }
 0xfb8   :  { %4815 = vpow2.f32 %v2509_v40 }
 0xfb9   :  { %v2511_v16 = vmul.f32 1.442695, %v2486_v53  ;;  %v2513_v34 = vmul.f32 1.442695, %v2487_v23 }
 0xfba   :  { %v6221_v27 = vpop.eup %4807  ;;  %v2444_v30 = vpop.xlane.xlu0 %2443 }
 0xfbb   :  { %v2447_v10 = vpop.xlane.xlu1 %2446  ;;  %4817 = vpow2.f32 %v2511_v16  ;;  %v2488_v46 = vsub.f32 %v6120_v54, %v2444_v30  ;;  %v2544_v60 = vsel %vm929_vm5, %v6221_v27, 0.0 }
 0xfbc   :  { %v2489_v36 = vsub.f32 %v6129_v38, %v2447_v10  ;;  %v6227_v50 = vpop.eup %4809  ;;  %2545 = vadd.xlane.f32.xlu0 %v2544_v60  ;;  %4819 = vpow2.f32 %v2513_v34 }
 0xfbd   :  { %v2515_v22 = vmul.f32 1.442695, %v2488_v46  ;;  %v2541_v2 = vsel %vm929_vm5, %v6227_v50, 0.0 }
 0xfbe   :  { %v2517_v29 = vmul.f32 1.442695, %v2489_v36  ;;  %v2450_v37 = vpop.xlane.xlu0 %2449  ;;  %2542 = vadd.xlane.f32.xlu1 %v2541_v2 }
 0xfbf   :  { %v2453_v14 = vpop.xlane.xlu1 %2452  ;;  %4821 = vpow2.f32 %v2515_v22  ;;  %v2490_v54 = vsub.f32 %v6138_v58, %v2450_v37 }
 0xfc0   :  { %v6232_v5 = vpop.eup %4811  ;;  %4823 = vpow2.f32 %v2517_v29  ;;  %v2491_v47 = vsub.f32 %v6143_v11, %v2453_v14 }
 0xfc1   :  { %v2519_v38 = vmul.f32 1.442695, %v2490_v54  ;;  %v2550_v7 = vsel %vm929_vm5, %v6232_v5, 0.0 }
 0xfc2   :  { %v2456_v49 = vpop.xlane.xlu0 %2455  ;;  %2551 = vadd.xlane.f32.xlu0 %v2550_v7  ;;  %v2521_v0 = vmul.f32 1.442695, %v2491_v47 }
 0xfc3   :  { %v2459_v18 = vpop.xlane.xlu1 %2458  ;;  %4825 = vpow2.f32 %v2519_v38  ;;  %v2492_v25 = vsub.f32 %v6152_v32, %v2456_v49 }
 0xfc4   :  { %v6238_v61 = vpop.eup %4813  ;;  %v2493_v2 = vsub.f32 %v6157_v35, %v2459_v18 }
 0xfc5   :  { %v2523_v57 = vmul.f32 1.442695, %v2492_v25  ;;  %v2547_v58 = vsel %vm929_vm5, %v6238_v61, 0.0  ;;  %v6242_v15 = vpop.eup %4815 }
 0xfc6   :  { %2548 = vadd.xlane.f32.xlu1 %v2547_v58  ;;  %v2553_v32 = vsel %vm929_vm5, %v6242_v15, 0.0  ;;  %v2462_v29 = vpop.xlane.xlu0 %2461  ;;  %v2525_v14 = vmul.f32 1.442695, %v2493_v2 }
 0xfc7   :  { %v2465_v11 = vpop.xlane.xlu1 %2464  ;;  %4827 = vpow2.f32 %v2523_v57  ;;  %v2494_v47 = vsub.f32 %v6162_v63, %v2462_v29 }
 0xfc8   :  { %v6244_v9 = vpop.eup %4817  ;;  %4829 = vpow2.f32 %v2521_v0  ;;  %v2495_v54 = vsub.f32 %v6171_v39, %v2465_v11 }
 0xfc9   :  { %v2556_v59 = vsel %vm929_vm5, %v6244_v9, 0.0  ;;  %v6250_v51 = vpop.eup %4819  ;;  %4831 = vpow2.f32 %v2525_v14  ;;  %v2527_v25 = vmul.f32 1.442695, %v2494_v47 }
 0xfca   :  { %2557 = vadd.xlane.f32.xlu0 %v2556_v59  ;;  %2554 = vadd.xlane.f32.xlu1 %v2553_v32  ;;  %v2559_v53 = vsel %vm929_vm5, %v6250_v51, 0.0  ;;  %v2468_v37 = vpop.xlane.xlu0 %2467  ;;  %v2529_v7 = vmul.f32 1.442695, %v2495_v54 }
 0xfcb   :  { %v2471_v40 = vpop.xlane.xlu1 %2470 }
 0xfcc   :  { %v6252_v12 = vpop.eup %4821  ;;  %v2497_v49 = vsub.f32 %v6185_v56, %v2471_v40  ;;  %4833 = vpow2.f32 %v2529_v7 }
 0xfcd   :  { %v2562_v42 = vsel %vm929_vm5, %v6252_v12, 0.0  ;;  %v6258_v23 = vpop.eup %4823  ;;  %4835 = vpow2.f32 %v2527_v25 }
 0xfce   :  { %2563 = vadd.xlane.f32.xlu0 %v2562_v42  ;;  %2560 = vadd.xlane.f32.xlu1 %v2559_v53  ;;  %v2565_v10 = vsel %vm929_vm5, %v6258_v23, 0.0  ;;  %v2474_v38 = vpop.xlane.xlu0 %2473  ;;  %v2533_v0 = vmul.f32 1.442695, %v2497_v49 }
 0xfcf   :  { %v2646_v16 = vpop.permute.xlu1 %2645  ;;  %v2498_v35 = vsub.f32 %v6194_v19, %v2474_v38 }
 0xfd0   :  { %4556 = vmatprep.subr.mxu0 %v2646_v16  ;;  %v6260_v34 = vpop.eup %4825  ;;  %4837 = vpow2.f32 %v2533_v0 }
 0xfd1   :  { %4557 = vmatpush3.msra.mxu0 %v2646_v16  ;;  %v2568_v30 = vsel %vm929_vm5, %v6260_v34, 0.0  ;;  %v2535_v39 = vmul.f32 1.442695, %v2498_v35 }
 0xfd2   :  { %2569 = vadd.xlane.f32.xlu0 %v2568_v30  ;;  %2566 = vadd.xlane.f32.xlu1 %v2565_v10  ;;  %v2480_v18 = vpop.xlane.xlu0 %2479 }
 0xfd3   :  { %v2500_v57 = vsub.f32 %v6199_v1, %v2480_v18 }
 0xfd4   :  { %v6266_v46 = vpop.eup %4827 }
 0xfd5   :  { %v2574_v36 = vsel %vm929_vm5, %v6266_v46, 0.0  ;;  %v6270_v60 = vpop.eup %4829  ;;  %v2539_v11 = vmul.f32 1.442695, %v2500_v57 }
 0xfd6   :  { %2575 = vadd.xlane.f32.xlu0 %v2574_v36  ;;  %v2571_v22 = vsel %vm929_vm5, %v6270_v60, 0.0  ;;  %v6286_v59 = vpop.eup %4831 }
 0xfd9   :  { %v6290_v19 = vpop.eup %4833 }
 0xfda   :  { %2572 = vadd.xlane.f32.xlu0 %v2571_v22  ;;  %v6292_v1 = vpop.eup %4835  ;;  %v2583_v32 = vsel %vm929_vm5, %v6290_v19, 0.0 }
 0xfdb   :  { %v2580_v42 = vsel %vm929_vm5, %v6292_v1, 0.0 }
 0xfe3   :  { %2643 = vrot.lane.b32.xlu1 %v5992_v62, %s4979_s23  ;;  %v2496_v62 = vsub.f32 %v6180_v4, %v2468_v37  ;;  %v2577_v4 = vsel %vm929_vm5, %v6286_v59, 0.0 }
 0xff0   :  { %2641 = vrot.lane.b32.xlu0 %v5975_v6, %s4979_s23  ;;  %v2531_v6 = vmul.f32 1.442695, %v2496_v62 }
 0xff2   :  { %4839 = vpow2.f32 %v2531_v6 }
 0xff3   :  { %4841 = vpow2.f32 %v2535_v39 }
 0xff4   :  { %4843 = vpow2.f32 %v2539_v11 }
 0xfff   :  { %v2477_v58 = vpop.xlane.xlu1 %2476 }
0x1000   :  { %v2499_v63 = vsub.f32 %v6210_v3, %v2477_v58  ;;  %v6296_v3 = vpop.eup %4837 }
0x1001   :  { %v6298_v40 = vpop.eup %4839  ;;  %v2589_v53 = vsel %vm929_vm5, %v6296_v3, 0.0 }
0x1002   :  { %v2537_v56 = vmul.f32 1.442695, %v2499_v63  ;;  %v6304_v16 = vpop.eup %4841  ;;  %v2586_v10 = vsel %vm929_vm5, %v6298_v40, 0.0 }
0x1003   :  { %v6306_v30 = vpop.eup %4843  ;;  %v2592_v36 = vsel %vm929_vm5, %v6304_v16, 0.0 }
0x1004   :  { %4845 = vpow2.f32 %v2537_v56  ;;  %v2598_v29 = vsel %vm929_vm5, %v6306_v30, 0.0 }
0x1007   :  { %2578 = vadd.xlane.f32.xlu1 %v2577_v4 }
0x100b   :  { %2584 = vadd.xlane.f32.xlu1 %v2583_v32 }
0x100f   :  { %2581 = vadd.xlane.f32.xlu0 %v2580_v42  ;;  %2590 = vadd.xlane.f32.xlu1 %v2589_v53 }
0x1011   :  { %v6312_v22 = vpop.eup %4845 }
0x1012   :  { %v2595_v2 = vsel %vm929_vm5, %v6312_v22, 0.0 }
0x1013   :  { %2587 = vadd.xlane.f32.xlu0 %v2586_v10  ;;  %2593 = vadd.xlane.f32.xlu1 %v2592_v36 }
0x1017   :  { %2599 = vadd.xlane.f32.xlu1 %v2598_v29  ;;  %2596 = vadd.xlane.f32.xlu0 %v2595_v2 }
0x1045   :  { %v2546_v14 = vpop.xlane.xlu0 %2545 }
0x1047   :  { %v2543_v37 = vpop.xlane.xlu1 %2542 }
0x1048   :  { %4847 = vrcp.f32 %v2543_v37 }
0x1049   :  { %4849 = vrcp.f32 %v2546_v14 }
0x104b   :  { %v2552_v54 = vpop.xlane.xlu0 %2551 }
0x104f   :  { %v2549_v38 = vpop.xlane.xlu1 %2548 }
0x1050   :  { %4851 = vrcp.f32 %v2549_v38 }
0x1051   :  { %4853 = vrcp.f32 %v2552_v54 }
0x1053   :  { %v2558_v47 = vpop.xlane.xlu0 %2557  ;;  %v2555_v7 = vpop.xlane.xlu1 %2554 }
0x1054   :  { %4855 = vrcp.f32 %v2555_v7 }
0x1055   :  { %v4848_v49 = vpop.eup %4847  ;;  %4857 = vrcp.f32 %v2558_v47 }
0x1056   :  { %v2621_v25 = vmul.f32 %v4848_v49, %v6227_v50  ;;  %v4850_v58 = vpop.eup %4849 }
0x1057   :  { %v2564_v62 = vpop.xlane.xlu0 %2563  ;;  %v2561_v0 = vpop.xlane.xlu1 %2560  ;;  %v2622_v11 = vmul.f32 %v4850_v58, %v6221_v27 }
0x1058   :  { %4562 = vmatprep.mubr.msk.f32.mxu0 %vm929_vm5, %v2621_v25  ;;  %4859 = vrcp.f32 %v2561_v0 }
0x1059   :  { %4861 = vrcp.f32 %v2564_v62 }
0x105b   :  { %v2570_v35 = vpop.xlane.xlu0 %2569  ;;  %v2567_v18 = vpop.xlane.xlu1 %2566 }
0x105c   :  { %4863 = vrcp.f32 %v2567_v18 }
0x105d   :  { %v4852_v50 = vpop.eup %4851  ;;  %4865 = vrcp.f32 %v2570_v35 }
0x105e   :  { %v4854_v56 = vpop.eup %4853  ;;  %v2623_v4 = vmul.f32 %v4852_v50, %v6238_v61 }
0x105f   :  { %v2576_v6 = vpop.xlane.xlu0 %2575  ;;  %v2644_v57 = vpop.permute.xlu1 %2643  ;;  %v2624_v42 = vmul.f32 %v4854_v56, %v6232_v5 }
0x1060   :  { %4558 = vmatprep.subr.mxu0 %v2644_v57 }
0x1061   :  { %4559 = vmatpush3.msra.mxu0 %v2644_v57  ;;  %v4856_v32 = vpop.eup %4855 }
0x1062   :  { %v4858_v53 = vpop.eup %4857  ;;  %v2625_v27 = vmul.f32 %v4856_v32, %v6242_v15 }
0x1063   :  { %v2573_v39 = vpop.xlane.xlu0 %2572  ;;  %v2626_v61 = vmul.f32 %v4858_v53, %v6244_v9 }
0x1064   :  { %4867 = vrcp.f32 %v2573_v39 }
0x1065   :  { %4869 = vrcp.f32 %v2576_v6  ;;  %v4860_v10 = vpop.eup %4859 }
0x1066   :  { %v4862_v36 = vpop.eup %4861  ;;  %v2627_v29 = vmul.f32 %v4860_v10, %v6250_v51 }
0x1067   :  { %v2642_v63 = vpop.permute.xlu0 %2641  ;;  %v2628_v5 = vmul.f32 %v4862_v36, %v6252_v12 }
0x1068   :  { %4560 = vmatprep.subr.mxu0 %v2642_v63 }
0x1069   :  { %4561 = vmatpush3.msra.mxu0 %v2642_v63  ;;  %v4864_v2 = vpop.eup %4863 }
0x106a   :  { %4563 = vmatmul.mubr.msk.f32.vlgmr.msra.gmra.mxu0 %vm929_vm5, %v2622_v11  ;;  %4615 = vmatprep.subr.mxu0 %v4973_v24  ;;  %v4866_v37 = vpop.eup %4865  ;;  %v2629_v15 = vmul.f32 %v4864_v2, %v6258_v23 }
0x106b   :  { %4565 = vmatprep.mubr.msk.f32.mxu0 %vm929_vm5, %v2623_v4  ;;  %v2630_v9 = vmul.f32 %v4866_v37, %v6260_v34 }
0x106e   :  { %4566 = vmatmul.mubr.msk.f32.gmra.mxu0 %vm929_vm5, %v2624_v42 }
0x106f   :  { %4568 = vmatprep.mubr.msk.f32.mxu0 %vm929_vm5, %v2625_v27 }
0x1071   :  { %v4868_v14 = vpop.eup %4867 }
0x1072   :  { %4569 = vmatmul.mubr.msk.f32.gmra.mxu0 %vm929_vm5, %v2626_v61  ;;  %v4870_v54 = vpop.eup %4869  ;;  %v2631_v51 = vmul.f32 %v4868_v14, %v6270_v60 }
0x1073   :  { %4571 = vmatprep.mubr.msk.f32.mxu0 %vm929_vm5, %v2627_v29  ;;  %v2632_v38 = vmul.f32 %v4870_v54, %v6266_v46 }
0x1076   :  { %4572 = vmatmul.mubr.msk.f32.gmra.mxu0 %vm929_vm5, %v2628_v5 }
0x1077   :  { %4574 = vmatprep.mubr.msk.f32.mxu0 %vm929_vm5, %v2629_v15 }
0x107a   :  { %4575 = vmatmul.mubr.msk.f32.gmra.mxu0 %vm929_vm5, %v2630_v9 }
0x107b   :  { %4577 = vmatprep.mubr.msk.f32.mxu0 %vm929_vm5, %v2631_v51 }
0x107e   :  { %4578 = vmatmul.mubr.msk.f32.gmra.mxu0 %vm929_vm5, %v2632_v38 }
0x1090   :  { %v2579_v12 = vpop.xlane.xlu1 %2578 }
0x1091   :  { %4871 = vrcp.f32 %v2579_v12 }
0x1094   :  { %v2585_v23 = vpop.xlane.xlu1 %2584 }
0x1095   :  { %4873 = vrcp.f32 %v2585_v23 }
0x1098   :  { %v2582_v47 = vpop.xlane.xlu0 %2581  ;;  %v2591_v7 = vpop.xlane.xlu1 %2590 }
0x1099   :  { %4875 = vrcp.f32 %v2582_v47 }
0x109a   :  { %4877 = vrcp.f32 %v2591_v7 }
0x109c   :  { %v2588_v34 = vpop.xlane.xlu0 %2587  ;;  %v2594_v49 = vpop.xlane.xlu1 %2593 }
0x109d   :  { %4879 = vrcp.f32 %v2588_v34 }
0x109e   :  { %v4872_v60 = vpop.eup %4871  ;;  %4881 = vrcp.f32 %v2594_v49 }
0x109f   :  { %v2633_v25 = vmul.f32 %v4872_v60, %v6286_v59 }
0x10a0   :  { %v2597_v62 = vpop.xlane.xlu0 %2596  ;;  %v2600_v0 = vpop.xlane.xlu1 %2599 }
0x10a1   :  { %4883 = vrcp.f32 %v2597_v62  ;;  %4580 = vmatprep.mubr.msk.f32.mxu0 %vm929_vm5, %v2633_v25 }
0x10a2   :  { %4885 = vrcp.f32 %v2600_v0  ;;  %v4874_v46 = vpop.eup %4873 }
0x10a3   :  { %v2635_v6 = vmul.f32 %v4874_v46, %v6290_v19 }
0x10a6   :  { %v4876_v35 = vpop.eup %4875 }
0x10a7   :  { %v2634_v18 = vmul.f32 %v4876_v35, %v6292_v1  ;;  %v4878_v57 = vpop.eup %4877 }
0x10a8   :  { %v2637_v50 = vmul.f32 %v4878_v57, %v6296_v3  ;;  %v3983_v3 = vld [vmem:[%s6714_s5 + $0x38] sm:$0xff] }
0x10a9   :  { %4581 = vmatmul.mubr.msk.f32.gmra.mxu0 %vm929_vm5, %v2634_v18  ;;  %4593 = vmatpush3.msra.mxu1 %v3983_v3 }
0x10aa   :  { %v4880_v39 = vpop.eup %4879  ;;  %4583 = vmatprep.mubr.msk.f32.mxu0 %vm929_vm5, %v2635_v6  ;;  %4594 = vmatprep.subr.mxu1 %v4973_v24 }
0x10ab   :  { %v2636_v59 = vmul.f32 %v4880_v39, %v6298_v40  ;;  %v4882_v58 = vpop.eup %4881  ;;  %v3982_v40 = vld [vmem:[%s6714_s5 + $0x30] sm:$0xff] }
0x10ac   :  { %v2638_v1 = vmul.f32 %v4882_v58, %v6304_v16  ;;  %v3981_v16 = vld [vmem:[%s6714_s5 + $0x28] sm:$0xff]  ;;  %4595 = vmatpush3.msra.mxu1 %v3982_v40 }
0x10ad   :  { %4584 = vmatmul.mubr.msk.f32.gmra.mxu0 %vm929_vm5, %v2636_v59  ;;  %4596 = vmatprep.subr.mxu1 %v4973_v24 }
0x10ae   :  { %v4884_v63 = vpop.eup %4883  ;;  %4586 = vmatprep.mubr.msk.f32.mxu0 %vm929_vm5, %v2637_v50  ;;  %4597 = vmatpush3.msra.mxu1 %v3981_v16 }
0x10af   :  { %v2639_v19 = vmul.f32 %v4884_v63, %v6312_v22  ;;  %v4886_v11 = vpop.eup %4885  ;;  %4598 = vmatprep.subr.mxu1 %v4973_v24 }
0x10b0   :  { %v2640_v56 = vmul.f32 %v4886_v11, %v6306_v30  ;;  %v3980_v30 = vld [vmem:[%s6714_s5 + $0x20] sm:$0xff] }
0x10b1   :  { %4587 = vmatmul.mubr.msk.f32.gmra.mxu0 %vm929_vm5, %v2638_v1  ;;  %4599 = vmatpush3.msra.mxu1 %v3980_v30 }
0x10b2   :  { %4589 = vmatprep.mubr.msk.f32.mxu0 %vm929_vm5, %v2639_v19  ;;  %4638 = vmatprep.subr.mxu1 %v4973_v24 }
0x10b5   :  { %4590 = vmatmul.mubr.msk.f32.gmra.mxu0 %vm929_vm5, %v2640_v56 }
0x10b6   :  { %4623 = vmatprep.mubr.msk.f32.mxu0 %vm4978_vm2, %v4973_v24 }
0x112a   :  { %v4564_v22 = vpop.f32.mrf.mxu0 }
0x112b   :  { %v2882_v34 = vmul.f32 %v4564_v22, %v5316_v48 }
0x112c   :  { %v2782_v4 = vpop.f32.mrf.mxu0 }
0x112d   :  { %v2881_v14 = vmul.f32 %v2782_v4, %v5316_v48 }
0x112e   :  { %v4567_v32 = vpop.f32.mrf.mxu0 }
0x112f   :  { %v2884_v19 = vmul.f32 %v4567_v32, %v5316_v48 }
0x1130   :  { %v2792_v42 = vpop.f32.mrf.mxu0 }
0x1131   :  { %v2883_v35 = vmul.f32 %v2792_v42, %v5316_v48 }
0x1132   :  { %v4570_v53 = vpop.f32.mrf.mxu0 }
0x1133   :  { %v2891_v37 = vmul.f32 %v4570_v53, %v5371_v13 }
0x1134   :  { %v2802_v27 = vpop.f32.mrf.mxu0 }
0x1135   :  { %v2896_v51 = vadd.f32 %v2891_v37, %v2881_v14  ;;  %v2885_v22 = vmul.f32 %v2802_v27, %v5316_v48  ;;  %v6415_v48 = vld [vmem:[%s6717_s8 + $0x8] sm:$0xff] }
0x1136   :  { %v4573_v10 = vpop.f32.mrf.mxu0 }
0x1137   :  { %v2893_v62 = vmul.f32 %v4573_v10, %v5371_v13 }
0x1138   :  { %v2812_v61 = vpop.f32.mrf.mxu0 }
0x1139   :  { %v2892_v12 = vmul.f32 %v2812_v61, %v5371_v13  ;;  %v2898_v59 = vadd.f32 %v2893_v62, %v2883_v35 }
0x113a   :  { %v4576_v36 = vpop.f32.mrf.mxu0 }
0x113b   :  { %v2897_v0 = vadd.f32 %v2892_v12, %v2882_v34  ;;  %v2895_v3 = vmul.f32 %v4576_v36, %v5371_v13 }
0x113c   :  { %v2822_v29 = vpop.f32.mrf.mxu0 }
0x113d   :  { %v2894_v58 = vmul.f32 %v2822_v29, %v5371_v13  ;;  %v2900_v32 = vadd.f32 %v2895_v3, %v2885_v22 }
0x113e   :  { %v4579_v2 = vpop.f32.mrf.mxu0 }
0x113f   :  { %v2902_v49 = vmul.f32 %v4579_v2, %v5392_v20  ;;  %v2899_v40 = vadd.f32 %v2894_v58, %v2884_v19 }
0x1140   :  { %v2832_v5 = vpop.f32.mrf.mxu0 }
0x1141   :  { %v2901_v9 = vmul.f32 %v2832_v5, %v5392_v20  ;;  %v2907_v18 = vadd.f32 %v2902_v49, %v2897_v0 }
0x1143   :  { %v2906_v23 = vadd.f32 %v2901_v9, %v2896_v51 }
0x1169   :  { %v4582_v15 = vpop.f32.mrf.mxu0 }
0x116a   :  { %v2904_v11 = vmul.f32 %v4582_v15, %v5392_v20 }
0x116b   :  { %v2842_v54 = vpop.f32.mrf.mxu0 }
0x116c   :  { %v2903_v6 = vmul.f32 %v2842_v54, %v5392_v20  ;;  %v2909_v4 = vadd.f32 %v2904_v11, %v2899_v40 }
0x116d   :  { %v4585_v38 = vpop.f32.mrf.mxu0 }
0x116e   :  { %v2911_v47 = vmul.f32 %v4585_v38, %v5415_v31  ;;  %v2908_v56 = vadd.f32 %v2903_v6, %v2898_v59 }
0x116f   :  { %v2852_v7 = vpop.f32.mrf.mxu0 }
0x1170   :  { %v2916_v60 = vadd.f32 %v2911_v47, %v2906_v23  ;;  %v2905_v42 = vmul.f32 %v2852_v7, %v5392_v20  ;;  %v2929_v20 = vrot.slane %v6415_v48, %v5781_v41 }
0x1171   :  { %v4588_v25 = vpop.f32.mrf.mxu0 }
0x1172   :  { %4601 = vmatmul.mubr.msk.f32.vlgmr.msra.gmra.mxu1 %vm50_vm0, %v2916_v60  ;;  %v2913_v50 = vmul.f32 %v4588_v25, %v5415_v31  ;;  %v2910_v61 = vadd.f32 %v2905_v42, %v2900_v32 }
0x1173   :  { %v2862_v46 = vpop.f32.mrf.mxu0  ;;  %4603 = vmatprep.mubr.msk.f32.mxu1 %vm4978_vm2, %v4973_v24 }
0x1174   :  { %v2912_v57 = vmul.f32 %v2862_v46, %v5415_v31  ;;  %v2918_v16 = vadd.f32 %v2913_v50, %v2908_v56  ;;  %v3991_v46 = vld [vmem:[%s6715_s6 + $0x30] sm:$0xff] }
0x1175   :  { %v4591_v39 = vpop.f32.mrf.mxu0 }
0x1176   :  { %v2917_v63 = vadd.f32 %v2912_v57, %v2907_v18  ;;  %v2915_v53 = vmul.f32 %v4591_v39, %v5415_v31 }
0x1177   :  { %v2872_v1 = vpop.f32.mrf.mxu0 }
0x1178   :  { %4604 = vmatmul.mubr.msk.f32.gmra.mxu1 %vm50_vm0, %v2917_v63  ;;  %v2914_v30 = vmul.f32 %v2872_v1, %v5415_v31  ;;  %v2920_v13 = vadd.f32 %v2915_v53, %v2910_v61  ;;  %v3990_v61 = vld [vmem:[%s6715_s6 + $0x28] sm:$0xff] }
0x1179   :  { %4606 = vmatprep.mubr.msk.f32.mxu1 %vm4978_vm2, %v4973_v24 }
0x117a   :  { %v2919_v10 = vadd.f32 %v2914_v30, %v2909_v4 }
0x117c   :  { %4607 = vmatmul.mubr.msk.f32.gmra.mxu1 %vm50_vm0, %v2918_v16 }
0x117d   :  { %4609 = vmatprep.mubr.msk.f32.mxu1 %vm4978_vm2, %v4973_v24 }
0x1180   :  { %4610 = vmatmul.mubr.msk.f32.gmra.mxu1 %vm50_vm0, %v2919_v10 }
0x1181   :  { %4612 = vmatprep.mubr.msk.f32.mxu1 %vm4978_vm2, %v4973_v24 }
0x1184   :  { %4613 = vmatmul.mubr.msk.f32.gmra.mxu1 %vm50_vm0, %v2920_v13  ;;  %v3989_v13 = vld [vmem:[%s6715_s6 + $0x20] sm:$0xff] }
0x1185   :  { %4654 = vmatprep.mubr.msk.f32.mxu1 %vm4978_vm2, %v4973_v24 }
0x1232   :  { %v3011_v31 = vpop.f32.mrf.mxu1 }
0x1233   :  { %v3012_v27 = vadd.f32 %v3011_v31, %v2929_v20 }
0x1234   :  { %v4602_v36 = vpop.f32.mrf.mxu1 }
0x1235   :  { %v3035_v29 = vadd.f32 %v3012_v27, %v5943_v52 }
0x1237   :  { %v3040_v2 = vsel %vm50_vm0, %v3035_v29, 0.0 }
0x1238   :  { %3041 = vadd.xlane.f32.xlu0 %v3040_v2  ;;  %v3016_v5 = vpop.f32.mrf.mxu1 }
0x1239   :  { %v3017_v37 = vadd.f32 %v3016_v5, %v2929_v20 }
0x123a   :  { %v4605_v15 = vpop.f32.mrf.mxu1 }
0x123b   :  { %v3036_v14 = vadd.f32 %v3017_v37, %v5949_v43 }
0x123c   :  { %v3021_v9 = vpop.f32.mrf.mxu1 }
0x123d   :  { %v3022_v54 = vadd.f32 %v3021_v9, %v2929_v20  ;;  %v3043_v51 = vsel %vm50_vm0, %v3036_v14, 0.0 }
0x123e   :  { %3044 = vadd.xlane.f32.xlu1 %v3043_v51  ;;  %v4608_v38 = vpop.f32.mrf.mxu1 }
0x123f   :  { %v3037_v12 = vadd.f32 %v3022_v54, %v5955_v44  ;;  %v3992_v44 = vld [vmem:[%s6715_s6 + $0x38] sm:$0xff]  ;;  %v3108_v54 = vrot.slane %v6415_v48, %v5311_v45 }
0x1240   :  { %v3026_v23 = vpop.f32.mrf.mxu1  ;;  %4616 = vmatpush3.msra.mxu0 %v3992_v44 }
0x1241   :  { %v3027_v47 = vadd.f32 %v3026_v23, %v2929_v20  ;;  %v3046_v52 = vsel %vm50_vm0, %v3037_v12, 0.0  ;;  %4617 = vmatprep.subr.mxu0 %v4973_v24 }
0x1242   :  { %3047 = vadd.xlane.f32.xlu0 %v3046_v52  ;;  %v4611_v7 = vpop.f32.mrf.mxu1  ;;  %4618 = vmatpush3.msra.mxu0 %v3991_v46  ;;  %v3117_v52 = vrot.slane %v6415_v48, %v5360_v8 }
0x1243   :  { %v3038_v34 = vadd.f32 %v3027_v47, %v5961_v21  ;;  %4619 = vmatprep.subr.mxu0 %v4973_v24 }
0x1244   :  { %v3031_v49 = vpop.f32.mrf.mxu1  ;;  %4620 = vmatpush3.msra.mxu0 %v3990_v61 }
0x1245   :  { %v3032_v60 = vadd.f32 %v3031_v49, %v2929_v20  ;;  %v3049_v43 = vsel %vm50_vm0, %v3038_v34, 0.0  ;;  %4621 = vmatprep.subr.mxu0 %v4973_v24 }
0x1246   :  { %3050 = vadd.xlane.f32.xlu1 %v3049_v43  ;;  %v4614_v25 = vpop.f32.mrf.mxu1  ;;  %4622 = vmatpush3.msra.mxu0 %v3989_v13 }
0x1247   :  { %v3039_v62 = vadd.f32 %v3032_v60, %v5967_v28  ;;  %3611 = vmatprep.subr.mxu0 %v4973_v24 }
0x1249   :  { %v3052_v0 = vsel %vm50_vm0, %v3039_v62, 0.0 }
0x124a   :  { %3053 = vadd.xlane.f32.xlu0 %v3052_v0 }
0x12c1   :  { %v3042_v21 = vpop.xlane.xlu0 %3041 }
0x12c2   :  { %v3055_v35 = vmul.f32 0.03125, %v3042_v21 }
0x12c4   :  { %v3060_v28 = vsub.f32 %v3035_v29, %v3055_v35 }
0x12c6   :  { %v3065_v18 = vmul.f32 %v3060_v28, %v3060_v28 }
0x12c7   :  { %v3045_v6 = vpop.xlane.xlu1 %3044 }
0x12c8   :  { %v3056_v57 = vmul.f32 0.03125, %v3045_v6  ;;  %v3070_v39 = vsel %vm50_vm0, %v3065_v18, 0.0 }
0x12c9   :  { %3071 = vadd.xlane.f32.xlu1 %v3070_v39 }
0x12ca   :  { %v3061_v59 = vsub.f32 %v3036_v14, %v3056_v57 }
0x12cb   :  { %v3048_v58 = vpop.xlane.xlu0 %3047 }
0x12cc   :  { %v3057_v50 = vmul.f32 0.03125, %v3048_v58  ;;  %v3066_v63 = vmul.f32 %v3061_v59, %v3061_v59  ;;  %v4004_v58 = vld [vmem:[%s6716_s7 + $0x70] sm:$0xff] }
0x12ce   :  { %v3062_v1 = vsub.f32 %v3037_v12, %v3057_v50  ;;  %v3073_v19 = vsel %vm50_vm0, %v3066_v63, 0.0  ;;  %v4003_v50 = vld [vmem:[%s6716_s7 + $0x68] sm:$0xff]  ;;  %v4002_v63 = vld [vmem:[%s6716_s7 + $0x60] sm:$0xff] }
0x12cf   :  { %3074 = vadd.xlane.f32.xlu0 %v3073_v19  ;;  %v3051_v11 = vpop.xlane.xlu1 %3050  ;;  %v4000_v19 = vld [vmem:[%s6716_s7 + $0x50] sm:$0xff] }
0x12d0   :  { %v3058_v56 = vmul.f32 0.03125, %v3051_v11  ;;  %v3067_v3 = vmul.f32 %v3062_v1, %v3062_v1  ;;  %v3999_v11 = vld [vmem:[%s6716_s7 + $0x48] sm:$0xff] }
0x12d2   :  { %v3063_v40 = vsub.f32 %v3038_v34, %v3058_v56  ;;  %v3076_v16 = vsel %vm50_vm0, %v3067_v3, 0.0  ;;  %v3998_v56 = vld [vmem:[%s6716_s7 + $0x40] sm:$0xff]  ;;  %v3131_v3 = vrot.slane %v6415_v48, %v5887_v55 }
0x12d3   :  { %3077 = vadd.xlane.f32.xlu1 %v3076_v16  ;;  %v3054_v30 = vpop.xlane.xlu0 %3053 }
0x12d4   :  { %v3059_v22 = vmul.f32 0.03125, %v3054_v30  ;;  %v3068_v4 = vmul.f32 %v3063_v40, %v3063_v40 }
0x12d6   :  { %v3064_v42 = vsub.f32 %v3039_v62, %v3059_v22  ;;  %v3079_v32 = vsel %vm50_vm0, %v3068_v4, 0.0 }
0x12d7   :  { %3080 = vadd.xlane.f32.xlu0 %v3079_v32 }
0x12d8   :  { %v3069_v53 = vmul.f32 %v3064_v42, %v3064_v42 }
0x12da   :  { %v3082_v10 = vsel %vm50_vm0, %v3069_v53, 0.0 }
0x12db   :  { %3083 = vadd.xlane.f32.xlu1 %v3082_v10 }
0x1352   :  { %v3072_v20 = vpop.xlane.xlu1 %3071 }
0x1353   :  { %v3085_v31 = vmul.f32 0.03125, %v3072_v20 }
0x1355   :  { %v3090_v27 = vadd.f32 1e-05, %v3085_v31 }
0x1357   :  { %4887 = vrsqrt.f32 %v3090_v27 }
0x1358   :  { %v3075_v36 = vpop.xlane.xlu0 %3074 }
0x1359   :  { %v3086_v29 = vmul.f32 0.03125, %v3075_v36 }
0x135b   :  { %v3091_v2 = vadd.f32 1e-05, %v3086_v29 }
0x135c   :  { %v3078_v5 = vpop.xlane.xlu1 %3077 }
0x135d   :  { %4889 = vrsqrt.f32 %v3091_v2  ;;  %v3087_v37 = vmul.f32 0.03125, %v3078_v5 }
0x135f   :  { %v3092_v15 = vadd.f32 1e-05, %v3087_v37 }
0x1360   :  { %v3081_v14 = vpop.xlane.xlu0 %3080 }
0x1361   :  { %4891 = vrsqrt.f32 %v3092_v15  ;;  %v3088_v9 = vmul.f32 0.03125, %v3081_v14 }
0x1363   :  { %v3093_v51 = vadd.f32 1e-05, %v3088_v9 }
0x1364   :  { %v4888_v38 = vpop.eup %4887  ;;  %v3084_v12 = vpop.xlane.xlu1 %3083 }
0x1365   :  { %v3100_v23 = vmul.f32 %v4888_v38, %v3060_v28  ;;  %4893 = vrsqrt.f32 %v3093_v51  ;;  %v3089_v47 = vmul.f32 0.03125, %v3084_v12 }
0x1367   :  { %v3109_v7 = vmul.f32 %v3108_v54, %v3100_v23  ;;  %v3094_v34 = vadd.f32 1e-05, %v3089_v47 }
0x1369   :  { %4895 = vrsqrt.f32 %v3094_v34  ;;  %v6454_v49 = vadd.f32 %v3117_v52, %v3109_v7 }
0x136a   :  { %v4890_v60 = vpop.eup %4889 }
0x136b   :  { %4624 = vmatmul.mubr.msk.f32.vlgmr.msra.gmra.mxu0 %vm50_vm0, %v6454_v49  ;;  %v3101_v43 = vmul.f32 %v4890_v60, %v3061_v59  ;;  %v4005_v59 = vld [vmem:[%s6716_s7 + $0x78] sm:$0xff] }
0x136c   :  { %4626 = vmatprep.mubr.msk.f32.mxu0 %vm4978_vm2, %v4973_v24  ;;  %4639 = vmatpush3.msra.mxu1 %v4005_v59 }
0x136d   :  { %v3110_v45 = vmul.f32 %v3108_v54, %v3101_v43  ;;  %4640 = vmatprep.subr.mxu1 %v4973_v24 }
0x136e   :  { %v4892_v25 = vpop.eup %4891  ;;  %4641 = vmatpush3.msra.mxu1 %v4004_v58 }
0x136f   :  { %v6460_v62 = vadd.f32 %v3117_v52, %v3110_v45  ;;  %v3102_v0 = vmul.f32 %v4892_v25, %v3062_v1  ;;  %4642 = vmatprep.subr.mxu1 %v4973_v24  ;;  %v4001_v1 = vld [vmem:[%s6716_s7 + $0x58] sm:$0xff] }
0x1370   :  { %4643 = vmatpush3.msra.mxu1 %v4003_v50 }
0x1371   :  { %4627 = vmatmul.mubr.msk.f32.gmra.mxu0 %vm50_vm0, %v6460_v62  ;;  %v3111_v8 = vmul.f32 %v3108_v54, %v3102_v0  ;;  %4644 = vmatprep.subr.mxu1 %v4973_v24 }
0x1372   :  { %v4894_v44 = vpop.eup %4893  ;;  %4629 = vmatprep.mubr.msk.f32.mxu0 %vm4978_vm2, %v4973_v24  ;;  %4645 = vmatpush3.msra.mxu1 %v4002_v63 }
0x1373   :  { %v6466_v46 = vadd.f32 %v3117_v52, %v3111_v8  ;;  %v3103_v21 = vmul.f32 %v4894_v44, %v3063_v40  ;;  %4646 = vmatprep.subr.mxu1 %v4973_v24 }
0x1374   :  { %4647 = vmatpush3.msra.mxu1 %v4001_v1 }
0x1375   :  { %4630 = vmatmul.mubr.msk.f32.gmra.mxu0 %vm50_vm0, %v6466_v46  ;;  %v3112_v35 = vmul.f32 %v3108_v54, %v3103_v21  ;;  %4648 = vmatprep.subr.mxu1 %v4973_v24 }
0x1376   :  { %v4896_v28 = vpop.eup %4895  ;;  %4632 = vmatprep.mubr.msk.f32.mxu0 %vm4978_vm2, %v4973_v24  ;;  %4649 = vmatpush3.msra.mxu1 %v4000_v19 }
0x1377   :  { %v6472_v18 = vadd.f32 %v3117_v52, %v3112_v35  ;;  %v3104_v6 = vmul.f32 %v4896_v28, %v3064_v42  ;;  %4650 = vmatprep.subr.mxu1 %v4973_v24 }
0x1378   :  { %4651 = vmatpush3.msra.mxu1 %v3999_v11 }
0x1379   :  { %4633 = vmatmul.mubr.msk.f32.gmra.mxu0 %vm50_vm0, %v6472_v18  ;;  %v3113_v57 = vmul.f32 %v3108_v54, %v3104_v6  ;;  %4652 = vmatprep.subr.mxu1 %v4973_v24 }
0x137a   :  { %4635 = vmatprep.mubr.msk.f32.mxu0 %vm4978_vm2, %v4973_v24  ;;  %4653 = vmatpush3.msra.mxu1 %v3998_v56 }
0x137b   :  { %v6478_v39 = vadd.f32 %v3117_v52, %v3113_v57  ;;  %4669 = vmatprep.subr.mxu1 %v4973_v24 }
0x137d   :  { %4636 = vmatmul.mubr.msk.f32.gmra.mxu0 %vm50_vm0, %v6478_v39 }
0x142b   :  { %v3213_v40 = vpop.f32.mrf.mxu0 }
0x142c   :  { %v3214_v16 = vadd.f32 %v3213_v40, %v3131_v3 }
0x142d   :  { %v4625_v30 = vpop.f32.mrf.mxu0 }
0x142e   :  { %v3237_v22 = vmul.f32 %v3214_v16, %v3214_v16 }
0x1430   :  { %v3242_v4 = vmul.f32 %v3237_v22, %v3214_v16 }
0x1431   :  { %v3218_v42 = vpop.f32.mrf.mxu0 }
0x1432   :  { %v3247_v32 = vmul.f32 0.044715, %v3242_v4  ;;  %v3219_v53 = vadd.f32 %v3218_v42, %v3131_v3 }
0x1433   :  { %v4628_v10 = vpop.f32.mrf.mxu0 }
0x1434   :  { %v3252_v61 = vadd.f32 %v3247_v32, %v3214_v16  ;;  %v3238_v13 = vmul.f32 %v3219_v53, %v3219_v53 }
0x1435   :  { %v3223_v20 = vpop.f32.mrf.mxu0 }
0x1436   :  { %v3257_v31 = vmul.f32 0.7978846, %v3252_v61  ;;  %v3243_v27 = vmul.f32 %v3238_v13, %v3219_v53  ;;  %v3224_v36 = vadd.f32 %v3223_v20, %v3131_v3  ;;  %v3294_v13 = vrot.slane %v6415_v48, %v5905_v33 }
0x1437   :  { %v4631_v29 = vpop.f32.mrf.mxu0 }
0x1438   :  { %4897 = vtanh.f32 %v3257_v31  ;;  %v3248_v2 = vmul.f32 0.044715, %v3243_v27  ;;  %v3239_v5 = vmul.f32 %v3224_v36, %v3224_v36 }
0x1439   :  { %v3228_v37 = vpop.f32.mrf.mxu0 }
0x143a   :  { %v3253_v15 = vadd.f32 %v3248_v2, %v3219_v53  ;;  %v3244_v14 = vmul.f32 %v3239_v5, %v3224_v36  ;;  %v3229_v9 = vadd.f32 %v3228_v37, %v3131_v3 }
0x143b   :  { %v4634_v54 = vpop.f32.mrf.mxu0 }
0x143c   :  { %v3258_v51 = vmul.f32 0.7978846, %v3253_v15  ;;  %v3249_v38 = vmul.f32 0.044715, %v3244_v14  ;;  %v3240_v12 = vmul.f32 %v3229_v9, %v3229_v9 }
0x143d   :  { %v3233_v23 = vpop.f32.mrf.mxu0 }
0x143e   :  { %4899 = vtanh.f32 %v3258_v51  ;;  %v3254_v47 = vadd.f32 %v3249_v38, %v3224_v36  ;;  %v3245_v52 = vmul.f32 %v3240_v12, %v3229_v9  ;;  %v3234_v7 = vadd.f32 %v3233_v23, %v3131_v3 }
0x143f   :  { %v4637_v34 = vpop.f32.mrf.mxu0 }
0x1440   :  { %v3259_v60 = vmul.f32 0.7978846, %v3254_v47  ;;  %v3250_v43 = vmul.f32 0.044715, %v3245_v52  ;;  %v3241_v45 = vmul.f32 %v3234_v7, %v3234_v7 }
0x1442   :  { %4901 = vtanh.f32 %v3259_v60  ;;  %v3255_v25 = vadd.f32 %v3250_v43, %v3229_v9  ;;  %v3246_v0 = vmul.f32 %v3241_v45, %v3234_v7 }
0x1444   :  { %v3260_v8 = vmul.f32 0.7978846, %v3255_v25  ;;  %v3251_v44 = vmul.f32 0.044715, %v3246_v0 }
0x1445   :  { %v4898_v21 = vpop.eup %4897 }
0x1446   :  { %v3267_v35 = vadd.f32 1.0, %v4898_v21  ;;  %4903 = vtanh.f32 %v3260_v8  ;;  %v3256_v28 = vadd.f32 %v3251_v44, %v3234_v7 }
0x1448   :  { %v3272_v6 = vmul.f32 0.5, %v3267_v35  ;;  %v3261_v57 = vmul.f32 0.7978846, %v3256_v28 }
0x144a   :  { %v3277_v59 = vmul.f32 %v3272_v6, %v3214_v16  ;;  %4905 = vtanh.f32 %v3261_v57 }
0x144b   :  { %v4900_v58 = vpop.eup %4899 }
0x144c   :  { %4655 = vmatmul.mubr.msk.f32.vlgmr.msra.gmra.mxu1 %vm1801_vm6, %v3277_v59  ;;  %v3268_v50 = vadd.f32 1.0, %v4900_v58 }
0x144d   :  { %4657 = vmatprep.mubr.msk.f32.mxu1 %vm4978_vm2, %v4973_v24 }
0x144e   :  { %v3273_v63 = vmul.f32 0.5, %v3268_v50 }
0x144f   :  { %v4902_v1 = vpop.eup %4901 }
0x1450   :  { %v3278_v19 = vmul.f32 %v3273_v63, %v3219_v53  ;;  %v3269_v11 = vadd.f32 1.0, %v4902_v1 }
0x1452   :  { %4658 = vmatmul.mubr.msk.f32.gmra.mxu1 %vm1801_vm6, %v3278_v19  ;;  %v3274_v56 = vmul.f32 0.5, %v3269_v11 }
0x1453   :  { %v4904_v3 = vpop.eup %4903  ;;  %4660 = vmatprep.mubr.msk.f32.mxu1 %vm4978_vm2, %v4973_v24 }
0x1454   :  { %v3279_v40 = vmul.f32 %v3274_v56, %v3224_v36  ;;  %v3270_v16 = vadd.f32 1.0, %v4904_v3 }
0x1456   :  { %4661 = vmatmul.mubr.msk.f32.gmra.mxu1 %vm1801_vm6, %v3279_v40  ;;  %v3275_v30 = vmul.f32 0.5, %v3270_v16 }
0x1457   :  { %v4906_v22 = vpop.eup %4905  ;;  %4663 = vmatprep.mubr.msk.f32.mxu1 %vm4978_vm2, %v4973_v24 }
0x1458   :  { %v3280_v4 = vmul.f32 %v3275_v30, %v3229_v9  ;;  %v3271_v42 = vadd.f32 1.0, %v4906_v22 }
0x145a   :  { %4664 = vmatmul.mubr.msk.f32.gmra.mxu1 %vm1801_vm6, %v3280_v4  ;;  %v3276_v32 = vmul.f32 0.5, %v3271_v42 }
0x145b   :  { %4666 = vmatprep.mubr.msk.f32.mxu1 %vm4978_vm2, %v4973_v24 }
0x145c   :  { %v3281_v53 = vmul.f32 %v3276_v32, %v3234_v7 }
0x145e   :  { %4667 = vmatmul.mubr.msk.f32.gmra.mxu1 %vm1801_vm6, %v3281_v53 }
0x145f   :  { %4673 = vmatprep.mubr.msk.f32.mxu1 %vm4978_vm2, %v4973_v24 }
0x150c   :  { %v3376_v10 = vpop.f32.mrf.mxu1 }
0x150d   :  { %v3377_v2 = vadd.f32 %v3376_v10, %v3294_v13 }
0x150e   :  { %v4656_v61 = vpop.f32.mrf.mxu1 }
0x150f   :  { %v3400_v54 = vadd.f32 %v3377_v2, %v6454_v49 }
0x1511   :  { %v3405_v52 = vsel %vm50_vm0, %v3400_v54, 0.0 }
0x1512   :  { %v3381_v20 = vpop.f32.mrf.mxu1 }
0x1513   :  { %v3382_v31 = vadd.f32 %v3381_v20, %v3294_v13 }
0x1514   :  { %v4659_v27 = vpop.f32.mrf.mxu1 }
0x1515   :  { %v3401_v36 = vadd.f32 %v3382_v31, %v6460_v62 }
0x1516   :  { %v3386_v29 = vpop.f32.mrf.mxu1 }
0x1517   :  { %v3387_v5 = vadd.f32 %v3386_v29, %v3294_v13  ;;  %v3408_v37 = vsel %vm50_vm0, %v3401_v36, 0.0 }
0x1518   :  { %3409 = vadd.xlane.f32.xlu0 %v3408_v37  ;;  %v4662_v15 = vpop.f32.mrf.mxu1 }
0x1519   :  { %v3402_v14 = vadd.f32 %v3387_v5, %v6466_v46  ;;  %v3473_v5 = vrot.slane %v6415_v48, %v5382_v17 }
0x151a   :  { %v3391_v9 = vpop.f32.mrf.mxu1 }
0x151b   :  { %v3392_v51 = vadd.f32 %v3391_v9, %v3294_v13  ;;  %v3411_v38 = vsel %vm50_vm0, %v3402_v14, 0.0 }
0x151c   :  { %3412 = vadd.xlane.f32.xlu1 %v3411_v38  ;;  %v4665_v12 = vpop.f32.mrf.mxu1 }
0x151d   :  { %v3403_v23 = vadd.f32 %v3392_v51, %v6472_v18 }
0x151e   :  { %v3396_v62 = vpop.f32.mrf.mxu1 }
0x151f   :  { %v3397_v47 = vadd.f32 %v3396_v62, %v3294_v13  ;;  %v3414_v7 = vsel %vm50_vm0, %v3403_v23, 0.0 }
0x1520   :  { %3406 = vadd.xlane.f32.xlu1 %v3405_v52  ;;  %3415 = vadd.xlane.f32.xlu0 %v3414_v7  ;;  %v4668_v34 = vpop.f32.mrf.mxu1 }
0x1521   :  { %v3404_v46 = vadd.f32 %v3397_v47, %v6478_v39 }
0x1523   :  { %v3417_v49 = vsel %vm50_vm0, %v3404_v46, 0.0 }
0x1524   :  { %3418 = vadd.xlane.f32.xlu0 %v3417_v49 }
0x15a1   :  { %v3410_v60 = vpop.xlane.xlu0 %3409 }
0x15a2   :  { %v3421_v43 = vmul.f32 0.03125, %v3410_v60 }
0x15a4   :  { %v3426_v45 = vsub.f32 %v3401_v36, %v3421_v43 }
0x15a5   :  { %v3413_v25 = vpop.xlane.xlu1 %3412 }
0x15a6   :  { %v3422_v0 = vmul.f32 0.03125, %v3413_v25  ;;  %v3431_v18 = vmul.f32 %v3426_v45, %v3426_v45 }
0x15a8   :  { %v3427_v8 = vsub.f32 %v3402_v14, %v3422_v0  ;;  %v3438_v44 = vsel %vm50_vm0, %v3431_v18, 0.0  ;;  %v3482_v14 = vrot.slane %v6415_v48, %v5405_v26 }
0x15a9   :  { %3439 = vadd.xlane.f32.xlu1 %v3438_v44  ;;  %v3416_v21 = vpop.xlane.xlu0 %3415  ;;  %v3407_v35 = vpop.xlane.xlu1 %3406 }
0x15aa   :  { %v3423_v28 = vmul.f32 0.03125, %v3416_v21  ;;  %v3420_v6 = vmul.f32 0.03125, %v3407_v35  ;;  %v3432_v57 = vmul.f32 %v3427_v8, %v3427_v8 }
0x15ac   :  { %v3428_v59 = vsub.f32 %v3403_v23, %v3423_v28  ;;  %v3425_v39 = vsub.f32 %v3400_v54, %v3420_v6  ;;  %v3441_v58 = vsel %vm50_vm0, %v3432_v57, 0.0 }
0x15ad   :  { %v3419_v50 = vpop.xlane.xlu0 %3418  ;;  %3442 = vadd.xlane.f32.xlu0 %v3441_v58 }
0x15ae   :  { %v3424_v63 = vmul.f32 0.03125, %v3419_v50  ;;  %v3433_v1 = vmul.f32 %v3428_v59, %v3428_v59  ;;  %v3430_v19 = vmul.f32 %v3425_v39, %v3425_v39 }
0x15b0   :  { %v3429_v11 = vsub.f32 %v3404_v46, %v3424_v63  ;;  %v3444_v56 = vsel %vm50_vm0, %v3433_v1, 0.0  ;;  %v3435_v3 = vsel %vm50_vm0, %v3430_v19, 0.0 }
0x15b1   :  { %3445 = vadd.xlane.f32.xlu1 %v3444_v56  ;;  %3436 = vadd.xlane.f32.xlu0 %v3435_v3 }
0x15b2   :  { %v3434_v40 = vmul.f32 %v3429_v11, %v3429_v11 }
0x15b4   :  { %v3447_v16 = vsel %vm50_vm0, %v3434_v40, 0.0 }
0x15b5   :  { %3448 = vadd.xlane.f32.xlu1 %v3447_v16 }
0x1632   :  { %v3440_v30 = vpop.xlane.xlu1 %3439 }
0x1633   :  { %v3451_v22 = vmul.f32 0.03125, %v3440_v30 }
0x1635   :  { %v3456_v4 = vadd.f32 1e-05, %v3451_v22 }
0x1636   :  { %v3443_v42 = vpop.xlane.xlu0 %3442 }
0x1637   :  { %4907 = vrsqrt.f32 %v3456_v4  ;;  %v3452_v32 = vmul.f32 0.03125, %v3443_v42 }
0x1639   :  { %v3457_v53 = vadd.f32 1e-05, %v3452_v32 }
0x163a   :  { %v3437_v10 = vpop.xlane.xlu0 %3436  ;;  %v3446_v61 = vpop.xlane.xlu1 %3445 }
0x163b   :  { %4909 = vrsqrt.f32 %v3457_v53  ;;  %v3450_v13 = vmul.f32 0.03125, %v3437_v10  ;;  %v3453_v20 = vmul.f32 0.03125, %v3446_v61  ;;  %v3602_v61 = vld [vmem:[%s6720_s11 + $0x78] sm:$0xff] }
0x163c   :  { %3612 = vmatpush1.msra.mxu0 %v3602_v61 }
0x163d   :  { %v3455_v31 = vadd.f32 1e-05, %v3450_v13  ;;  %v3458_v27 = vadd.f32 1e-05, %v3453_v20  ;;  %v3601_v13 = vld [vmem:[%s6720_s11 + $0x70] sm:$0xff]  ;;  %3613 = vmatprep.subr.mxu0 %v4973_v24  ;;  %v3600_v20 = vld [vmem:[%s6720_s11 + $0x68] sm:$0xff] }
0x163e   :  { %v3449_v36 = vpop.xlane.xlu1 %3448  ;;  %3614 = vmatpush1.msra.mxu0 %v3601_v13 }
0x163f   :  { %4911 = vrsqrt.f32 %v3455_v31  ;;  %v3454_v29 = vmul.f32 0.03125, %v3449_v36  ;;  %3615 = vmatprep.subr.mxu0 %v4973_v24  ;;  %v3599_v31 = vld [vmem:[%s6720_s11 + $0x60] sm:$0xff]  ;;  %v3597_v36 = vld [vmem:[%s6720_s11 + $0x50] sm:$0xff] }
0x1640   :  { %4913 = vrsqrt.f32 %v3458_v27  ;;  %3616 = vmatpush1.msra.mxu0 %v3600_v20  ;;  %v3598_v27 = vld [vmem:[%s6720_s11 + $0x58] sm:$0xff] }
0x1641   :  { %v3459_v2 = vadd.f32 1e-05, %v3454_v29  ;;  %3617 = vmatprep.subr.mxu0 %v4973_v24  ;;  %v3596_v29 = vld [vmem:[%s6720_s11 + $0x48] sm:$0xff] }
0x1642   :  { %3618 = vmatpush1.msra.mxu0 %v3599_v31 }
0x1643   :  { %4915 = vrsqrt.f32 %v3459_v2  ;;  %3619 = vmatprep.subr.mxu0 %v4973_v24  ;;  %v3595_v2 = vld [vmem:[%s6720_s11 + $0x40] sm:$0xff] }
0x1644   :  { %v4908_v37 = vpop.eup %4907  ;;  %3620 = vmatpush1.msra.mxu0 %v3598_v27  ;;  %v3607_v27 = vld [vmem:[%s6720_s11 + $0xa0] sm:$0xff] }
0x1645   :  { %v3466_v15 = vmul.f32 %v4908_v37, %v3426_v45  ;;  %3621 = vmatprep.subr.mxu0 %v4973_v24  ;;  %v3593_v37 = vld [vmem:[%s6720_s11 + $0x30] sm:$0xff] }
0x1646   :  { %3622 = vmatpush1.msra.mxu0 %v3597_v36 }
0x1647   :  { %v3475_v9 = vmul.f32 %v3473_v5, %v3466_v15  ;;  %3623 = vmatprep.subr.mxu0 %v4973_v24  ;;  %v3592_v15 = vld [vmem:[%s6720_s11 + $0x28] sm:$0xff] }
0x1648   :  { %v4910_v54 = vpop.eup %4909  ;;  %3624 = vmatpush1.msra.mxu0 %v3596_v29 }
0x1649   :  { %v3484_v51 = vadd.f32 %v3482_v14, %v3475_v9  ;;  %v3467_v38 = vmul.f32 %v4910_v54, %v3427_v8  ;;  %3625 = vmatprep.subr.mxu0 %v4973_v24  ;;  %v3590_v9 = vld [vmem:[%s6720_s11 + $0x18] sm:$0xff]  ;;  %v3589_v54 = vld [vmem:[%s6720_s11 + $0x10] sm:$0xff] }
0x164a   :  { %3626 = vmatpush1.msra.mxu0 %v3595_v2 }
0x164b   :  { %v3491_v12 = vsel %vm50_vm0, %v3484_v51, 0.0  ;;  %v3476_v23 = vmul.f32 %v3473_v5, %v3467_v38  ;;  %3627 = vmatprep.subr.mxu0 %v4973_v24 }
0x164c   :  { %v4912_v62 = vpop.eup %4911  ;;  %3492 = vadd.xlane.f32.xlu0 %v3491_v12 }
0x164d   :  { %v4914_v47 = vpop.eup %4913  ;;  %v3485_v52 = vadd.f32 %v3482_v14, %v3476_v23  ;;  %v3465_v7 = vmul.f32 %v4912_v62, %v3425_v39 }
0x164e   :  { %v3468_v34 = vmul.f32 %v4914_v47, %v3428_v59 }
0x164f   :  { %v3494_v17 = vsel %vm50_vm0, %v3485_v52, 0.0  ;;  %v3474_v46 = vmul.f32 %v3473_v5, %v3465_v7 }
0x1650   :  { %v4916_v49 = vpop.eup %4915  ;;  %3495 = vadd.xlane.f32.xlu1 %v3494_v17  ;;  %v3477_v60 = vmul.f32 %v3473_v5, %v3468_v34 }
0x1651   :  { %v3483_v26 = vadd.f32 %v3482_v14, %v3474_v46  ;;  %v3469_v48 = vmul.f32 %v4916_v49, %v3429_v11 }
0x1652   :  { %v3486_v43 = vadd.f32 %v3482_v14, %v3477_v60 }
0x1653   :  { %v3488_v45 = vsel %vm50_vm0, %v3483_v26, 0.0  ;;  %v3478_v25 = vmul.f32 %v3473_v5, %v3469_v48  ;;  %v3594_v5 = vld [vmem:[%s6720_s11 + $0x38] sm:$0xff] }
0x1654   :  { %3489 = vadd.xlane.f32.xlu1 %v3488_v45  ;;  %v3497_v0 = vsel %vm50_vm0, %v3486_v43, 0.0  ;;  %3628 = vmatpush1.msra.mxu0 %v3594_v5  ;;  %v3606_v48 = vld [vmem:[%s6720_s11 + $0x98] sm:$0xff]  ;;  %v46_v5 = vld [vmem:[%s6718_s9 + $0x10] sm:$0xff] }
0x1655   :  { %3498 = vadd.xlane.f32.xlu0 %v3497_v0  ;;  %v3487_v18 = vadd.f32 %v3482_v14, %v3478_v25  ;;  %3629 = vmatprep.subr.mxu0 %v4973_v24  ;;  %v3591_v14 = vld [vmem:[%s6720_s11 + $0x20] sm:$0xff]  ;;  %v3605_v0 = vld [vmem:[%s6720_s11 + $0x90] sm:$0xff] }
0x1656   :  { %3630 = vmatpush1.msra.mxu0 %v3593_v37 }
0x1657   :  { %v3500_v8 = vsel %vm50_vm0, %v3487_v18, 0.0  ;;  %3631 = vmatprep.subr.mxu0 %v4973_v24 }
0x1658   :  { %3632 = vmatpush1.msra.mxu0 %v3592_v15 }
0x1659   :  { %3501 = vadd.xlane.f32.xlu0 %v3500_v8  ;;  %3633 = vmatprep.subr.mxu0 %v4973_v24  ;;  %v6659_v8 = vld [vmem:[%s6718_s9] sm:$0xff] }
0x165a   :  { %3634 = vmatpush1.msra.mxu0 %v3591_v14  ;;  %v3758_v14 = vrot.slane %v6659_v8, %v5905_v33 }
0x165b   :  { %3635 = vmatprep.subr.mxu0 %v4973_v24 }
0x165c   :  { %3636 = vmatpush1.msra.mxu0 %v3590_v9 }
0x165d   :  { %3637 = vmatprep.subr.mxu0 %v4973_v24 }
0x165e   :  { %3638 = vmatpush1.msra.mxu0 %v3589_v54 }
0x165f   :  { %3639 = vmatprep.subr.mxu0 %v4973_v24 }
0x16d5   :  { %v3493_v44 = vpop.xlane.xlu0 %3492 }
0x16d6   :  { %v3504_v21 = vmul.f32 0.03125, %v3493_v44  ;;  %v3556_v44 = vrot.slane %v6659_v8, %v5887_v55 }
0x16d8   :  { %v6557_v35 = vsub.f32 %v3484_v51, %v3504_v21  ;;  %v3588_v51 = vld [vmem:[%s6720_s11 + $0x8] sm:$0xff] }
0x16d9   :  { %v3496_v28 = vpop.xlane.xlu1 %3495  ;;  %3640 = vmatpush1.msra.mxu0 %v3588_v51 }
0x16da   :  { %v3505_v6 = vmul.f32 0.03125, %v3496_v28  ;;  %v3514_v57 = vmul.f32 %v6557_v35, %v6557_v35  ;;  %3641 = vmatprep.subr.mxu0 %v4973_v24 }
0x16dc   :  { %v6561_v59 = vsub.f32 %v3485_v52, %v3505_v6  ;;  %v3521_v39 = vsel %vm50_vm0, %v3514_v57, 0.0  ;;  %v3565_v6 = vrot.slane %v6659_v8, %v5781_v41  ;;  %v3603_v57 = vld [vmem:[%s6720_s11 + $0x80] sm:$0xff] }
0x16dd   :  { %3522 = vadd.xlane.f32.xlu1 %v3521_v39  ;;  %v3490_v58 = vpop.xlane.xlu1 %3489 }
0x16de   :  { %v3499_v50 = vpop.xlane.xlu0 %3498  ;;  %v3503_v63 = vmul.f32 0.03125, %v3490_v58  ;;  %v3515_v1 = vmul.f32 %v6561_v59, %v6561_v59  ;;  %v48_v58 = vld [vmem:[%s6718_s9 + $0x20] sm:$0xff] }
0x16df   :  { %v3506_v19 = vmul.f32 0.03125, %v3499_v50  ;;  %4670 = vmatpush3.msra.mxu1 %v48_v58 }
0x16e0   :  { %v6566_v11 = vsub.f32 %v3483_v26, %v3503_v63  ;;  %v3524_v56 = vsel %vm50_vm0, %v3515_v1, 0.0  ;;  %v3587_v26 = vld [vmem:[%s6720_s11] sm:$0xff]  ;;  %4671 = vmatprep.subr.mxu1 %v4973_v24 }
0x16e1   :  { %v6569_v3 = vsub.f32 %v3486_v43, %v3506_v19  ;;  %3525 = vadd.xlane.f32.xlu0 %v3524_v56  ;;  %3642 = vmatpush1.msra.mxu0 %v3587_v26 }
0x16e2   :  { %v3502_v40 = vpop.xlane.xlu0 %3501  ;;  %v3513_v16 = vmul.f32 %v6566_v11, %v6566_v11  ;;  %3667 = vmatprep.subr.mxu0 %v4973_v24 }
0x16e3   :  { %v3507_v30 = vmul.f32 0.03125, %v3502_v40  ;;  %v3516_v22 = vmul.f32 %v6569_v3, %v6569_v3  ;;  %3668 = vmatpush2.msra.mxu0 %v3606_v48 }
0x16e4   :  { %v3518_v4 = vsel %vm50_vm0, %v3513_v16, 0.0  ;;  %3669 = vmatprep.subr.mxu0 %v4973_v24 }
0x16e5   :  { %v6576_v42 = vsub.f32 %v3487_v18, %v3507_v30  ;;  %v3527_v32 = vsel %vm50_vm0, %v3516_v22, 0.0  ;;  %3519 = vadd.xlane.f32.xlu0 %v3518_v4  ;;  %v3604_v18 = vld [vmem:[%s6720_s11 + $0x88] sm:$0xff]  ;;  %3670 = vmatpush2.msra.mxu0 %v3605_v0  ;;  %s4982_s11 = smov [#allocation2]  }
0x16e6   :  { %3528 = vadd.xlane.f32.xlu1 %v3527_v32  ;;  %3671 = vmatprep.subr.mxu0 %v4973_v24 }
0x16e7   :  { %v3517_v53 = vmul.f32 %v6576_v42, %v6576_v42  ;;  %3672 = vmatpush2.msra.mxu0 %v3604_v18 }
0x16e8   :  { %3673 = vmatprep.subr.mxu0 %v4973_v24 }
0x16e9   :  { %v3530_v10 = vsel %vm50_vm0, %v3517_v53, 0.0  ;;  %3674 = vmatpush2.msra.mxu0 %v3603_v57 }
0x16ea   :  { %3531 = vadd.xlane.f32.xlu1 %v3530_v10 }
0x1766   :  { %v3523_v38 = vpop.xlane.xlu1 %3522 }
0x1767   :  { %v3534_v12 = vmul.f32 0.03125, %v3523_v38 }
0x1769   :  { %v3539_v23 = vadd.f32 1e-05, %v3534_v12 }
0x176a   :  { %v3526_v62 = vpop.xlane.xlu0 %3525 }
0x176b   :  { %4917 = vrsqrt.f32 %v3539_v23  ;;  %v3535_v47 = vmul.f32 0.03125, %v3526_v62 }
0x176d   :  { %v3540_v52 = vadd.f32 1e-05, %v3535_v47 }
0x176e   :  { %v3520_v7 = vpop.xlane.xlu0 %3519 }
0x176f   :  { %4919 = vrsqrt.f32 %v3540_v52  ;;  %v3533_v34 = vmul.f32 0.03125, %v3520_v7  ;;  %v3529_v17 = vpop.xlane.xlu1 %3528 }
0x1770   :  { %v3536_v46 = vmul.f32 0.03125, %v3529_v17 }
0x1771   :  { %v3538_v49 = vadd.f32 1e-05, %v3533_v34 }
0x1772   :  { %v3541_v60 = vadd.f32 1e-05, %v3536_v46 }
0x1773   :  { %4921 = vrsqrt.f32 %v3538_v49  ;;  %v3532_v43 = vpop.xlane.xlu1 %3531 }
0x1774   :  { %4923 = vrsqrt.f32 %v3541_v60  ;;  %v3537_v45 = vmul.f32 0.03125, %v3532_v43 }
0x1776   :  { %v3542_v25 = vadd.f32 1e-05, %v3537_v45 }
0x1778   :  { %v4918_v21 = vpop.eup %4917  ;;  %4925 = vrsqrt.f32 %v3542_v25 }
0x1779   :  { %v3549_v28 = vmul.f32 %v4918_v21, %v6557_v35  ;;  %v47_v35 = vld [vmem:[%s6718_s9 + $0x18] sm:$0xff] }
0x177a   :  { %4672 = vmatpush3.msra.mxu1 %v47_v35 }
0x177b   :  { %v3558_v39 = vmul.f32 %v3556_v44, %v3549_v28  ;;  %4676 = vmatprep.subr.mxu1 %v4973_v24 }
0x177c   :  { %v4920_v55 = vpop.eup %4919 }
0x177d   :  { %v3567_v50 = vadd.f32 %v3565_v6, %v3558_v39  ;;  %v3550_v41 = vmul.f32 %v4920_v55, %v6561_v59 }
0x177f   :  { %3572 = vrot.lane.b32.xlu0 %v3567_v50, %s4981_s17  ;;  %v3559_v63 = vmul.f32 %v3556_v44, %v3550_v41 }
0x1780   :  { %v4922_v1 = vpop.eup %4921 }
0x1781   :  { %v4924_v19 = vpop.eup %4923  ;;  %v3568_v56 = vadd.f32 %v3565_v6, %v3559_v63  ;;  %v3548_v40 = vmul.f32 %v4922_v1, %v6566_v11 }
0x1782   :  { %v3551_v16 = vmul.f32 %v4924_v19, %v6569_v3 }
0x1783   :  { %3576 = vrot.lane.b32.xlu1 %v3568_v56, %s4979_s23  ;;  %v3557_v30 = vmul.f32 %v3556_v44, %v3548_v40 }
0x1784   :  { %v3560_v59 = vmul.f32 %v3556_v44, %v3551_v16 }
0x1785   :  { %v4926_v22 = vpop.eup %4925  ;;  %v3566_v4 = vadd.f32 %v3565_v6, %v3557_v30 }
0x1786   :  { %v3569_v32 = vadd.f32 %v3565_v6, %v3560_v59  ;;  %v3552_v53 = vmul.f32 %v4926_v22, %v6576_v42 }
0x1788   :  { %3580 = vrot.lane.b32.xlu1 %v3569_v32, %s4980_s24  ;;  %v3561_v10 = vmul.f32 %v3556_v44, %v3552_v53 }
0x178a   :  { %v3570_v61 = vadd.f32 %v3565_v6, %v3561_v10 }
0x178c   :  { %4011 = vmatprep.mubr.msk.f32.mxu0 %vm50_vm0, %v3570_v61  ;;  %3834 = vst.msk [vmem:[%s6722_s13 + $0x8] sm:$0xff] %vm50_vm0, %v3570_v61 }
0x17f1   :  { %v3573_v3 = vpop.permute.xlu0 %3572 }
0x17f2   :  { %v3583_v13 = vsel %vm50_vm0, %v3566_v4, %v3573_v3 }
0x17f5   :  { %v3577_v11 = vpop.permute.xlu1 %3576 }
0x17f6   :  { %v3584_v20 = vsel %vm1801_vm6, %v3583_v13, %v3577_v11 }
0x17fa   :  { %v3581_v31 = vpop.permute.xlu1 %3580 }
0x17fb   :  { %v3586_v42 = vsel %vm3585_vm7, %v3584_v20, %v3581_v31 }
0x17fc   :  { %3833 = vst [vmem:[%s6722_s13] sm:$0xff] %v3586_v42  ;;  %3676 = vmatmul.mubr.f32.vlgmr.msra.gmra.mxu0 %v3586_v42  ;;  %s3842_s13 = sshll.u32 %s4982_s11, 4  ;;  %s3843_s13 = int_to_ptr.vmem [resolvable:$true] %s3842_s13 }
0x17fd   :  { %s4950_s20 = scalar_lea.vmem %s3843_s13, 32  ;;  %p4955_p1 = scmp.lt.s32.totalorder %s3843_s13, %s3843_s13 }
0x17fe   :  { %p4951_p0 = scmp.ne.s32.totalorder %s3843_s13, %s4950_s20  ;;  %p4956_p2 = scmp.lt.s32.totalorder %s4950_s20, %s4950_s20 }
0x1800   :  { %p4957_p3 = por %p4956_p2, %p4955_p1 }
0x1802   :  { %p4958_p4 = pnand %p4957_p3, %p4951_p0 }
0x18bc   :  { %v3677_v36 = vpop.f32.mrf.mxu0 }
0x18bd   :  { %v3681_v29 = vmul.f32 %v3677_v36, %v3607_v27 }
0x18be   :  { %v3679_v2 = vpop.f32.mrf.mxu0 }
0x18bf   :  { %4674 = vmatmul.mubr.msk.f32.vlgmr.msra.gmra.mxu1 %vm84_vm1, %v3681_v29 }
0x18c0   :  { %4678 = vmatprep.mubr.msk.f32.mxu1 %vm4978_vm2, %v4973_v24 }
0x197f   :  { %v3751_v37 = vpop.f32.mrf.mxu1 }
0x1980   :  { %4677 = vmatpush3.msra.mxu1 %v3751_v37 }
0x1981   :  { %v4675_v15 = vpop.f32.mrf.mxu1  ;;  %4679 = vmatmul.mubr.msk.f32.vlgmr.msra.gmra.mxu1 %vm3759_vm8, %v46_v5 }
0x1a41   :  { %v3829_v9 = vpop.f32.mrf.mxu1 }
0x1a42   :  { %v3830_v54 = vadd.f32 %v3829_v9, %v3758_v14 }
0x1a43   :  { %v4680_v51 = vpop.f32.mrf.mxu1 }
0x1a44   :  { %3835 = vst [vmem:[#allocation2] sm:$0x3] %v3830_v54 }
0x1a45   :  { %4961 = shalt.err (!%p4958_p4)
}
0x1a46   :  { %3845 = dma.vmem_to_hbm [thread:$0]  %s3843_s13, 32, %s6721_s12, [#allocation3]  }
0x1a47   :  { %4970 = dma.done.wait [#allocation3], 32  }
0x1a48   :  { %4971 = vsyncadd [#allocation3], 4294967264 }
0x1a49   :  { %3853 = vsyncpa [#allocation3], 1 }

</bundles_post_ra>
